<compile_context>
chip_gen: v6e
topology: v6e:2x2x1
jax: 0.10.0
libtpu: 0.0.40
codegen_flags: <defaults>
</compile_context>

<pallas_src>
import functools

import numpy as np
import jax
import jax.numpy as jnp
from jax import lax
from jax.experimental import pallas as pl
from jax.experimental.pallas import tpu as pltpu  # noqa: F401  (TPU backend)

KSIZE = 5
STRIDE = 2
PAD = 2
NUM_CONV_LAYERS = 4
FC_HIDDEN = [128]
LANES = 128


# ------------------------------ Pallas kernel --------------------------------
def _fused_net_kernel(*refs, n_layers):
    """refs = (x_ref, w1, b1, w2, b2, ..., wL, bL, o_ref).

    Chains L x [matmul (bf16 in, f32 acc) + bias + ReLU] fully in VMEM; the last
    layer has no activation.  Every operand is a single full-array VMEM block.
    """
    x_ref = refs[0]
    o_ref = refs[-1]
    wb = refs[1:-1]
    h = x_ref[...].astype(jnp.bfloat16)
    acc = None
    for i in range(n_layers):
        w_ref = wb[2 * i]
        b_ref = wb[2 * i + 1]
        acc = jnp.dot(h, w_ref[...], preferred_element_type=jnp.float32)
        acc = acc + b_ref[...]            # (1, N) f32 bias broadcast over rows
        if i < n_layers - 1:
            acc = jnp.maximum(acc, 0.0)   # ReLU in f32
            h = acc.astype(jnp.bfloat16)  # next layer's MXU input
    o_ref[...] = acc.astype(o_ref.dtype)


def fused_forward_pallas(x_flat, packed):
    """y_padded = fused net forward.  x_flat: (B, K0) f32; packed: [(W bf16, b f32)]."""
    B = x_flat.shape[0]
    n_out = packed[-1][0].shape[1]
    operands = [x_flat]
    in_specs = [pl.BlockSpec(x_flat.shape, lambda: (0, 0))]
    for (w, b) in packed:
        operands += [w, b]
        in_specs += [pl.BlockSpec(w.shape, lambda: (0, 0)),
                     pl.BlockSpec(b.shape, lambda: (0, 0))]
    kernel = functools.partial(_fused_net_kernel, n_layers=len(packed))
    return pl.pallas_call(
        kernel,
        out_shape=jax.ShapeDtypeStruct((B, n_out), jnp.float32),
        in_specs=in_specs,
        out_specs=pl.BlockSpec((B, n_out), lambda: (0, 0)),  # lane-dense (N=128k)
    )(*operands)


# ------------------- one-off parameter construction (host) -------------------
def _round_up(n, m):
    return ((n + m - 1) // m) * m


def init_model_params(key, in_channels, out_dim, spatial):
    """Synthetic deterministic params in their 'logical' (conv / fc) form."""
    conv_params = []   # list of (w_hwio [k,k,cin,cout] f32, b [cout] f32)
    c_in, c_out, h = in_channels, 16, spatial
    for _ in range(NUM_CONV_LAYERS):
        key, kw_, kb_ = jax.random.split(key, 3)
        fan_in = KSIZE * KSIZE * c_in
        w = jax.random.normal(kw_, (KSIZE, KSIZE, c_in, c_out), jnp.float32) / np.sqrt(fan_in)
        b = jax.random.normal(kb_, (c_out,), jnp.float32) * 0.01
        conv_params.append((w, b))
        c_in, c_out = c_out, c_out * 2
        h = (h + 2 * PAD - KSIZE) // STRIDE + 1
    flat_dim = c_in * h * h
    fc_params = []
    dims = [flat_dim] + FC_HIDDEN + [out_dim]
    for d_in, d_out in zip(dims[:-1], dims[1:]):
        key, kw_, kb_ = jax.random.split(key, 3)
        w = jax.random.normal(kw_, (d_in, d_out), jnp.float32) / np.sqrt(d_in)
        b = jax.random.normal(kb_, (d_out,), jnp.float32) * 0.01
        fc_params.append((w, b))
    return conv_params, fc_params


def _unroll_conv_matrix(w_hwio, bias, H, W, stride, pad):
    """Fold a strided conv into its Toeplitz matrix: (H*W*Cin, Ho*Wo*Cout).

    Input/output flattening order is (h, w, c) — matching NHWC .reshape(B, -1).
    """
    k, _, cin, cout = w_hwio.shape
    Ho = (H + 2 * pad - k) // stride + 1
    Wo = (W + 2 * pad - k) // stride + 1
    M = np.zeros((H * W * cin, Ho * Wo * cout), np.float32)
    for ho in range(Ho):
        for wo in range(Wo):
            ob = (ho * Wo + wo) * cout
            for kh in range(k):
                hi = ho * stride - pad + kh
                if hi < 0 or hi >= H:
                    continue
                for kw in range(k):
                    wi = wo * stride - pad + kw
                    if wi < 0 or wi >= W:
                        continue
                    ib = (hi * W + wi) * cin
                    M[ib:ib + cin, ob:ob + cout] = w_hwio[kh, kw]
    b_full = np.tile(bias, Ho * Wo)  # bias[c] at every spatial position
    return M, b_full, Ho, Wo


def _pad_kn(w, b):
    """Zero-pad K and N up to multiples of 128 (lane-dense MXU / stores)."""
    K, N = w.shape
    Kp, Np = _round_up(K, LANES), _round_up(N, LANES)
    if (Kp, Np) != (K, N):
        w = np.pad(w, ((0, Kp - K), (0, Np - N)))
        b = np.pad(b, (0, Np - N))
    return w, b


def pack_for_kernel(conv_params, fc_params, spatial):
    """Build the per-layer (W bf16 (K,N), bias f32 (1,N)) operands for the kernel."""
    packed = []
    h = w_sp = spatial
    for (w_hwio, b) in conv_params:
        M, b_full, h, w_sp = _unroll_conv_matrix(
            np.asarray(w_hwio), np.asarray(b), h, w_sp, STRIDE, PAD)
        M, b_full = _pad_kn(M, b_full)
        packed.append((jnp.asarray(M, jnp.bfloat16),
                       jnp.asarray(b_full, jnp.float32).reshape(1, -1)))
    for (w, b) in fc_params:
        w_np, b_np = _pad_kn(np.asarray(w), np.asarray(b))
        packed.append((jnp.asarray(w_np, jnp.bfloat16),
                       jnp.asarray(b_np, jnp.float32).reshape(1, -1)))
    return packed


# ------------------------------- forward pass --------------------------------
def cla_attr_det_forward(packed_params, x_nchw, out_dim):
    B = x_nchw.shape[0]
    # NCHW (PyTorch) -> NHWC -> flatten in (h, w, c) order to match the Toeplitz
    # weight construction.
    x_flat = jnp.transpose(x_nchw, (0, 2, 3, 1)).astype(jnp.float32).reshape(B, -1)
    k_in = packed_params[0][0].shape[0]
    if x_flat.shape[1] != k_in:  # first-layer K padded to a lane multiple
        x_flat = jnp.pad(x_flat, ((0, 0), (0, k_in - x_flat.shape[1])))
    y_padded = fused_forward_pallas(x_flat, packed_params)
    return y_padded[:, :out_dim]  # drop the zero-padded lanes


def decode_logits(y, nclasses, ncond):
    return y[:, :nclasses], y[:, nclasses:nclasses + ncond]


# ------------------------------ references -----------------------------------
def packed_matmul_reference(packed, x_flat, out_dim):
    """Same matmul chain as the kernel (bf16 in, f32 acc), in plain XLA."""
    h = x_flat.astype(jnp.bfloat16)
    n = len(packed)
    acc = None
    for i, (w, b) in enumerate(packed):
        acc = jnp.dot(h, w, preferred_element_type=jnp.float32) + b
        if i < n - 1:
            acc = jnp.maximum(acc, 0.0)
            h = acc.astype(jnp.bfloat16)
    return acc[:, :out_dim]


def reference_forward(conv_params, fc_params, x_nchw):
    """Pure-JAX f32 conv/FC reference of the module semantics."""
    x = jnp.transpose(x_nchw, (0, 2, 3, 1)).astype(jnp.float32)
    for (w_hwio, b) in conv_params:
        x = lax.conv_general_dilated(
            x, w_hwio, window_strides=(STRIDE, STRIDE),
            padding=[(PAD, PAD), (PAD, PAD)],
            dimension_numbers=("NHWC", "HWIO", "NHWC"))
        x = jnp.maximum(x + b, 0.0)
    x = x.reshape(x.shape[0], -1)
    n_fc = len(fc_params)
    for i, (w, b) in enumerate(fc_params):
        x = x @ w + b
        if i != n_fc - 1:
            x = jnp.maximum(x, 0.0)
    return x


if __name__ == "__main__":
    # Module config (small, synthetic): input_shape = (4, 16, 16) CHW,
    # nclasses = 3, attributes = [[a, b], [c, d, e]] -> nconditional_ldims = 5.
    nclasses = 3
    attributes = [["a", "b"], ["c", "d", "e"]]
    ncond = sum(len(a) for a in attributes)
    out_dim = nclasses + ncond  # 8

    key = jax.random.PRNGKey(0)
    key, kx = jax.random.split(key)
    x = jax.random.normal(kx, (2, 4, 16, 16), jnp.float32)  # NCHW like PyTorch

    conv_params, fc_params = init_model_params(
        jax.random.PRNGKey(42), in_channels=4, out_dim=out_dim, spatial=16)
    packed = pack_for_kernel(conv_params, fc_params, spatial=16)

    fwd = jax.jit(functools.partial(cla_attr_det_forward, out_dim=out_dim))
    y = jax.block_until_ready(fwd(packed, x))
    assert y.shape == (2, out_dim), y.shape

    cls_logits, attr_logits = decode_logits(y, nclasses, ncond)
    assert cls_logits.shape == (2, nclasses) and attr_logits.shape == (2, ncond)

    # Tight check: Pallas kernel vs the identical bf16/f32 matmul chain in XLA.
    x_flat = jnp.transpose(x, (0, 2, 3, 1)).astype(jnp.float32).reshape(2, -1)
    y_mm = jax.block_until_ready(packed_matmul_reference(packed, x_flat, out_dim))
    assert jnp.allclose(y, y_mm, rtol=1e-3, atol=1e-3), (
        "kernel vs matmul-chain mismatch", float(jnp.abs(y - y_mm).max()))

    # Loose check: vs the f32 conv/FC reference (kernel uses bf16 MXU inputs).
    y_ref = jax.block_until_ready(reference_forward(conv_params, fc_params, x))
    assert jnp.allclose(y, y_ref, rtol=5e-2, atol=5e-2), (
        "kernel vs conv reference mismatch", float(jnp.abs(y - y_ref).max()))

    print("KERNEL_OK")
</pallas_src>

<mosaic_0001>
module attributes {stable_mosaic.version = 11 : i64} {
  func.func @_fused_net_kernel(%arg0: memref<2x1024xf32, #tpu.memory_space<vmem>>, %arg1: memref<1024x1024xbf16, #tpu.memory_space<vmem>>, %arg2: memref<1x1024xf32, #tpu.memory_space<vmem>>, %arg3: memref<1024x512xbf16, #tpu.memory_space<vmem>>, %arg4: memref<1x512xf32, #tpu.memory_space<vmem>>, %arg5: memref<512x256xbf16, #tpu.memory_space<vmem>>, %arg6: memref<1x256xf32, #tpu.memory_space<vmem>>, %arg7: memref<256x128xbf16, #tpu.memory_space<vmem>>, %arg8: memref<1x128xf32, #tpu.memory_space<vmem>>, %arg9: memref<128x128xbf16, #tpu.memory_space<vmem>>, %arg10: memref<1x128xf32, #tpu.memory_space<vmem>>, %arg11: memref<128x128xbf16, #tpu.memory_space<vmem>>, %arg12: memref<1x128xf32, #tpu.memory_space<vmem>>, %arg13: memref<2x128xf32, #tpu.memory_space<vmem>>) attributes {dimension_semantics = [], scalar_prefetch = 0 : i64, scratch_operands = 0 : i64, tpu.core_type = #tpu.core_type<tc>} {
    %c0 = arith.constant 0 : index
    %c0_0 = arith.constant 0 : index
    %0 = vector.load %arg0[%c0, %c0_0] : memref<2x1024xf32, #tpu.memory_space<vmem>>, vector<2x1024xf32>
    %1 = arith.truncf %0 : vector<2x1024xf32> to vector<2x1024xbf16>
    %c0_1 = arith.constant 0 : index
    %c0_2 = arith.constant 0 : index
    %2 = vector.load %arg1[%c0_1, %c0_2] : memref<1024x1024xbf16, #tpu.memory_space<vmem>>, vector<1024x1024xbf16>
    %cst = arith.constant dense<0.000000e+00> : vector<2x1024xf32>
    %3 = tpu.matmul %1, %2, %cst {dimension_numbers = #tpu.dot_dimension_numbers<[1], [0], [0], [1], [0, 0, 1, 1], [], []>} : vector<2x1024xbf16>, vector<1024x1024xbf16>, vector<2x1024xf32> -> vector<2x1024xf32>
    %c0_3 = arith.constant 0 : index
    %c0_4 = arith.constant 0 : index
    %4 = vector.load %arg2[%c0_3, %c0_4] : memref<1x1024xf32, #tpu.memory_space<vmem>>, vector<1x1024xf32>
    %5 = vector.broadcast %4 : vector<1x1024xf32> to vector<2x1024xf32>
    %6 = arith.addf %3, %5 : vector<2x1024xf32>
    %cst_5 = arith.constant 0.000000e+00 : f32
    %7 = vector.broadcast %cst_5 : f32 to vector<2x1024xf32>
    %8 = arith.maximumf %6, %7 : vector<2x1024xf32>
    %9 = arith.truncf %8 : vector<2x1024xf32> to vector<2x1024xbf16>
    %c0_6 = arith.constant 0 : index
    %c0_7 = arith.constant 0 : index
    %10 = vector.load %arg3[%c0_6, %c0_7] : memref<1024x512xbf16, #tpu.memory_space<vmem>>, vector<1024x512xbf16>
    %cst_8 = arith.constant dense<0.000000e+00> : vector<2x512xf32>
    %11 = tpu.matmul %9, %10, %cst_8 {dimension_numbers = #tpu.dot_dimension_numbers<[1], [0], [0], [1], [0, 0, 1, 1], [], []>} : vector<2x1024xbf16>, vector<1024x512xbf16>, vector<2x512xf32> -> vector<2x512xf32>
    %c0_9 = arith.constant 0 : index
    %c0_10 = arith.constant 0 : index
    %12 = vector.load %arg4[%c0_9, %c0_10] : memref<1x512xf32, #tpu.memory_space<vmem>>, vector<1x512xf32>
    %13 = vector.broadcast %12 : vector<1x512xf32> to vector<2x512xf32>
    %14 = arith.addf %11, %13 : vector<2x512xf32>
    %cst_11 = arith.constant 0.000000e+00 : f32
    %15 = vector.broadcast %cst_11 : f32 to vector<2x512xf32>
    %16 = arith.maximumf %14, %15 : vector<2x512xf32>
    %17 = arith.truncf %16 : vector<2x512xf32> to vector<2x512xbf16>
    %c0_12 = arith.constant 0 : index
    %c0_13 = arith.constant 0 : index
    %18 = vector.load %arg5[%c0_12, %c0_13] : memref<512x256xbf16, #tpu.memory_space<vmem>>, vector<512x256xbf16>
    %cst_14 = arith.constant dense<0.000000e+00> : vector<2x256xf32>
    %19 = tpu.matmul %17, %18, %cst_14 {dimension_numbers = #tpu.dot_dimension_numbers<[1], [0], [0], [1], [0, 0, 1, 1], [], []>} : vector<2x512xbf16>, vector<512x256xbf16>, vector<2x256xf32> -> vector<2x256xf32>
    %c0_15 = arith.constant 0 : index
    %c0_16 = arith.constant 0 : index
    %20 = vector.load %arg6[%c0_15, %c0_16] : memref<1x256xf32, #tpu.memory_space<vmem>>, vector<1x256xf32>
    %21 = vector.broadcast %20 : vector<1x256xf32> to vector<2x256xf32>
    %22 = arith.addf %19, %21 : vector<2x256xf32>
    %cst_17 = arith.constant 0.000000e+00 : f32
    %23 = vector.broadcast %cst_17 : f32 to vector<2x256xf32>
    %24 = arith.maximumf %22, %23 : vector<2x256xf32>
    %25 = arith.truncf %24 : vector<2x256xf32> to vector<2x256xbf16>
    %c0_18 = arith.constant 0 : index
    %c0_19 = arith.constant 0 : index
    %26 = vector.load %arg7[%c0_18, %c0_19] : memref<256x128xbf16, #tpu.memory_space<vmem>>, vector<256x128xbf16>
    %cst_20 = arith.constant dense<0.000000e+00> : vector<2x128xf32>
    %27 = tpu.matmul %25, %26, %cst_20 {dimension_numbers = #tpu.dot_dimension_numbers<[1], [0], [0], [1], [0, 0, 1, 1], [], []>} : vector<2x256xbf16>, vector<256x128xbf16>, vector<2x128xf32> -> vector<2x128xf32>
    %c0_21 = arith.constant 0 : index
    %c0_22 = arith.constant 0 : index
    %28 = vector.load %arg8[%c0_21, %c0_22] : memref<1x128xf32, #tpu.memory_space<vmem>>, vector<1x128xf32>
    %29 = vector.broadcast %28 : vector<1x128xf32> to vector<2x128xf32>
    %30 = arith.addf %27, %29 : vector<2x128xf32>
    %cst_23 = arith.constant 0.000000e+00 : f32
    %31 = vector.broadcast %cst_23 : f32 to vector<2x128xf32>
    %32 = arith.maximumf %30, %31 : vector<2x128xf32>
    %33 = arith.truncf %32 : vector<2x128xf32> to vector<2x128xbf16>
    %c0_24 = arith.constant 0 : index
    %c0_25 = arith.constant 0 : index
    %34 = vector.load %arg9[%c0_24, %c0_25] : memref<128x128xbf16, #tpu.memory_space<vmem>>, vector<128x128xbf16>
    %cst_26 = arith.constant dense<0.000000e+00> : vector<2x128xf32>
    %35 = tpu.matmul %33, %34, %cst_26 {dimension_numbers = #tpu.dot_dimension_numbers<[1], [0], [0], [1], [0, 0, 1, 1], [], []>} : vector<2x128xbf16>, vector<128x128xbf16>, vector<2x128xf32> -> vector<2x128xf32>
    %c0_27 = arith.constant 0 : index
    %c0_28 = arith.constant 0 : index
    %36 = vector.load %arg10[%c0_27, %c0_28] : memref<1x128xf32, #tpu.memory_space<vmem>>, vector<1x128xf32>
    %37 = vector.broadcast %36 : vector<1x128xf32> to vector<2x128xf32>
    %38 = arith.addf %35, %37 : vector<2x128xf32>
    %cst_29 = arith.constant 0.000000e+00 : f32
    %39 = vector.broadcast %cst_29 : f32 to vector<2x128xf32>
    %40 = arith.maximumf %38, %39 : vector<2x128xf32>
    %41 = arith.truncf %40 : vector<2x128xf32> to vector<2x128xbf16>
    %c0_30 = arith.constant 0 : index
    %c0_31 = arith.constant 0 : index
    %42 = vector.load %arg11[%c0_30, %c0_31] : memref<128x128xbf16, #tpu.memory_space<vmem>>, vector<128x128xbf16>
    %cst_32 = arith.constant dense<0.000000e+00> : vector<2x128xf32>
    %43 = tpu.matmul %41, %42, %cst_32 {dimension_numbers = #tpu.dot_dimension_numbers<[1], [0], [0], [1], [0, 0, 1, 1], [], []>} : vector<2x128xbf16>, vector<128x128xbf16>, vector<2x128xf32> -> vector<2x128xf32>
    %c0_33 = arith.constant 0 : index
    %c0_34 = arith.constant 0 : index
    %44 = vector.load %arg12[%c0_33, %c0_34] : memref<1x128xf32, #tpu.memory_space<vmem>>, vector<1x128xf32>
    %45 = vector.broadcast %44 : vector<1x128xf32> to vector<2x128xf32>
    %46 = arith.addf %43, %45 : vector<2x128xf32>
    %c0_35 = arith.constant 0 : index
    %c0_36 = arith.constant 0 : index
    %47 = vector.load %arg13[%c0_35, %c0_36] : memref<2x128xf32, #tpu.memory_space<vmem>>, vector<2x128xf32>
    tpu.vector_store %arg13[%c0_35, %c0_36], %46 {strides = array<i32>} : memref<2x128xf32, #tpu.memory_space<vmem>>, vector<2x128xf32>,
    return
  }
}

</mosaic_0001>

<bundles_post_ra>
// kernel: cla_attr_det_forward.1
= control target key start
LH: loop header
LB: loop body
LE: loop exit
PB: predicated region body
PF: predicated region fallthrough
CT: control target
= control target key end

     0   :  { %18 = vsyncpa [#allocation3], 0  ;;  %s8978_s0 = inlined_call_operand.vmem [shape: f32[2,1024], index: 0, kind: input, shape index: {}]   ;;  %s8979_s1 = inlined_call_operand.hbm [shape: bf16[1024,1024], index: 1, kind: input, shape index: {}]   ;;  %s8980_s2 = inlined_call_operand.hbm [shape: f32[1,1024], index: 2, kind: input, shape index: {}]   ;;  %s8981_s3 = inlined_call_operand.hbm [shape: bf16[1024,512], index: 3, kind: input, shape index: {}]   ;;  %s8982_s4 = inlined_call_operand.hbm [shape: f32[1,512], index: 4, kind: input, shape index: {}]   ;;  %s8983_s5 = inlined_call_operand.hbm [shape: bf16[512,256], index: 5, kind: input, shape index: {}]   ;;  %s8984_s6 = inlined_call_operand.hbm [shape: f32[1,256], index: 6, kind: input, shape index: {}]   ;;  %s8985_s7 = inlined_call_operand.hbm [shape: bf16[256,128], index: 7, kind: input, shape index: {}]   ;;  %s8986_s8 = inlined_call_operand.hbm [shape: f32[1,128], index: 8, kind: input, shape index: {}]   ;;  %s8987_s9 = inlined_call_operand.hbm [shape: bf16[128,128], index: 9, kind: input, shape index: {}]   ;;  %s8988_s10 = inlined_call_operand.hbm [shape: f32[1,128], index: 10, kind: input, shape index: {}]   ;;  %s8989_s11 = inlined_call_operand.hbm [shape: bf16[128,128], index: 11, kind: input, shape index: {}]   ;;  %s8990_s12 = inlined_call_operand.hbm [shape: f32[1,128], index: 12, kind: input, shape index: {}]   ;;  %s8991_s13 = inlined_call_operand.hbm [shape: f32[2,128], index: 13, kind: output, shape index: {}]  }
   0x1   :  { %19 = vsyncpa [#allocation6], 0 }
   0x2   :  { %20 = vsyncpa [#allocation9], 0 }
   0x3   :  { %21 = vsyncpa [#allocation12], 0 }
   0x4   :  { %22 = vsyncpa [#allocation15], 0 }
   0x5   :  { %23 = vsyncpa [#allocation18], 0 }
   0x6   :  { %24 = vsyncpa [#allocation21], 0 }
   0x7   :  { %25 = vsyncpa [#allocation4], 0  ;;  %s8598_s25 = smov [#allocation5]   ;;  %s8599_s27 = smov [#allocation8]  }
   0x8   :  { %s46_s26 = sshll.u32 %s8598_s25, 4  ;;  %s68_s28 = sshll.u32 %s8599_s27, 4  ;;  %s47_s26 = int_to_ptr.vmem [resolvable:$true] %s46_s26  ;;  %s69_s28 = int_to_ptr.vmem [resolvable:$true] %s68_s28 }
   0x9   :  { %s8330_s29 = scalar_lea.vmem %s47_s26, 128  ;;  %p8335_p1 = scmp.lt.s32.totalorder %s47_s26, %s47_s26 }
   0xa   :  { %p8331_p0 = scmp.ne.s32.totalorder %s47_s26, %s8330_s29  ;;  %p8336_p2 = scmp.lt.s32.totalorder %s8330_s29, %s8330_s29 }
   0xc   :  { %p8337_p3 = por %p8336_p2, %p8335_p1 }
   0xe   :  { %p8338_p4 = pnand %p8337_p3, %p8331_p0 }
  0x10   :  { %8341 = shalt.err (!%p8338_p4)
}
  0x11   :  { %49 = dma.hbm_to_vmem [thread:$0]  %s8980_s2, 128, %s47_s26, [#allocation6]  }
  0x12   :  { %s8350_s15 = scalar_lea.vmem %s69_s28, 64  ;;  %p8355_p6 = scmp.lt.s32.totalorder %s69_s28, %s69_s28 }
  0x13   :  { %p8351_p5 = scmp.ne.s32.totalorder %s69_s28, %s8350_s15  ;;  %p8356_p7 = scmp.lt.s32.totalorder %s8350_s15, %s8350_s15 }
  0x15   :  { %p8357_p8 = por %p8356_p7, %p8355_p6 }
  0x17   :  { %p8358_p9 = pnand %p8357_p8, %p8351_p5 }
  0x19   :  { %8361 = shalt.err (!%p8358_p9)
}
  0x1a   :  { %71 = dma.hbm_to_vmem [thread:$0]  %s8982_s4, 64, %s69_s28, [#allocation9]  }
  0x1b   :  { %s8600_s18 = smov [#allocation11]   ;;  %s8601_s20 = smov [#allocation14]  }
  0x1c   :  { %s90_s19 = sshll.u32 %s8600_s18, 4  ;;  %s112_s21 = sshll.u32 %s8601_s20, 4  ;;  %s91_s19 = int_to_ptr.vmem [resolvable:$true] %s90_s19  ;;  %s113_s21 = int_to_ptr.vmem [resolvable:$true] %s112_s21 }
  0x1d   :  { %s8370_s22 = scalar_lea.vmem %s91_s19, 32  ;;  %p8375_p11 = scmp.lt.s32.totalorder %s91_s19, %s91_s19 }
  0x1e   :  { %p8371_p10 = scmp.ne.s32.totalorder %s91_s19, %s8370_s22  ;;  %p8376_p12 = scmp.lt.s32.totalorder %s8370_s22, %s8370_s22 }
  0x20   :  { %p8377_p13 = por %p8376_p12, %p8375_p11 }
  0x22   :  { %p8378_p0 = pnand %p8377_p13, %p8371_p10 }
  0x24   :  { %8381 = shalt.err (!%p8378_p0)
}
  0x25   :  { %93 = dma.hbm_to_vmem [thread:$0]  %s8984_s6, 32, %s91_s19, [#allocation12]  }
  0x26   :  { %s8390_s24 = scalar_lea.vmem %s113_s21, 16  ;;  %s8394_s4 = scalar_lea.vmem %s113_s21, 32 }
  0x27   :  { %p8391_p1 = scmp.ne.s32.totalorder %s113_s21, %s8390_s24  ;;  %p8395_p2 = scmp.lt.s32.totalorder %s113_s21, %s113_s21 }
  0x28   :  { %p8396_p3 = scmp.lt.s32.totalorder %s8394_s4, %s8390_s24 }
  0x2a   :  { %p8397_p4 = por %p8396_p3, %p8395_p2 }
  0x2c   :  { %p8398_p5 = pnand %p8397_p4, %p8391_p1 }
  0x2e   :  { %8401 = shalt.err (!%p8398_p5)
}
  0x2f   :  { %115 = dma.hbm_to_vmem [thread:$0]  %s8986_s8, 16, %s113_s21, [#allocation15]  }
  0x30   :  { %s8602_s27 = smov [#allocation17]   ;;  %s8603_s29 = smov [#allocation2]  }
  0x31   :  { %s134_s28 = sshll.u32 %s8602_s27, 4  ;;  %s33_s30 = sshll.u32 %s8603_s29, 4  ;;  %s135_s28 = int_to_ptr.vmem [resolvable:$true] %s134_s28  ;;  %s34_s30 = int_to_ptr.vmem [resolvable:$true] %s33_s30 }
  0x32   :  { %s8410_s14 = scalar_lea.vmem %s135_s28, 16  ;;  %s8414_s6 = scalar_lea.vmem %s135_s28, 32 }
  0x33   :  { %p8411_p6 = scmp.ne.s32.totalorder %s135_s28, %s8410_s14  ;;  %p8415_p7 = scmp.lt.s32.totalorder %s135_s28, %s135_s28 }
  0x34   :  { %p8416_p8 = scmp.lt.s32.totalorder %s8414_s6, %s8410_s14 }
  0x36   :  { %p8417_p9 = por %p8416_p8, %p8415_p7 }
  0x38   :  { %p8418_p10 = pnand %p8417_p9, %p8411_p6 }
  0x3a   :  { %8421 = shalt.err (!%p8418_p10)
}
  0x3b   :  { %137 = dma.hbm_to_vmem [thread:$0]  %s8988_s10, 16, %s135_s28, [#allocation18]  }
  0x3c   :  { %s8430_s17 = scalar_lea.vmem %s34_s30, 65536  ;;  %p8435_p12 = scmp.lt.s32.totalorder %s34_s30, %s34_s30 }
  0x3d   :  { %p8431_p11 = scmp.ne.s32.totalorder %s34_s30, %s8430_s17  ;;  %p8436_p13 = scmp.lt.s32.totalorder %s8430_s17, %s8430_s17 }
  0x3f   :  { %p8437_p0 = por %p8436_p13, %p8435_p12 }
  0x41   :  { %p8438_p1 = pnand %p8437_p0, %p8431_p11 }
  0x43   :  { %8441 = shalt.err (!%p8438_p1)
}
  0x44   :  { %s8604_s8 = smov 512   ;;  %s8605_s18 = smov 32  }
  0x45   :  { %39 = dma.hbm_to_vmem [thread:$0]  %s8979_s1, 65536, %s34_s30, [#allocation3], %s8604_s8, %s8604_s8, %s8605_s18  }
  0x46   :  { %s8606_s21 = smov [#allocation7]  }
  0x47   :  { %s55_s22 = sshll.u32 %s8606_s21, 4  ;;  %s56_s22 = int_to_ptr.vmem [resolvable:$true] %s55_s22 }
  0x48   :  { %s8450_s2 = scalar_lea.vmem %s56_s22, 32768  ;;  %p8455_p3 = scmp.lt.s32.totalorder %s56_s22, %s56_s22 }
  0x49   :  { %p8451_p2 = scmp.ne.s32.totalorder %s56_s22, %s8450_s2  ;;  %p8456_p4 = scmp.lt.s32.totalorder %s8450_s2, %s8450_s2 }
  0x4b   :  { %p8457_p5 = por %p8456_p4, %p8455_p3 }
  0x4d   :  { %p8458_p6 = pnand %p8457_p5, %p8451_p2 }
  0x4f   :  { %8461 = shalt.err (!%p8458_p6)
}
  0x50   :  { %s8607_s10 = smov 256   ;;  %s8608_s23 = smov 16  }
  0x51   :  { %61 = dma.hbm_to_vmem [thread:$0]  %s8981_s3, 32768, %s56_s22, [#allocation6], %s8607_s10, %s8607_s10, %s8608_s23  }
  0x52   :  { %s8609_s25 = smov [#allocation10]  }
  0x53   :  { %s77_s26 = sshll.u32 %s8609_s25, 4  ;;  %s78_s26 = int_to_ptr.vmem [resolvable:$true] %s77_s26 }
  0x54   :  { %s8470_s1 = scalar_lea.vmem %s78_s26, 8192  ;;  %p8475_p8 = scmp.lt.s32.totalorder %s78_s26, %s78_s26 }
  0x55   :  { %p8471_p7 = scmp.ne.s32.totalorder %s78_s26, %s8470_s1  ;;  %p8476_p9 = scmp.lt.s32.totalorder %s8470_s1, %s8470_s1 }
  0x57   :  { %p8477_p10 = por %p8476_p9, %p8475_p8 }
  0x59   :  { %p8478_p11 = pnand %p8477_p10, %p8471_p7 }
  0x5b   :  { %8481 = shalt.err (!%p8478_p11)
}
  0x5c   :  { %s8610_s27 = smov 128   ;;  %s8611_s28 = smov 8  }
  0x5d   :  { %83 = dma.hbm_to_vmem [thread:$0]  %s8983_s5, 8192, %s78_s26, [#allocation9], %s8610_s27, %s8610_s27, %s8611_s28  }
  0x5e   :  { %s8612_s14 = smov [#allocation13]  }
  0x5f   :  { %s99_s6 = sshll.u32 %s8612_s14, 4  ;;  %s100_s6 = int_to_ptr.vmem [resolvable:$true] %s99_s6 }
  0x60   :  { %s8490_s3 = scalar_lea.vmem %s100_s6, 2048  ;;  %p8495_p13 = scmp.lt.s32.totalorder %s100_s6, %s100_s6 }
  0x61   :  { %p8491_p12 = scmp.ne.s32.totalorder %s100_s6, %s8490_s3  ;;  %p8496_p0 = scmp.lt.s32.totalorder %s8490_s3, %s8490_s3 }
  0x63   :  { %p8497_p1 = por %p8496_p0, %p8495_p13 }
  0x65   :  { %p8498_p2 = pnand %p8497_p1, %p8491_p12 }
  0x67   :  { %8501 = shalt.err (!%p8498_p2)
}
  0x68   :  { %s8613_s15 = smov 64   ;;  %s8614_s16 = smov 4  }
  0x69   :  { %105 = dma.hbm_to_vmem [thread:$0]  %s8985_s7, 2048, %s100_s6, [#allocation12], %s8613_s15, %s8613_s15, %s8614_s16  }
  0x6a   :  { %s8615_s18 = smov [#allocation16]   ;;  %s8616_s5 = smov [#allocation19]  }
  0x6b   :  { %s121_s19 = sshll.u32 %s8615_s18, 4  ;;  %s143_s20 = sshll.u32 %s8616_s5, 4  ;;  %s122_s19 = int_to_ptr.vmem [resolvable:$true] %s121_s19  ;;  %s144_s20 = int_to_ptr.vmem [resolvable:$true] %s143_s20 }
  0x6c   :  { %s8510_s21 = scalar_lea.vmem %s122_s19, 1024  ;;  %p8515_p4 = scmp.lt.s32.totalorder %s122_s19, %s122_s19 }
  0x6d   :  { %p8511_p3 = scmp.ne.s32.totalorder %s122_s19, %s8510_s21  ;;  %p8516_p5 = scmp.lt.s32.totalorder %s8510_s21, %s8510_s21 }
  0x6f   :  { %p8517_p6 = por %p8516_p5, %p8515_p4 }
  0x71   :  { %p8518_p7 = pnand %p8517_p6, %p8511_p3 }
  0x73   :  { %8521 = shalt.err (!%p8518_p7)
}
  0x74   :  { %127 = dma.hbm_to_vmem [thread:$0]  %s8987_s9, 1024, %s122_s19, [#allocation15], %s8613_s15, %s8613_s15, %s8614_s16  }
  0x75   :  { %s8530_s10 = scalar_lea.vmem %s144_s20, 1024  ;;  %p8535_p9 = scmp.lt.s32.totalorder %s144_s20, %s144_s20 }
  0x76   :  { %p8531_p8 = scmp.ne.s32.totalorder %s144_s20, %s8530_s10  ;;  %p8536_p10 = scmp.lt.s32.totalorder %s8530_s10, %s8530_s10 }
  0x78   :  { %p8537_p11 = por %p8536_p10, %p8535_p9 }
  0x7a   :  { %p8538_p12 = pnand %p8537_p11, %p8531_p8 }
  0x7c   :  { %8541 = shalt.err (!%p8538_p12)
}
  0x7d   :  { %149 = dma.hbm_to_vmem [thread:$0]  %s8989_s11, 1024, %s144_s20, [#allocation18], %s8613_s15, %s8613_s15, %s8614_s16  }
  0x7e   :  { %s8617_s24 = smov [#allocation20]  }
  0x7f   :  { %s156_s4 = sshll.u32 %s8617_s24, 4  ;;  %s157_s4 = int_to_ptr.vmem [resolvable:$true] %s156_s4 }
  0x80   :  { %s8550_s25 = scalar_lea.vmem %s157_s4, 16  ;;  %s8554_s26 = scalar_lea.vmem %s157_s4, 32 }
  0x81   :  { %p8551_p13 = scmp.ne.s32.totalorder %s157_s4, %s8550_s25  ;;  %p8555_p0 = scmp.lt.s32.totalorder %s157_s4, %s157_s4 }
  0x82   :  { %p8556_p1 = scmp.lt.s32.totalorder %s8554_s26, %s8550_s25 }
  0x84   :  { %p8557_p2 = por %p8556_p1, %p8555_p0 }
  0x86   :  { %p8558_p3 = pnand %p8557_p2, %p8551_p13 }
  0x88   :  { %8561 = shalt.err (!%p8558_p3)
}
  0x89   :  { %159 = dma.hbm_to_vmem [thread:$0]  %s8990_s12, 16, %s157_s4, [#allocation21]  }
  0x8a   :  { %8582 = dma.done.wait [#allocation3], 65536  }
  0x8b   :  { %8583 = vsyncadd [#allocation3], 4294901760 }
  0x8c   :  { %8584 = dma.done.wait [#allocation6], 32896  }
  0x8d   :  { %8585 = vsyncadd [#allocation6], 4294934400 }
  0x8e   :  { %8586 = dma.done.wait [#allocation9], 8256  }
  0x8f   :  { %8587 = vsyncadd [#allocation9], 4294959040 }
  0x90   :  { %8588 = dma.done.wait [#allocation12], 2080  }
  0x91   :  { %8589 = vsyncadd [#allocation12], 4294965216 }
  0x92   :  { %8590 = dma.done.wait [#allocation15], 1040  }
  0x93   :  { %8591 = vsyncadd [#allocation15], 4294966256 }
  0x94   :  { %8592 = dma.done.wait [#allocation18], 1040  }
  0x95   :  { %8593 = vsyncadd [#allocation18], 4294966256 }
  0x96   :  { %8594 = dma.done.wait [#allocation21], 16  }
  0x97   :  { %8595 = vsyncadd [#allocation21], 4294967280  ;;  %v307_v0 = vld [vmem:[#allocation2 + $0x1c0] sm:$0xff]  ;;  %v8618_v32 = vmov 1983009808   ;;  %v205_v34 = vlaneseq  ;;  %vm8620_vm0 = vmmov 0  }
  0x98   :  { %v311_v1 = vld [vmem:[#allocation2 + $0x1e0] sm:$0xff]  ;;  %v203_v33 = vunpack.c.l.s4 %v8618_v32 }
  0x99   :  { %v435_v2 = vld [vmem:[#allocation2 + $0x5c0] sm:$0xff]  ;;  %v6893_v3 = vcombine.high %v307_v0, %v311_v1  ;;  %v6892_v5 = vcombine.low %v307_v0, %v311_v1  ;;  %v8728_v44 = vshrl.u32 %v205_v34, 7 }
  0x9a   :  { %v439_v4 = vld [vmem:[#allocation2 + $0x5e0] sm:$0xff]  ;;  %v204_v43 = vunpack.c.0.s8 %v203_v33 }
  0x9b   :  { %v299_v6 = vld [vmem:[#allocation2 + $0x180] sm:$0xff]  ;;  %v7021_v8 = vcombine.high %v435_v2, %v439_v4  ;;  %v7020_v9 = vcombine.low %v435_v2, %v439_v4  ;;  %3365 = vmatprep.subr.bf16.mxu0 %v6893_v3 }
  0x9c   :  { %v303_v7 = vld [vmem:[#allocation2 + $0x1a0] sm:$0xff]  ;;  %3366 = vmatpush1.bf16.msra.mxu0 %v6892_v5  ;;  %v8731_v53 = vsub.s32 %v204_v43, %v8728_v44 }
  0x9d   :  { %v6885_v10 = vcombine.high %v299_v6, %v303_v7  ;;  %v427_v11 = vld [vmem:[#allocation2 + $0x580] sm:$0xff]  ;;  %3406 = vmatprep.subr.bf16.mxu1 %v7021_v8  ;;  %v6884_v18 = vcombine.low %v299_v6, %v303_v7 }
  0x9e   :  { %v431_v12 = vld [vmem:[#allocation2 + $0x5a0] sm:$0xff]  ;;  %3407 = vmatpush1.bf16.msra.mxu1 %v7020_v9 }
  0x9f   :  { %v291_v13 = vld [vmem:[#allocation2 + $0x140] sm:$0xff]  ;;  %v7013_v14 = vcombine.high %v427_v11, %v431_v12  ;;  %3367 = vmatprep.subr.bf16.mxu0 %v6885_v10  ;;  %v7012_v19 = vcombine.low %v427_v11, %v431_v12 }
  0xa0   :  { %v295_v15 = vld [vmem:[#allocation2 + $0x160] sm:$0xff]  ;;  %3368 = vmatpush1.bf16.msra.mxu0 %v6884_v18 }
  0xa1   :  { %v419_v16 = vld [vmem:[#allocation2 + $0x540] sm:$0xff]  ;;  %v6877_v20 = vcombine.high %v291_v13, %v295_v15  ;;  %3408 = vmatprep.subr.bf16.mxu1 %v7013_v14  ;;  %v6876_v26 = vcombine.low %v291_v13, %v295_v15 }
  0xa2   :  { %v423_v17 = vld [vmem:[#allocation2 + $0x560] sm:$0xff]  ;;  %3409 = vmatpush1.bf16.msra.mxu1 %v7012_v19 }
  0xa3   :  { %v7005_v21 = vcombine.high %v419_v16, %v423_v17  ;;  %v283_v22 = vld [vmem:[#allocation2 + $0x100] sm:$0xff]  ;;  %3369 = vmatprep.subr.bf16.mxu0 %v6877_v20  ;;  %v7004_v27 = vcombine.low %v419_v16, %v423_v17 }
  0xa4   :  { %v287_v23 = vld [vmem:[#allocation2 + $0x120] sm:$0xff]  ;;  %3370 = vmatpush1.bf16.msra.mxu0 %v6876_v26 }
  0xa5   :  { %v411_v24 = vld [vmem:[#allocation2 + $0x500] sm:$0xff]  ;;  %v6869_v28 = vcombine.high %v283_v22, %v287_v23  ;;  %3410 = vmatprep.subr.bf16.mxu1 %v7005_v21  ;;  %v6868_v37 = vcombine.low %v283_v22, %v287_v23 }
  0xa6   :  { %v415_v25 = vld [vmem:[#allocation2 + $0x520] sm:$0xff]  ;;  %3411 = vmatpush1.bf16.msra.mxu1 %v7004_v27 }
  0xa7   :  { %v6997_v29 = vcombine.high %v411_v24, %v415_v25  ;;  %v275_v30 = vld [vmem:[#allocation2 + $0xc0] sm:$0xff]  ;;  %3371 = vmatprep.subr.bf16.mxu0 %v6869_v28  ;;  %v6996_v38 = vcombine.low %v411_v24, %v415_v25 }
  0xa8   :  { %v279_v31 = vld [vmem:[#allocation2 + $0xe0] sm:$0xff]  ;;  %3372 = vmatpush1.bf16.msra.mxu0 %v6868_v37 }
  0xa9   :  { %v403_v35 = vld [vmem:[#allocation2 + $0x4c0] sm:$0xff]  ;;  %v6861_v39 = vcombine.high %v275_v30, %v279_v31  ;;  %3412 = vmatprep.subr.bf16.mxu1 %v6997_v29  ;;  %v6860_v47 = vcombine.low %v275_v30, %v279_v31 }
  0xaa   :  { %v407_v36 = vld [vmem:[#allocation2 + $0x4e0] sm:$0xff]  ;;  %3413 = vmatpush1.bf16.msra.mxu1 %v6996_v38 }
  0xab   :  { %v6989_v40 = vcombine.high %v403_v35, %v407_v36  ;;  %v267_v41 = vld [vmem:[#allocation2 + $0x80] sm:$0xff]  ;;  %3373 = vmatprep.subr.bf16.mxu0 %v6861_v39  ;;  %v6988_v48 = vcombine.low %v403_v35, %v407_v36 }
  0xac   :  { %v271_v42 = vld [vmem:[#allocation2 + $0xa0] sm:$0xff]  ;;  %3374 = vmatpush1.bf16.msra.mxu0 %v6860_v47 }
  0xad   :  { %v395_v45 = vld [vmem:[#allocation2 + $0x480] sm:$0xff]  ;;  %v6853_v49 = vcombine.high %v267_v41, %v271_v42  ;;  %3414 = vmatprep.subr.bf16.mxu1 %v6989_v40  ;;  %v6852_v56 = vcombine.low %v267_v41, %v271_v42 }
  0xae   :  { %v399_v46 = vld [vmem:[#allocation2 + $0x4a0] sm:$0xff]  ;;  %3415 = vmatpush1.bf16.msra.mxu1 %v6988_v48 }
  0xaf   :  { %v6981_v50 = vcombine.high %v395_v45, %v399_v46  ;;  %v259_v51 = vld [vmem:[#allocation2 + $0x40] sm:$0xff]  ;;  %3375 = vmatprep.subr.bf16.mxu0 %v6853_v49  ;;  %v6980_v57 = vcombine.low %v395_v45, %v399_v46 }
  0xb0   :  { %v263_v52 = vld [vmem:[#allocation2 + $0x60] sm:$0xff]  ;;  %3376 = vmatpush1.bf16.msra.mxu0 %v6852_v56 }
  0xb1   :  { %v387_v54 = vld [vmem:[#allocation2 + $0x440] sm:$0xff]  ;;  %v6845_v58 = vcombine.high %v259_v51, %v263_v52  ;;  %3416 = vmatprep.subr.bf16.mxu1 %v6981_v50  ;;  %v6844_v3 = vcombine.low %v259_v51, %v263_v52 }
  0xb2   :  { %v391_v55 = vld [vmem:[#allocation2 + $0x460] sm:$0xff]  ;;  %3417 = vmatpush1.bf16.msra.mxu1 %v6980_v57 }
  0xb3   :  { %v197_v59 = vld [vmem:[%s8978_s0] sm:$0xff]  ;;  %v6973_v60 = vcombine.high %v387_v54, %v391_v55  ;;  %3377 = vmatprep.subr.bf16.mxu0 %v6845_v58  ;;  %v6972_v6 = vcombine.low %v387_v54, %v391_v55 }
  0xb4   :  { %v251_v61 = vld [vmem:[#allocation2] sm:$0xff]  ;;  %v8737_v63 = vrot.slane %v197_v59, %v8731_v53  ;;  %v201_v0 = vcombine.high %v197_v59, %v197_v59  ;;  %3378 = vmatpush1.bf16.msra.mxu0 %v6844_v3 }
  0xb5   :  { %v255_v62 = vld [vmem:[#allocation2 + $0x20] sm:$0xff]  ;;  %3418 = vmatprep.subr.bf16.mxu1 %v6973_v60 }
  0xb6   :  { %v379_v1 = vld [vmem:[#allocation2 + $0x400] sm:$0xff]  ;;  %v216_v4 = vcombine.high %v8737_v63, %v8737_v63  ;;  %v8742_v5 = vrot.slane %v201_v0, %v8731_v53  ;;  %v6837_v7 = vcombine.high %v251_v61, %v255_v62  ;;  %v6836_v15 = vcombine.low %v251_v61, %v255_v62  ;;  %3419 = vmatpush1.bf16.msra.mxu1 %v6972_v6 }
  0xb7   :  { %v383_v2 = vld [vmem:[#allocation2 + $0x420] sm:$0xff] }
  0xb8   :  { %v6965_v8 = vcombine.high %v379_v1, %v383_v2  ;;  %v371_v9 = vld [vmem:[#allocation2 + $0x3c0] sm:$0xff]  ;;  %v8744_v11 = vpack.c.bf16 %v216_v4, %v216_v4  ;;  %v217_v12 = vcombine.high %v8742_v5, %v8742_v5  ;;  %3379 = vmatprep.subr.bf16.mxu0 %v6837_v7  ;;  %v6964_v17 = vcombine.low %v379_v1, %v383_v2  ;;  %v198_v4 = vld [vmem:[%s8978_s0 + $0x8] sm:$0xff]  ;;  %s8621_s0 = smov [#allocation22]  }
  0xb9   :  { %v375_v10 = vld [vmem:[#allocation2 + $0x3e0] sm:$0xff]  ;;  %3380 = vmatpush1.bf16.msra.mxu0 %v6836_v15  ;;  %s6821_s29 = sshll.u32 %s8621_s0, 4  ;;  %s6822_s29 = int_to_ptr.vmem [resolvable:$true] %s6821_s29 }
  0xba   :  { %v499_v13 = vld [vmem:[#allocation2 + $0x7c0] sm:$0xff]  ;;  %3397 = vmatprep.mubr.bf16.mxu0 %v8744_v11  ;;  %v8749_v16 = vpack.c.bf16 %v217_v12, %v217_v12  ;;  %v6957_v18 = vcombine.high %v371_v9, %v375_v10  ;;  %3420 = vmatprep.subr.bf16.mxu1 %v6965_v8  ;;  %v6956_v24 = vcombine.low %v371_v9, %v375_v10  ;;  %s8562_s30 = scalar_lea.vmem %s6822_s29, 32  ;;  %p8567_p5 = scmp.lt.s32.totalorder %s6822_s29, %s6822_s29 }
  0xbb   :  { %v503_v14 = vld [vmem:[#allocation2 + $0x7e0] sm:$0xff]  ;;  %3421 = vmatpush1.bf16.msra.mxu1 %v6964_v17  ;;  %p8563_p4 = scmp.ne.s32.totalorder %s6822_s29, %s8562_s30  ;;  %p8568_p6 = scmp.lt.s32.totalorder %s8562_s30, %s8562_s30 }
  0xbc   :  { %v7085_v19 = vcombine.high %v499_v13, %v503_v14  ;;  %v363_v20 = vld [vmem:[#allocation2 + $0x380] sm:$0xff]  ;;  %3438 = vmatprep.mubr.bf16.mxu1 %v8749_v16  ;;  %3381 = vmatprep.subr.bf16.mxu0 %v6957_v18  ;;  %v7084_v25 = vcombine.low %v499_v13, %v503_v14  ;;  %v218_v14 = vcombine.high %v198_v4, %v198_v4 }
  0xbd   :  { %v367_v21 = vld [vmem:[#allocation2 + $0x3a0] sm:$0xff]  ;;  %3382 = vmatpush2.bf16.msra.mxu0 %v6956_v24  ;;  %p8569_p7 = por %p8568_p6, %p8567_p5 }
  0xbe   :  { %v491_v22 = vld [vmem:[#allocation2 + $0x780] sm:$0xff]  ;;  %v6949_v26 = vcombine.high %v363_v20, %v367_v21  ;;  %3422 = vmatprep.subr.bf16.mxu1 %v7085_v19  ;;  %v6948_v32 = vcombine.low %v363_v20, %v367_v21 }
  0xbf   :  { %v495_v23 = vld [vmem:[#allocation2 + $0x7a0] sm:$0xff]  ;;  %3423 = vmatpush2.bf16.msra.mxu1 %v7084_v25  ;;  %v8759_v25 = vrot.slane %v218_v14, %v8731_v53  ;;  %p8570_p8 = pnand %p8569_p7, %p8563_p4 }
  0xc0   :  { %v7077_v27 = vcombine.high %v491_v22, %v495_v23  ;;  %v355_v28 = vld [vmem:[#allocation2 + $0x340] sm:$0xff]  ;;  %3383 = vmatprep.subr.bf16.mxu0 %v6949_v26  ;;  %v7076_v33 = vcombine.low %v491_v22, %v495_v23  ;;  %v8756_v22 = vrot.slane %v198_v4, %v8731_v53 }
  0xc1   :  { %v359_v29 = vld [vmem:[#allocation2 + $0x360] sm:$0xff]  ;;  %3384 = vmatpush2.bf16.msra.mxu0 %v6948_v32 }
  0xc2   :  { %v483_v30 = vld [vmem:[#allocation2 + $0x740] sm:$0xff]  ;;  %v6941_v34 = vcombine.high %v355_v28, %v359_v29  ;;  %3424 = vmatprep.subr.bf16.mxu1 %v7077_v27  ;;  %v6940_v40 = vcombine.low %v355_v28, %v359_v29  ;;  %v233_v32 = vcombine.high %v8756_v22, %v8756_v22 }
  0xc3   :  { %v487_v31 = vld [vmem:[#allocation2 + $0x760] sm:$0xff]  ;;  %3425 = vmatpush2.bf16.msra.mxu1 %v7076_v33  ;;  %v8765_v33 = vpack.c.bf16 %v8737_v63, %v8737_v63 }
  0xc4   :  { %v7069_v35 = vcombine.high %v483_v30, %v487_v31  ;;  %v347_v36 = vld [vmem:[#allocation2 + $0x300] sm:$0xff]  ;;  %3385 = vmatprep.subr.bf16.mxu0 %v6941_v34  ;;  %v7068_v41 = vcombine.low %v483_v30, %v487_v31 }
  0xc5   :  { %v351_v37 = vld [vmem:[#allocation2 + $0x320] sm:$0xff]  ;;  %3386 = vmatpush2.bf16.msra.mxu0 %v6940_v40 }
  0xc6   :  { %v475_v38 = vld [vmem:[#allocation2 + $0x700] sm:$0xff]  ;;  %v6933_v42 = vcombine.high %v347_v36, %v351_v37  ;;  %3426 = vmatprep.subr.bf16.mxu1 %v7069_v35  ;;  %v6932_v49 = vcombine.low %v347_v36, %v351_v37  ;;  %v234_v35 = vcombine.high %v8759_v25, %v8759_v25  ;;  %v8771_v36 = vpack.c.bf16 %v8742_v5, %v8742_v5 }
  0xc7   :  { %v479_v39 = vld [vmem:[#allocation2 + $0x720] sm:$0xff]  ;;  %3427 = vmatpush2.bf16.msra.mxu1 %v7068_v41 }
  0xc8   :  { %v7061_v43 = vcombine.high %v475_v38, %v479_v39  ;;  %v339_v45 = vld [vmem:[#allocation2 + $0x2c0] sm:$0xff]  ;;  %3387 = vmatprep.subr.bf16.mxu0 %v6933_v42  ;;  %v7060_v50 = vcombine.low %v475_v38, %v479_v39 }
  0xc9   :  { %v343_v46 = vld [vmem:[#allocation2 + $0x2e0] sm:$0xff]  ;;  %3388 = vmatpush2.bf16.msra.mxu0 %v6932_v49 }
  0xca   :  { %v467_v47 = vld [vmem:[#allocation2 + $0x6c0] sm:$0xff]  ;;  %v6925_v51 = vcombine.high %v339_v45, %v343_v46  ;;  %3428 = vmatprep.subr.bf16.mxu1 %v7061_v43  ;;  %v6924_v58 = vcombine.low %v339_v45, %v343_v46  ;;  %v8773_v45 = vpack.c.bf16 %v233_v32, %v233_v32  ;;  %v8776_v46 = vpack.c.bf16 %v234_v35, %v234_v35 }
  0xcb   :  { %v471_v48 = vld [vmem:[#allocation2 + $0x6e0] sm:$0xff]  ;;  %3429 = vmatpush2.bf16.msra.mxu1 %v7060_v50 }
  0xcc   :  { %v7053_v52 = vcombine.high %v467_v47, %v471_v48  ;;  %v331_v54 = vld [vmem:[#allocation2 + $0x280] sm:$0xff]  ;;  %3389 = vmatprep.subr.bf16.mxu0 %v6925_v51  ;;  %v7052_v59 = vcombine.low %v467_v47, %v471_v48 }
  0xcd   :  { %v335_v55 = vld [vmem:[#allocation2 + $0x2a0] sm:$0xff]  ;;  %3390 = vmatpush2.bf16.msra.mxu0 %v6924_v58 }
  0xce   :  { %v459_v56 = vld [vmem:[#allocation2 + $0x680] sm:$0xff]  ;;  %v6917_v60 = vcombine.high %v331_v54, %v335_v55  ;;  %3430 = vmatprep.subr.bf16.mxu1 %v7053_v52  ;;  %v6916_v3 = vcombine.low %v331_v54, %v335_v55 }
  0xcf   :  { %v463_v57 = vld [vmem:[#allocation2 + $0x6a0] sm:$0xff]  ;;  %3431 = vmatpush2.bf16.msra.mxu1 %v7052_v59 }
  0xd0   :  { %v7045_v61 = vcombine.high %v459_v56, %v463_v57  ;;  %v323_v62 = vld [vmem:[#allocation2 + $0x240] sm:$0xff]  ;;  %3391 = vmatprep.subr.bf16.mxu0 %v6917_v60  ;;  %v7044_v6 = vcombine.low %v459_v56, %v463_v57 }
  0xd1   :  { %v327_v0 = vld [vmem:[#allocation2 + $0x260] sm:$0xff]  ;;  %3392 = vmatpush2.bf16.msra.mxu0 %v6916_v3 }
  0xd2   :  { %v451_v1 = vld [vmem:[#allocation2 + $0x640] sm:$0xff]  ;;  %v6909_v7 = vcombine.high %v323_v62, %v327_v0  ;;  %3432 = vmatprep.subr.bf16.mxu1 %v7045_v61  ;;  %v6908_v15 = vcombine.low %v323_v62, %v327_v0 }
  0xd3   :  { %v455_v2 = vld [vmem:[#allocation2 + $0x660] sm:$0xff]  ;;  %3433 = vmatpush2.bf16.msra.mxu1 %v7044_v6 }
  0xd4   :  { %v7037_v8 = vcombine.high %v451_v1, %v455_v2  ;;  %v315_v9 = vld [vmem:[#allocation2 + $0x200] sm:$0xff]  ;;  %3393 = vmatprep.subr.bf16.mxu0 %v6909_v7  ;;  %v7036_v17 = vcombine.low %v451_v1, %v455_v2 }
  0xd5   :  { %v319_v10 = vld [vmem:[#allocation2 + $0x220] sm:$0xff]  ;;  %3394 = vmatpush2.bf16.msra.mxu0 %v6908_v15 }
  0xd6   :  { %v443_v12 = vld [vmem:[#allocation2 + $0x600] sm:$0xff]  ;;  %v6901_v18 = vcombine.high %v315_v9, %v319_v10  ;;  %3434 = vmatprep.subr.bf16.mxu1 %v7037_v8  ;;  %v6900_v26 = vcombine.low %v315_v9, %v319_v10 }
  0xd7   :  { %v447_v13 = vld [vmem:[#allocation2 + $0x620] sm:$0xff]  ;;  %3435 = vmatpush2.bf16.msra.mxu1 %v7036_v17 }
  0xd8   :  { %v7029_v19 = vcombine.high %v443_v12, %v447_v13  ;;  %v563_v20 = vld [vmem:[#allocation2 + $0x9c0] sm:$0xff]  ;;  %3395 = vmatprep.subr.bf16.mxu0 %v6901_v18  ;;  %v7028_v27 = vcombine.low %v443_v12, %v447_v13 }
  0xd9   :  { %v567_v21 = vld [vmem:[#allocation2 + $0x9e0] sm:$0xff]  ;;  %3396 = vmatpush2.bf16.msra.mxu0 %v6900_v26 }
  0xda   :  { %v691_v23 = vld [vmem:[#allocation2 + $0xdc0] sm:$0xff]  ;;  %v7149_v28 = vcombine.high %v563_v20, %v567_v21  ;;  %3436 = vmatprep.subr.bf16.mxu1 %v7029_v19  ;;  %v7148_v37 = vcombine.low %v563_v20, %v567_v21 }
  0xdb   :  { %v695_v24 = vld [vmem:[#allocation2 + $0xde0] sm:$0xff]  ;;  %3437 = vmatpush2.bf16.msra.mxu1 %v7028_v27 }
  0xdc   :  { %v7277_v29 = vcombine.high %v691_v23, %v695_v24  ;;  %v555_v30 = vld [vmem:[#allocation2 + $0x980] sm:$0xff]  ;;  %3447 = vmatprep.subr.bf16.mxu0 %v7149_v28  ;;  %v7276_v38 = vcombine.low %v691_v23, %v695_v24  ;;  %3398 = vmatmul.mubr.bf16.vlgmr.msra.gmra.mxu0 %v8765_v33 }
  0xdd   :  { %v559_v31 = vld [vmem:[#allocation2 + $0x9a0] sm:$0xff]  ;;  %3448 = vmatpush1.bf16.msra.mxu0 %v7148_v37  ;;  %3479 = vmatprep.mubr.bf16.mxu0 %v8773_v45 }
  0xde   :  { %v683_v34 = vld [vmem:[#allocation2 + $0xd80] sm:$0xff]  ;;  %v7141_v39 = vcombine.high %v555_v30, %v559_v31  ;;  %3488 = vmatprep.subr.bf16.mxu1 %v7277_v29  ;;  %3439 = vmatmul.mubr.bf16.vlgmr.msra.gmra.mxu1 %v8771_v36  ;;  %v7140_v5 = vcombine.low %v555_v30, %v559_v31 }
  0xdf   :  { %v687_v53 = vld [vmem:[#allocation2 + $0xda0] sm:$0xff]  ;;  %3489 = vmatpush1.bf16.msra.mxu1 %v7276_v38  ;;  %3520 = vmatprep.mubr.bf16.mxu1 %v8776_v46 }
  0xe0   :  { %v547_v40 = vld [vmem:[#allocation2 + $0x940] sm:$0xff]  ;;  %v7269_v63 = vcombine.high %v683_v34, %v687_v53  ;;  %3449 = vmatprep.subr.bf16.mxu0 %v7141_v39  ;;  %v7268_v47 = vcombine.low %v683_v34, %v687_v53 }
  0xe1   :  { %v551_v41 = vld [vmem:[#allocation2 + $0x960] sm:$0xff]  ;;  %3450 = vmatpush1.bf16.msra.mxu0 %v7140_v5 }
  0xe2   :  { %v675_v42 = vld [vmem:[#allocation2 + $0xd40] sm:$0xff]  ;;  %v7133_v48 = vcombine.high %v547_v40, %v551_v41  ;;  %3490 = vmatprep.subr.bf16.mxu1 %v7269_v63  ;;  %v7132_v55 = vcombine.low %v547_v40, %v551_v41 }
  0xe3   :  { %v679_v43 = vld [vmem:[#allocation2 + $0xd60] sm:$0xff]  ;;  %3491 = vmatpush1.bf16.msra.mxu1 %v7268_v47 }
  0xe4   :  { %v539_v49 = vld [vmem:[#allocation2 + $0x900] sm:$0xff]  ;;  %v7261_v52 = vcombine.high %v675_v42, %v679_v43  ;;  %3451 = vmatprep.subr.bf16.mxu0 %v7133_v48  ;;  %v7260_v56 = vcombine.low %v675_v42, %v679_v43 }
  0xe5   :  { %v543_v50 = vld [vmem:[#allocation2 + $0x920] sm:$0xff]  ;;  %3452 = vmatpush1.bf16.msra.mxu0 %v7132_v55 }
  0xe6   :  { %v667_v51 = vld [vmem:[#allocation2 + $0xd00] sm:$0xff]  ;;  %v7125_v57 = vcombine.high %v539_v49, %v543_v50  ;;  %3492 = vmatprep.subr.bf16.mxu1 %v7261_v52  ;;  %v7124_v0 = vcombine.low %v539_v49, %v543_v50 }
  0xe7   :  { %v671_v54 = vld [vmem:[#allocation2 + $0xd20] sm:$0xff]  ;;  %3493 = vmatpush1.bf16.msra.mxu1 %v7260_v56 }
  0xe8   :  { %v531_v58 = vld [vmem:[#allocation2 + $0x8c0] sm:$0xff]  ;;  %v7253_v61 = vcombine.high %v667_v51, %v671_v54  ;;  %3453 = vmatprep.subr.bf16.mxu0 %v7125_v57  ;;  %v7252_v1 = vcombine.low %v667_v51, %v671_v54 }
  0xe9   :  { %v535_v59 = vld [vmem:[#allocation2 + $0x8e0] sm:$0xff]  ;;  %3454 = vmatpush1.bf16.msra.mxu0 %v7124_v0 }
  0xea   :  { %v659_v60 = vld [vmem:[#allocation2 + $0xcc0] sm:$0xff]  ;;  %v7117_v2 = vcombine.high %v531_v58, %v535_v59  ;;  %3494 = vmatprep.subr.bf16.mxu1 %v7253_v61  ;;  %v7116_v9 = vcombine.low %v531_v58, %v535_v59 }
  0xeb   :  { %v663_v62 = vld [vmem:[#allocation2 + $0xce0] sm:$0xff]  ;;  %3495 = vmatpush1.bf16.msra.mxu1 %v7252_v1 }
  0xec   :  { %v523_v3 = vld [vmem:[#allocation2 + $0x880] sm:$0xff]  ;;  %v7245_v7 = vcombine.high %v659_v60, %v663_v62  ;;  %3455 = vmatprep.subr.bf16.mxu0 %v7117_v2  ;;  %v7244_v10 = vcombine.low %v659_v60, %v663_v62 }
  0xed   :  { %v527_v4 = vld [vmem:[#allocation2 + $0x8a0] sm:$0xff]  ;;  %3456 = vmatpush1.bf16.msra.mxu0 %v7116_v9 }
  0xee   :  { %v651_v6 = vld [vmem:[#allocation2 + $0xc80] sm:$0xff]  ;;  %v7109_v12 = vcombine.high %v523_v3, %v527_v4  ;;  %3496 = vmatprep.subr.bf16.mxu1 %v7245_v7  ;;  %v7108_v19 = vcombine.low %v523_v3, %v527_v4 }
  0xef   :  { %v655_v8 = vld [vmem:[#allocation2 + $0xca0] sm:$0xff]  ;;  %3497 = vmatpush1.bf16.msra.mxu1 %v7244_v10 }
  0xf0   :  { %v515_v13 = vld [vmem:[#allocation2 + $0x840] sm:$0xff]  ;;  %v7237_v17 = vcombine.high %v651_v6, %v655_v8  ;;  %3457 = vmatprep.subr.bf16.mxu0 %v7109_v12  ;;  %v7236_v20 = vcombine.low %v651_v6, %v655_v8 }
  0xf1   :  { %v519_v14 = vld [vmem:[#allocation2 + $0x860] sm:$0xff]  ;;  %3458 = vmatpush1.bf16.msra.mxu0 %v7108_v19 }
  0xf2   :  { %v643_v15 = vld [vmem:[#allocation2 + $0xc40] sm:$0xff]  ;;  %v7101_v21 = vcombine.high %v515_v13, %v519_v14  ;;  %3498 = vmatprep.subr.bf16.mxu1 %v7237_v17  ;;  %v7100_v29 = vcombine.low %v515_v13, %v519_v14 }
  0xf3   :  { %v647_v18 = vld [vmem:[#allocation2 + $0xc60] sm:$0xff]  ;;  %3499 = vmatpush1.bf16.msra.mxu1 %v7236_v20 }
  0xf4   :  { %v507_v23 = vld [vmem:[#allocation2 + $0x800] sm:$0xff]  ;;  %v7229_v27 = vcombine.high %v643_v15, %v647_v18  ;;  %3459 = vmatprep.subr.bf16.mxu0 %v7101_v21  ;;  %v7228_v30 = vcombine.low %v643_v15, %v647_v18 }
  0xf5   :  { %v511_v24 = vld [vmem:[#allocation2 + $0x820] sm:$0xff]  ;;  %3460 = vmatpush1.bf16.msra.mxu0 %v7100_v29 }
  0xf6   :  { %v635_v26 = vld [vmem:[#allocation2 + $0xc00] sm:$0xff]  ;;  %v7093_v31 = vcombine.high %v507_v23, %v511_v24  ;;  %3500 = vmatprep.subr.bf16.mxu1 %v7229_v27  ;;  %v7092_v38 = vcombine.low %v507_v23, %v511_v24 }
  0xf7   :  { %v639_v28 = vld [vmem:[#allocation2 + $0xc20] sm:$0xff]  ;;  %3501 = vmatpush1.bf16.msra.mxu1 %v7228_v30 }
  0xf8   :  { %v627_v32 = vld [vmem:[#allocation2 + $0xbc0] sm:$0xff]  ;;  %v7221_v35 = vcombine.high %v635_v26, %v639_v28  ;;  %3461 = vmatprep.subr.bf16.mxu0 %v7093_v31  ;;  %v7220_v39 = vcombine.low %v635_v26, %v639_v28 }
  0xf9   :  { %v631_v34 = vld [vmem:[#allocation2 + $0xbe0] sm:$0xff]  ;;  %3462 = vmatpush1.bf16.msra.mxu0 %v7092_v38 }
  0xfa   :  { %v755_v53 = vld [vmem:[#allocation2 + $0xfc0] sm:$0xff]  ;;  %v7213_v40 = vcombine.high %v627_v32, %v631_v34  ;;  %3502 = vmatprep.subr.bf16.mxu1 %v7221_v35  ;;  %v7212_v47 = vcombine.low %v627_v32, %v631_v34 }
  0xfb   :  { %v759_v37 = vld [vmem:[#allocation2 + $0xfe0] sm:$0xff]  ;;  %3503 = vmatpush1.bf16.msra.mxu1 %v7220_v39 }
  0xfc   :  { %v619_v41 = vld [vmem:[#allocation2 + $0xb80] sm:$0xff]  ;;  %v7341_v43 = vcombine.high %v755_v53, %v759_v37  ;;  %3463 = vmatprep.subr.bf16.mxu0 %v7213_v40  ;;  %v7340_v48 = vcombine.low %v755_v53, %v759_v37 }
  0xfd   :  { %v623_v42 = vld [vmem:[#allocation2 + $0xba0] sm:$0xff]  ;;  %3464 = vmatpush2.bf16.msra.mxu0 %v7212_v47  ;;  %v440_v47 = vld [vmem:[#allocation2 + $0x5e8] sm:$0xff] }
  0xfe   :  { %v747_v63 = vld [vmem:[#allocation2 + $0xf80] sm:$0xff]  ;;  %v7205_v49 = vcombine.high %v619_v41, %v623_v42  ;;  %3504 = vmatprep.subr.bf16.mxu1 %v7341_v43  ;;  %v7204_v56 = vcombine.low %v619_v41, %v623_v42  ;;  %v308_v42 = vld [vmem:[#allocation2 + $0x1c8] sm:$0xff] }
  0xff   :  { %v751_v5 = vld [vmem:[#allocation2 + $0xfa0] sm:$0xff]  ;;  %3505 = vmatpush2.bf16.msra.mxu1 %v7340_v48  ;;  %v436_v43 = vld [vmem:[#allocation2 + $0x5c8] sm:$0xff] }
 0x100   :  { %v611_v50 = vld [vmem:[#allocation2 + $0xb40] sm:$0xff]  ;;  %v7333_v54 = vcombine.high %v747_v63, %v751_v5  ;;  %3465 = vmatprep.subr.bf16.mxu0 %v7205_v49  ;;  %v7332_v57 = vcombine.low %v747_v63, %v751_v5  ;;  %v312_v63 = vld [vmem:[#allocation2 + $0x1e8] sm:$0xff] }
 0x101   :  { %v615_v51 = vld [vmem:[#allocation2 + $0xb60] sm:$0xff]  ;;  %3466 = vmatpush2.bf16.msra.mxu0 %v7204_v56  ;;  %v432_v56 = vld [vmem:[#allocation2 + $0x5a8] sm:$0xff] }
 0x102   :  { %v739_v52 = vld [vmem:[#allocation2 + $0xf40] sm:$0xff]  ;;  %v7197_v58 = vcombine.high %v611_v50, %v615_v51  ;;  %3506 = vmatprep.subr.bf16.mxu1 %v7333_v54  ;;  %v7196_v1 = vcombine.low %v611_v50, %v615_v51  ;;  %v6895_v50 = vcombine.high %v308_v42, %v312_v63  ;;  %v300_v51 = vld [vmem:[#allocation2 + $0x188] sm:$0xff] }
 0x103   :  { %v743_v55 = vld [vmem:[#allocation2 + $0xf60] sm:$0xff]  ;;  %3507 = vmatpush2.bf16.msra.mxu1 %v7332_v57  ;;  %v428_v54 = vld [vmem:[#allocation2 + $0x588] sm:$0xff]  ;;  %v8783_v57 = vpack.c.bf16 %v8756_v22, %v8756_v22 }
 0x104   :  { %v603_v59 = vld [vmem:[#allocation2 + $0xb00] sm:$0xff]  ;;  %v7325_v62 = vcombine.high %v739_v52, %v743_v55  ;;  %3467 = vmatprep.subr.bf16.mxu0 %v7197_v58  ;;  %v7324_v2 = vcombine.low %v739_v52, %v743_v55  ;;  %v304_v52 = vld [vmem:[#allocation2 + $0x1a8] sm:$0xff]  ;;  %v7023_v55 = vcombine.high %v436_v43, %v440_v47  ;;  %v8787_v58 = vpack.c.bf16 %v8759_v25, %v8759_v25 }
 0x105   :  { %v607_v60 = vld [vmem:[#allocation2 + $0xb20] sm:$0xff]  ;;  %3468 = vmatpush2.bf16.msra.mxu0 %v7196_v1  ;;  %v7015_v1 = vcombine.high %v428_v54, %v432_v56  ;;  %v6886_v22 = vcombine.low %v300_v51, %v304_v52  ;;  %v7014_v25 = vcombine.low %v428_v54, %v432_v56  ;;  %v376_v54 = vld [vmem:[#allocation2 + $0x3e8] sm:$0xff] }
 0x106   :  { %v731_v61 = vld [vmem:[#allocation2 + $0xf00] sm:$0xff]  ;;  %v7189_v3 = vcombine.high %v603_v59, %v607_v60  ;;  %3508 = vmatprep.subr.bf16.mxu1 %v7325_v62  ;;  %v7188_v10 = vcombine.low %v603_v59, %v607_v60  ;;  %v6894_v59 = vcombine.low %v308_v42, %v312_v63  ;;  %v7022_v60 = vcombine.low %v436_v43, %v440_v47  ;;  %v292_v62 = vld [vmem:[#allocation2 + $0x148] sm:$0xff] }
 0x107   :  { %v735_v0 = vld [vmem:[#allocation2 + $0xf20] sm:$0xff]  ;;  %3509 = vmatpush2.bf16.msra.mxu1 %v7324_v2  ;;  %v420_v2 = vld [vmem:[#allocation2 + $0x548] sm:$0xff] }
 0x108   :  { %v595_v4 = vld [vmem:[#allocation2 + $0xac0] sm:$0xff]  ;;  %v7317_v8 = vcombine.high %v731_v61, %v735_v0  ;;  %3469 = vmatprep.subr.bf16.mxu0 %v7189_v3  ;;  %v7316_v12 = vcombine.low %v731_v61, %v735_v0  ;;  %v6887_v61 = vcombine.high %v300_v51, %v304_v52  ;;  %v296_v0 = vld [vmem:[#allocation2 + $0x168] sm:$0xff] }
 0x109   :  { %v599_v6 = vld [vmem:[#allocation2 + $0xae0] sm:$0xff]  ;;  %3470 = vmatpush2.bf16.msra.mxu0 %v7188_v10  ;;  %v424_v3 = vld [vmem:[#allocation2 + $0x568] sm:$0xff] }
 0x10a   :  { %v723_v7 = vld [vmem:[#allocation2 + $0xec0] sm:$0xff]  ;;  %v7181_v13 = vcombine.high %v595_v4, %v599_v6  ;;  %3510 = vmatprep.subr.bf16.mxu1 %v7317_v8  ;;  %v7180_v20 = vcombine.low %v595_v4, %v599_v6  ;;  %v6879_v4 = vcombine.high %v292_v62, %v296_v0  ;;  %v284_v6 = vld [vmem:[#allocation2 + $0x108] sm:$0xff] }
 0x10b   :  { %v727_v9 = vld [vmem:[#allocation2 + $0xee0] sm:$0xff]  ;;  %3511 = vmatpush2.bf16.msra.mxu1 %v7316_v12  ;;  %v412_v8 = vld [vmem:[#allocation2 + $0x508] sm:$0xff]  ;;  %v6878_v12 = vcombine.low %v292_v62, %v296_v0 }
 0x10c   :  { %v587_v14 = vld [vmem:[#allocation2 + $0xa80] sm:$0xff]  ;;  %v7309_v18 = vcombine.high %v723_v7, %v727_v9  ;;  %3471 = vmatprep.subr.bf16.mxu0 %v7181_v13  ;;  %v7308_v21 = vcombine.low %v723_v7, %v727_v9  ;;  %v288_v7 = vld [vmem:[#allocation2 + $0x128] sm:$0xff]  ;;  %v7007_v9 = vcombine.high %v420_v2, %v424_v3  ;;  %v7006_v13 = vcombine.low %v420_v2, %v424_v3 }
 0x10d   :  { %v591_v15 = vld [vmem:[#allocation2 + $0xaa0] sm:$0xff]  ;;  %3472 = vmatpush2.bf16.msra.mxu0 %v7180_v20  ;;  %v416_v10 = vld [vmem:[#allocation2 + $0x528] sm:$0xff] }
 0x10e   :  { %v715_v17 = vld [vmem:[#allocation2 + $0xe80] sm:$0xff]  ;;  %v7173_v23 = vcombine.high %v587_v14, %v591_v15  ;;  %3512 = vmatprep.subr.bf16.mxu1 %v7309_v18  ;;  %v7172_v30 = vcombine.low %v587_v14, %v591_v15  ;;  %v6871_v14 = vcombine.high %v284_v6, %v288_v7  ;;  %v276_v15 = vld [vmem:[#allocation2 + $0xc8] sm:$0xff] }
 0x10f   :  { %v719_v19 = vld [vmem:[#allocation2 + $0xea0] sm:$0xff]  ;;  %3513 = vmatpush2.bf16.msra.mxu1 %v7308_v21  ;;  %v404_v18 = vld [vmem:[#allocation2 + $0x4c8] sm:$0xff]  ;;  %v6870_v21 = vcombine.low %v284_v6, %v288_v7 }
 0x110   :  { %v579_v24 = vld [vmem:[#allocation2 + $0xa40] sm:$0xff]  ;;  %v7301_v28 = vcombine.high %v715_v17, %v719_v19  ;;  %3473 = vmatprep.subr.bf16.mxu0 %v7173_v23  ;;  %v7300_v31 = vcombine.low %v715_v17, %v719_v19  ;;  %v280_v17 = vld [vmem:[#allocation2 + $0xe8] sm:$0xff]  ;;  %v6999_v19 = vcombine.high %v412_v8, %v416_v10  ;;  %v6998_v23 = vcombine.low %v412_v8, %v416_v10 }
 0x111   :  { %v583_v26 = vld [vmem:[#allocation2 + $0xa60] sm:$0xff]  ;;  %3474 = vmatpush2.bf16.msra.mxu0 %v7172_v30  ;;  %v408_v20 = vld [vmem:[#allocation2 + $0x4e8] sm:$0xff] }
 0x112   :  { %v707_v27 = vld [vmem:[#allocation2 + $0xe40] sm:$0xff]  ;;  %v7165_v32 = vcombine.high %v579_v24, %v583_v26  ;;  %3514 = vmatprep.subr.bf16.mxu1 %v7301_v28  ;;  %v7164_v39 = vcombine.low %v579_v24, %v583_v26  ;;  %v6863_v24 = vcombine.high %v276_v15, %v280_v17  ;;  %v268_v26 = vld [vmem:[#allocation2 + $0x88] sm:$0xff] }
 0x113   :  { %v711_v29 = vld [vmem:[#allocation2 + $0xe60] sm:$0xff]  ;;  %3515 = vmatpush2.bf16.msra.mxu1 %v7300_v31  ;;  %v396_v28 = vld [vmem:[#allocation2 + $0x488] sm:$0xff]  ;;  %v6862_v31 = vcombine.low %v276_v15, %v280_v17 }
 0x114   :  { %v571_v34 = vld [vmem:[#allocation2 + $0xa00] sm:$0xff]  ;;  %v7293_v37 = vcombine.high %v707_v27, %v711_v29  ;;  %3475 = vmatprep.subr.bf16.mxu0 %v7165_v32  ;;  %v7292_v40 = vcombine.low %v707_v27, %v711_v29  ;;  %v272_v27 = vld [vmem:[#allocation2 + $0xa8] sm:$0xff]  ;;  %v6991_v29 = vcombine.high %v404_v18, %v408_v20  ;;  %v6990_v32 = vcombine.low %v404_v18, %v408_v20 }
 0x115   :  { %v575_v53 = vld [vmem:[#allocation2 + $0xa20] sm:$0xff]  ;;  %3476 = vmatpush2.bf16.msra.mxu0 %v7164_v39  ;;  %v400_v30 = vld [vmem:[#allocation2 + $0x4a8] sm:$0xff] }
 0x116   :  { %v699_v35 = vld [vmem:[#allocation2 + $0xe00] sm:$0xff]  ;;  %v7157_v41 = vcombine.high %v571_v34, %v575_v53  ;;  %3516 = vmatprep.subr.bf16.mxu1 %v7293_v37  ;;  %v7156_v48 = vcombine.low %v571_v34, %v575_v53  ;;  %v6855_v34 = vcombine.high %v268_v26, %v272_v27  ;;  %v260_v53 = vld [vmem:[#allocation2 + $0x48] sm:$0xff] }
 0x117   :  { %v703_v38 = vld [vmem:[#allocation2 + $0xe20] sm:$0xff]  ;;  %3517 = vmatpush2.bf16.msra.mxu1 %v7292_v40  ;;  %v388_v37 = vld [vmem:[#allocation2 + $0x448] sm:$0xff]  ;;  %v6854_v40 = vcombine.low %v268_v26, %v272_v27 }
 0x118   :  { %v7285_v5 = vcombine.high %v699_v35, %v703_v38  ;;  %3477 = vmatprep.subr.bf16.mxu0 %v7157_v41  ;;  %v7284_v49 = vcombine.low %v699_v35, %v703_v38  ;;  %v264_v35 = vld [vmem:[#allocation2 + $0x68] sm:$0xff]  ;;  %v6983_v38 = vcombine.high %v396_v28, %v400_v30  ;;  %v6982_v41 = vcombine.low %v396_v28, %v400_v30 }
 0x119   :  { %3478 = vmatpush2.bf16.msra.mxu0 %v7156_v48  ;;  %v392_v39 = vld [vmem:[#allocation2 + $0x468] sm:$0xff]  ;;  %v6847_v42 = vcombine.high %v260_v53, %v264_v35 }
 0x11a   :  { %3518 = vmatprep.subr.bf16.mxu1 %v7285_v5  ;;  %3529 = vmatprep.subr.bf16.mxu0 %v6895_v50  ;;  %v252_v63 = vld [vmem:[#allocation2 + $0x8] sm:$0xff]  ;;  %v6975_v47 = vcombine.high %v388_v37, %v392_v39  ;;  %v6974_v50 = vcombine.low %v388_v37, %v392_v39 }
 0x11b   :  { %3519 = vmatpush2.bf16.msra.mxu1 %v7284_v49  ;;  %v256_v43 = vld [vmem:[#allocation2 + $0x28] sm:$0xff]  ;;  %v6846_v49 = vcombine.low %v260_v53, %v264_v35 }
 0x11c   :  { %3570 = vmatprep.subr.bf16.mxu1 %v7023_v55  ;;  %3480 = vmatmul.mubr.bf16.vlgmr.msra.gmra.mxu0 %v8783_v57  ;;  %v380_v5 = vld [vmem:[#allocation2 + $0x408] sm:$0xff]  ;;  %v6839_v51 = vcombine.high %v252_v63, %v256_v43 }
 0x11d   :  { %3530 = vmatpush1.bf16.msra.mxu0 %v6894_v59  ;;  %3561 = vmatprep.mubr.bf16.mxu0 %v8744_v11  ;;  %v384_v48 = vld [vmem:[#allocation2 + $0x428] sm:$0xff] }
 0x11e   :  { %3521 = vmatmul.mubr.bf16.vlgmr.msra.gmra.mxu1 %v8787_v58  ;;  %3531 = vmatprep.subr.bf16.mxu0 %v6887_v61  ;;  %v372_v52 = vld [vmem:[#allocation2 + $0x3c8] sm:$0xff]  ;;  %v6967_v56 = vcombine.high %v380_v5, %v384_v48  ;;  %v6966_v61 = vcombine.low %v380_v5, %v384_v48 }
 0x11f   :  { %3571 = vmatpush1.bf16.msra.mxu1 %v7022_v60  ;;  %3602 = vmatprep.mubr.bf16.mxu1 %v8749_v16  ;;  %v500_v55 = vld [vmem:[#allocation2 + $0x7c8] sm:$0xff]  ;;  %v6838_v60 = vcombine.low %v252_v63, %v256_v43  ;;  %v6959_v62 = vcombine.high %v372_v52, %v376_v54 }
 0x120   :  { %3572 = vmatprep.subr.bf16.mxu1 %v7015_v1  ;;  %v504_v59 = vld [vmem:[#allocation2 + $0x7e8] sm:$0xff] }
 0x121   :  { %3532 = vmatpush1.bf16.msra.mxu0 %v6886_v22  ;;  %v364_v0 = vld [vmem:[#allocation2 + $0x388] sm:$0xff]  ;;  %v7087_v3 = vcombine.high %v500_v55, %v504_v59 }
 0x122   :  { %3533 = vmatprep.subr.bf16.mxu0 %v6879_v4  ;;  %v368_v1 = vld [vmem:[#allocation2 + $0x3a8] sm:$0xff]  ;;  %v7086_v4 = vcombine.low %v500_v55, %v504_v59 }
 0x123   :  { %3573 = vmatpush1.bf16.msra.mxu1 %v7014_v25  ;;  %v492_v2 = vld [vmem:[#allocation2 + $0x788] sm:$0xff]  ;;  %v6958_v25 = vcombine.low %v372_v52, %v376_v54  ;;  %v6951_v6 = vcombine.high %v364_v0, %v368_v1 }
 0x124   :  { %3574 = vmatprep.subr.bf16.mxu1 %v7007_v9  ;;  %v496_v22 = vld [vmem:[#allocation2 + $0x7a8] sm:$0xff] }
 0x125   :  { %3534 = vmatpush1.bf16.msra.mxu0 %v6878_v12  ;;  %v356_v7 = vld [vmem:[#allocation2 + $0x348] sm:$0xff]  ;;  %v7079_v10 = vcombine.high %v492_v2, %v496_v22 }
 0x126   :  { %3535 = vmatprep.subr.bf16.mxu0 %v6871_v14  ;;  %v360_v8 = vld [vmem:[#allocation2 + $0x368] sm:$0xff]  ;;  %v7078_v14 = vcombine.low %v492_v2, %v496_v22 }
 0x127   :  { %3575 = vmatpush1.bf16.msra.mxu1 %v7006_v13  ;;  %v484_v9 = vld [vmem:[#allocation2 + $0x748] sm:$0xff]  ;;  %v6950_v13 = vcombine.low %v364_v0, %v368_v1  ;;  %v6943_v15 = vcombine.high %v356_v7, %v360_v8 }
 0x128   :  { %3576 = vmatprep.subr.bf16.mxu1 %v6999_v19  ;;  %v488_v12 = vld [vmem:[#allocation2 + $0x768] sm:$0xff] }
 0x129   :  { %3536 = vmatpush1.bf16.msra.mxu0 %v6870_v21  ;;  %v348_v17 = vld [vmem:[#allocation2 + $0x308] sm:$0xff]  ;;  %v7071_v20 = vcombine.high %v484_v9, %v488_v12 }
 0x12a   :  { %3537 = vmatprep.subr.bf16.mxu0 %v6863_v24  ;;  %v352_v18 = vld [vmem:[#allocation2 + $0x328] sm:$0xff]  ;;  %v7070_v24 = vcombine.low %v484_v9, %v488_v12 }
 0x12b   :  { %3577 = vmatpush1.bf16.msra.mxu1 %v6998_v23  ;;  %v476_v19 = vld [vmem:[#allocation2 + $0x708] sm:$0xff]  ;;  %v6942_v23 = vcombine.low %v356_v7, %v360_v8  ;;  %v6935_v26 = vcombine.high %v348_v17, %v352_v18 }
 0x12c   :  { %3578 = vmatprep.subr.bf16.mxu1 %v6991_v29  ;;  %v480_v21 = vld [vmem:[#allocation2 + $0x728] sm:$0xff] }
 0x12d   :  { %3538 = vmatpush1.bf16.msra.mxu0 %v6862_v31  ;;  %v340_v27 = vld [vmem:[#allocation2 + $0x2c8] sm:$0xff]  ;;  %v7063_v30 = vcombine.high %v476_v19, %v480_v21 }
 0x12e   :  { %3539 = vmatprep.subr.bf16.mxu0 %v6855_v34  ;;  %v344_v28 = vld [vmem:[#allocation2 + $0x2e8] sm:$0xff]  ;;  %v7062_v34 = vcombine.low %v476_v19, %v480_v21 }
 0x12f   :  { %3579 = vmatpush1.bf16.msra.mxu1 %v6990_v32  ;;  %v468_v29 = vld [vmem:[#allocation2 + $0x6c8] sm:$0xff]  ;;  %v6934_v32 = vcombine.low %v348_v17, %v352_v18  ;;  %v6927_v53 = vcombine.high %v340_v27, %v344_v28 }
 0x130   :  { %3580 = vmatprep.subr.bf16.mxu1 %v6983_v38  ;;  %v472_v31 = vld [vmem:[#allocation2 + $0x6e8] sm:$0xff] }
 0x131   :  { %3540 = vmatpush1.bf16.msra.mxu0 %v6854_v40  ;;  %v332_v35 = vld [vmem:[#allocation2 + $0x288] sm:$0xff]  ;;  %v7055_v39 = vcombine.high %v468_v29, %v472_v31 }
 0x132   :  { %3541 = vmatprep.subr.bf16.mxu0 %v6847_v42  ;;  %v336_v37 = vld [vmem:[#allocation2 + $0x2a8] sm:$0xff]  ;;  %v7054_v42 = vcombine.low %v468_v29, %v472_v31 }
 0x133   :  { %3581 = vmatpush1.bf16.msra.mxu1 %v6982_v41  ;;  %v460_v38 = vld [vmem:[#allocation2 + $0x688] sm:$0xff]  ;;  %v6926_v41 = vcombine.low %v340_v27, %v344_v28  ;;  %v6919_v63 = vcombine.high %v332_v35, %v336_v37 }
 0x134   :  { %3582 = vmatprep.subr.bf16.mxu1 %v6975_v47  ;;  %v464_v40 = vld [vmem:[#allocation2 + $0x6a8] sm:$0xff] }
 0x135   :  { %3542 = vmatpush1.bf16.msra.mxu0 %v6846_v49  ;;  %v324_v43 = vld [vmem:[#allocation2 + $0x248] sm:$0xff]  ;;  %v7047_v48 = vcombine.high %v460_v38, %v464_v40 }
 0x136   :  { %3543 = vmatprep.subr.bf16.mxu0 %v6839_v51  ;;  %v328_v5 = vld [vmem:[#allocation2 + $0x268] sm:$0xff]  ;;  %v7046_v51 = vcombine.low %v460_v38, %v464_v40 }
 0x137   :  { %3583 = vmatpush1.bf16.msra.mxu1 %v6974_v50  ;;  %v452_v47 = vld [vmem:[#allocation2 + $0x648] sm:$0xff]  ;;  %v6918_v50 = vcombine.low %v332_v35, %v336_v37  ;;  %v6911_v52 = vcombine.high %v324_v43, %v328_v5 }
 0x138   :  { %3584 = vmatprep.subr.bf16.mxu1 %v6967_v56  ;;  %v456_v49 = vld [vmem:[#allocation2 + $0x668] sm:$0xff] }
 0x139   :  { %3544 = vmatpush1.bf16.msra.mxu0 %v6838_v60  ;;  %v316_v54 = vld [vmem:[#allocation2 + $0x208] sm:$0xff]  ;;  %v7039_v59 = vcombine.high %v452_v47, %v456_v49 }
 0x13a   :  { %3545 = vmatprep.subr.bf16.mxu0 %v6959_v62  ;;  %v320_v55 = vld [vmem:[#allocation2 + $0x228] sm:$0xff]  ;;  %v7038_v62 = vcombine.low %v452_v47, %v456_v49 }
 0x13b   :  { %3585 = vmatpush1.bf16.msra.mxu1 %v6966_v61  ;;  %v444_v56 = vld [vmem:[#allocation2 + $0x608] sm:$0xff]  ;;  %v6910_v61 = vcombine.low %v324_v43, %v328_v5  ;;  %v6903_v0 = vcombine.high %v316_v54, %v320_v55 }
 0x13c   :  { %3586 = vmatprep.subr.bf16.mxu1 %v7087_v3  ;;  %v448_v60 = vld [vmem:[#allocation2 + $0x628] sm:$0xff] }
 0x13d   :  { %3546 = vmatpush2.bf16.msra.mxu0 %v6958_v25  ;;  %v564_v1 = vld [vmem:[#allocation2 + $0x9c8] sm:$0xff]  ;;  %v7031_v22 = vcombine.high %v444_v56, %v448_v60 }
 0x13e   :  { %3547 = vmatprep.subr.bf16.mxu0 %v6951_v6  ;;  %v568_v2 = vld [vmem:[#allocation2 + $0x9e8] sm:$0xff]  ;;  %v7030_v6 = vcombine.low %v444_v56, %v448_v60 }
 0x13f   :  { %3587 = vmatpush2.bf16.msra.mxu1 %v7086_v4  ;;  %v692_v3 = vld [vmem:[#allocation2 + $0xdc8] sm:$0xff]  ;;  %v6902_v4 = vcombine.low %v316_v54, %v320_v55  ;;  %v7151_v7 = vcombine.high %v564_v1, %v568_v2 }
 0x140   :  { %3588 = vmatprep.subr.bf16.mxu1 %v7079_v10  ;;  %v696_v25 = vld [vmem:[#allocation2 + $0xde8] sm:$0xff] }
 0x141   :  { %3548 = vmatpush2.bf16.msra.mxu0 %v6950_v13  ;;  %v556_v8 = vld [vmem:[#allocation2 + $0x988] sm:$0xff]  ;;  %v7279_v12 = vcombine.high %v692_v3, %v696_v25 }
 0x142   :  { %3549 = vmatprep.subr.bf16.mxu0 %v6943_v15  ;;  %v560_v9 = vld [vmem:[#allocation2 + $0x9a8] sm:$0xff]  ;;  %v7278_v15 = vcombine.low %v692_v3, %v696_v25 }
 0x143   :  { %3589 = vmatpush2.bf16.msra.mxu1 %v7078_v14  ;;  %v684_v10 = vld [vmem:[#allocation2 + $0xd88] sm:$0xff]  ;;  %v7150_v14 = vcombine.low %v564_v1, %v568_v2  ;;  %v7143_v17 = vcombine.high %v556_v8, %v560_v9 }
 0x144   :  { %3590 = vmatprep.subr.bf16.mxu1 %v7071_v20  ;;  %v688_v13 = vld [vmem:[#allocation2 + $0xda8] sm:$0xff] }
 0x145   :  { %3550 = vmatpush2.bf16.msra.mxu0 %v6942_v23  ;;  %v548_v18 = vld [vmem:[#allocation2 + $0x948] sm:$0xff]  ;;  %v7271_v21 = vcombine.high %v684_v10, %v688_v13 }
 0x146   :  { %3551 = vmatprep.subr.bf16.mxu0 %v6935_v26  ;;  %v552_v19 = vld [vmem:[#allocation2 + $0x968] sm:$0xff]  ;;  %v7270_v26 = vcombine.low %v684_v10, %v688_v13 }
 0x147   :  { %3591 = vmatpush2.bf16.msra.mxu1 %v7070_v24  ;;  %v676_v20 = vld [vmem:[#allocation2 + $0xd48] sm:$0xff]  ;;  %v7142_v24 = vcombine.low %v556_v8, %v560_v9  ;;  %v7135_v27 = vcombine.high %v548_v18, %v552_v19 }
 0x148   :  { %3592 = vmatprep.subr.bf16.mxu1 %v7063_v30  ;;  %v680_v23 = vld [vmem:[#allocation2 + $0xd68] sm:$0xff] }
 0x149   :  { %3552 = vmatpush2.bf16.msra.mxu0 %v6934_v32  ;;  %v540_v28 = vld [vmem:[#allocation2 + $0x908] sm:$0xff]  ;;  %v7263_v31 = vcombine.high %v676_v20, %v680_v23 }
 0x14a   :  { %3553 = vmatprep.subr.bf16.mxu0 %v6927_v53  ;;  %v544_v29 = vld [vmem:[#allocation2 + $0x928] sm:$0xff]  ;;  %v7262_v53 = vcombine.low %v676_v20, %v680_v23 }
 0x14b   :  { %3593 = vmatpush2.bf16.msra.mxu1 %v7062_v34  ;;  %v668_v30 = vld [vmem:[#allocation2 + $0xd08] sm:$0xff]  ;;  %v7134_v34 = vcombine.low %v548_v18, %v552_v19  ;;  %v7127_v35 = vcombine.high %v540_v28, %v544_v29 }
 0x14c   :  { %3594 = vmatprep.subr.bf16.mxu1 %v7055_v39  ;;  %v672_v32 = vld [vmem:[#allocation2 + $0xd28] sm:$0xff] }
 0x14d   :  { %3554 = vmatpush2.bf16.msra.mxu0 %v6926_v41  ;;  %v532_v37 = vld [vmem:[#allocation2 + $0x8c8] sm:$0xff]  ;;  %v7255_v40 = vcombine.high %v668_v30, %v672_v32 }
 0x14e   :  { %3555 = vmatprep.subr.bf16.mxu0 %v6919_v63  ;;  %v536_v38 = vld [vmem:[#allocation2 + $0x8e8] sm:$0xff]  ;;  %v7254_v63 = vcombine.low %v668_v30, %v672_v32 }
 0x14f   :  { %3595 = vmatpush2.bf16.msra.mxu1 %v7054_v42  ;;  %v660_v39 = vld [vmem:[#allocation2 + $0xcc8] sm:$0xff]  ;;  %v7126_v42 = vcombine.low %v540_v28, %v544_v29  ;;  %v7119_v43 = vcombine.high %v532_v37, %v536_v38 }
 0x150   :  { %3596 = vmatprep.subr.bf16.mxu1 %v7047_v48  ;;  %v664_v41 = vld [vmem:[#allocation2 + $0xce8] sm:$0xff] }
 0x151   :  { %3556 = vmatpush2.bf16.msra.mxu0 %v6918_v50  ;;  %v524_v5 = vld [vmem:[#allocation2 + $0x888] sm:$0xff]  ;;  %v7247_v49 = vcombine.high %v660_v39, %v664_v41 }
 0x152   :  { %3557 = vmatprep.subr.bf16.mxu0 %v6911_v52  ;;  %v528_v47 = vld [vmem:[#allocation2 + $0x8a8] sm:$0xff]  ;;  %v7246_v52 = vcombine.low %v660_v39, %v664_v41 }
 0x153   :  { %3597 = vmatpush2.bf16.msra.mxu1 %v7046_v51  ;;  %v652_v48 = vld [vmem:[#allocation2 + $0xc88] sm:$0xff]  ;;  %v7118_v51 = vcombine.low %v532_v37, %v536_v38  ;;  %v7111_v54 = vcombine.high %v524_v5, %v528_v47 }
 0x154   :  { %3598 = vmatprep.subr.bf16.mxu1 %v7039_v59  ;;  %v656_v50 = vld [vmem:[#allocation2 + $0xca8] sm:$0xff] }
 0x155   :  { %3558 = vmatpush2.bf16.msra.mxu0 %v6910_v61  ;;  %v516_v55 = vld [vmem:[#allocation2 + $0x848] sm:$0xff]  ;;  %v7239_v60 = vcombine.high %v652_v48, %v656_v50 }
 0x156   :  { %3559 = vmatprep.subr.bf16.mxu0 %v6903_v0  ;;  %v520_v56 = vld [vmem:[#allocation2 + $0x868] sm:$0xff]  ;;  %v7238_v0 = vcombine.low %v652_v48, %v656_v50 }
 0x157   :  { %3599 = vmatpush2.bf16.msra.mxu1 %v7038_v62  ;;  %v644_v59 = vld [vmem:[#allocation2 + $0xc48] sm:$0xff]  ;;  %v7110_v62 = vcombine.low %v524_v5, %v528_v47  ;;  %v7103_v1 = vcombine.high %v516_v55, %v520_v56 }
 0x158   :  { %3600 = vmatprep.subr.bf16.mxu1 %v7031_v22  ;;  %v648_v61 = vld [vmem:[#allocation2 + $0xc68] sm:$0xff] }
 0x159   :  { %3560 = vmatpush2.bf16.msra.mxu0 %v6902_v4  ;;  %v508_v2 = vld [vmem:[#allocation2 + $0x808] sm:$0xff]  ;;  %v7231_v25 = vcombine.high %v644_v59, %v648_v61 }
 0x15a   :  { %3611 = vmatprep.subr.bf16.mxu0 %v7151_v7  ;;  %v512_v3 = vld [vmem:[#allocation2 + $0x828] sm:$0xff]  ;;  %v7230_v7 = vcombine.low %v644_v59, %v648_v61 }
 0x15b   :  { %3601 = vmatpush2.bf16.msra.mxu1 %v7030_v6  ;;  %v636_v22 = vld [vmem:[#allocation2 + $0xc08] sm:$0xff]  ;;  %v7102_v6 = vcombine.low %v516_v55, %v520_v56  ;;  %v7095_v8 = vcombine.high %v508_v2, %v512_v3 }
 0x15c   :  { %3652 = vmatprep.subr.bf16.mxu1 %v7279_v12  ;;  %3562 = vmatmul.mubr.bf16.vlgmr.msra.gmra.mxu0 %v8765_v33  ;;  %v640_v4 = vld [vmem:[#allocation2 + $0xc28] sm:$0xff] }
 0x15d   :  { %3612 = vmatpush1.bf16.msra.mxu0 %v7150_v14  ;;  %3643 = vmatprep.mubr.bf16.mxu0 %v8773_v45  ;;  %v628_v9 = vld [vmem:[#allocation2 + $0xbc8] sm:$0xff]  ;;  %v7223_v13 = vcombine.high %v636_v22, %v640_v4 }
 0x15e   :  { %3603 = vmatmul.mubr.bf16.vlgmr.msra.gmra.mxu1 %v8771_v36  ;;  %3613 = vmatprep.subr.bf16.mxu0 %v7143_v17  ;;  %v632_v10 = vld [vmem:[#allocation2 + $0xbe8] sm:$0xff]  ;;  %v7222_v17 = vcombine.low %v636_v22, %v640_v4 }
 0x15f   :  { %3653 = vmatpush1.bf16.msra.mxu1 %v7278_v15  ;;  %3684 = vmatprep.mubr.bf16.mxu1 %v8776_v46  ;;  %v756_v12 = vld [vmem:[#allocation2 + $0xfc8] sm:$0xff]  ;;  %v7094_v15 = vcombine.low %v508_v2, %v512_v3  ;;  %v7215_v18 = vcombine.high %v628_v9, %v632_v10 }
 0x160   :  { %3654 = vmatprep.subr.bf16.mxu1 %v7271_v21  ;;  %v760_v14 = vld [vmem:[#allocation2 + $0xfe8] sm:$0xff] }
 0x161   :  { %3614 = vmatpush1.bf16.msra.mxu0 %v7142_v24  ;;  %v620_v19 = vld [vmem:[#allocation2 + $0xb88] sm:$0xff]  ;;  %v7343_v23 = vcombine.high %v756_v12, %v760_v14 }
 0x162   :  { %3615 = vmatprep.subr.bf16.mxu0 %v7135_v27  ;;  %v624_v20 = vld [vmem:[#allocation2 + $0xba8] sm:$0xff]  ;;  %v7342_v27 = vcombine.low %v756_v12, %v760_v14 }
 0x163   :  { %3655 = vmatpush1.bf16.msra.mxu1 %v7270_v26  ;;  %v748_v21 = vld [vmem:[#allocation2 + $0xf88] sm:$0xff]  ;;  %v7214_v26 = vcombine.low %v628_v9, %v632_v10  ;;  %v7207_v28 = vcombine.high %v620_v19, %v624_v20 }
 0x164   :  { %3656 = vmatprep.subr.bf16.mxu1 %v7263_v31  ;;  %v752_v24 = vld [vmem:[#allocation2 + $0xfa8] sm:$0xff] }
 0x165   :  { %3616 = vmatpush1.bf16.msra.mxu0 %v7134_v34  ;;  %v612_v29 = vld [vmem:[#allocation2 + $0xb48] sm:$0xff]  ;;  %v7335_v32 = vcombine.high %v748_v21, %v752_v24 }
 0x166   :  { %3617 = vmatprep.subr.bf16.mxu0 %v7127_v35  ;;  %v616_v30 = vld [vmem:[#allocation2 + $0xb68] sm:$0xff]  ;;  %v7334_v35 = vcombine.low %v748_v21, %v752_v24  ;;  %v313_v21 = vld [vmem:[#allocation2 + $0x1f0] sm:$0xff] }
 0x167   :  { %3657 = vmatpush1.bf16.msra.mxu1 %v7262_v53  ;;  %v740_v31 = vld [vmem:[#allocation2 + $0xf48] sm:$0xff]  ;;  %v7206_v53 = vcombine.low %v620_v19, %v624_v20  ;;  %v7199_v37 = vcombine.high %v612_v29, %v616_v30  ;;  %v309_v20 = vld [vmem:[#allocation2 + $0x1d0] sm:$0xff] }
 0x168   :  { %3658 = vmatprep.subr.bf16.mxu1 %v7255_v40  ;;  %v744_v34 = vld [vmem:[#allocation2 + $0xf68] sm:$0xff] }
 0x169   :  { %3618 = vmatpush1.bf16.msra.mxu0 %v7126_v42  ;;  %v604_v38 = vld [vmem:[#allocation2 + $0xb08] sm:$0xff]  ;;  %v7327_v41 = vcombine.high %v740_v31, %v744_v34 }
 0x16a   :  { %3619 = vmatprep.subr.bf16.mxu0 %v7119_v43  ;;  %v608_v39 = vld [vmem:[#allocation2 + $0xb28] sm:$0xff]  ;;  %v7326_v43 = vcombine.low %v740_v31, %v744_v34  ;;  %v6897_v31 = vcombine.high %v309_v20, %v313_v21  ;;  %v305_v34 = vld [vmem:[#allocation2 + $0x1b0] sm:$0xff] }
 0x16b   :  { %3659 = vmatpush1.bf16.msra.mxu1 %v7254_v63  ;;  %v732_v40 = vld [vmem:[#allocation2 + $0xf08] sm:$0xff]  ;;  %v7198_v63 = vcombine.low %v612_v29, %v616_v30  ;;  %v7191_v5 = vcombine.high %v604_v38, %v608_v39 }
 0x16c   :  { %3660 = vmatprep.subr.bf16.mxu1 %v7247_v49  ;;  %v736_v42 = vld [vmem:[#allocation2 + $0xf28] sm:$0xff] }
 0x16d   :  { %3620 = vmatpush1.bf16.msra.mxu0 %v7118_v51  ;;  %v596_v47 = vld [vmem:[#allocation2 + $0xac8] sm:$0xff]  ;;  %v7319_v50 = vcombine.high %v732_v40, %v736_v42 }
 0x16e   :  { %3621 = vmatprep.subr.bf16.mxu0 %v7111_v54  ;;  %v600_v48 = vld [vmem:[#allocation2 + $0xae8] sm:$0xff]  ;;  %v7318_v54 = vcombine.low %v732_v40, %v736_v42  ;;  %v6896_v40 = vcombine.low %v309_v20, %v313_v21 }
 0x16f   :  { %3661 = vmatpush1.bf16.msra.mxu1 %v7246_v52  ;;  %v724_v49 = vld [vmem:[#allocation2 + $0xec8] sm:$0xff]  ;;  %v7190_v52 = vcombine.low %v604_v38, %v608_v39  ;;  %v7183_v55 = vcombine.high %v596_v47, %v600_v48  ;;  %v433_v38 = vld [vmem:[#allocation2 + $0x5b0] sm:$0xff] }
 0x170   :  { %3662 = vmatprep.subr.bf16.mxu1 %v7239_v60  ;;  %v728_v51 = vld [vmem:[#allocation2 + $0xee8] sm:$0xff] }
 0x171   :  { %3622 = vmatpush1.bf16.msra.mxu0 %v7110_v62  ;;  %v588_v56 = vld [vmem:[#allocation2 + $0xa88] sm:$0xff]  ;;  %v7311_v61 = vcombine.high %v724_v49, %v728_v51 }
 0x172   :  { %3623 = vmatprep.subr.bf16.mxu0 %v7103_v1  ;;  %v592_v59 = vld [vmem:[#allocation2 + $0xaa8] sm:$0xff]  ;;  %v7310_v1 = vcombine.low %v724_v49, %v728_v51  ;;  %v421_v49 = vld [vmem:[#allocation2 + $0x550] sm:$0xff] }
 0x173   :  { %3663 = vmatpush1.bf16.msra.mxu1 %v7238_v0  ;;  %v716_v60 = vld [vmem:[#allocation2 + $0xe88] sm:$0xff]  ;;  %v7182_v0 = vcombine.low %v596_v47, %v600_v48  ;;  %v7175_v2 = vcombine.high %v588_v56, %v592_v59  ;;  %v297_v47 = vld [vmem:[#allocation2 + $0x170] sm:$0xff] }
 0x174   :  { %3664 = vmatprep.subr.bf16.mxu1 %v7231_v25  ;;  %v720_v62 = vld [vmem:[#allocation2 + $0xea8] sm:$0xff] }
 0x175   :  { %3624 = vmatpush1.bf16.msra.mxu0 %v7102_v6  ;;  %v580_v3 = vld [vmem:[#allocation2 + $0xa48] sm:$0xff]  ;;  %v7303_v4 = vcombine.high %v716_v60, %v720_v62 }
 0x176   :  { %3625 = vmatprep.subr.bf16.mxu0 %v7095_v8  ;;  %v584_v22 = vld [vmem:[#allocation2 + $0xa68] sm:$0xff]  ;;  %v7302_v8 = vcombine.low %v716_v60, %v720_v62 }
 0x177   :  { %3665 = vmatpush1.bf16.msra.mxu1 %v7230_v7  ;;  %v708_v25 = vld [vmem:[#allocation2 + $0xe48] sm:$0xff]  ;;  %v7174_v7 = vcombine.low %v588_v56, %v592_v59  ;;  %v7167_v9 = vcombine.high %v580_v3, %v584_v22 }
 0x178   :  { %3666 = vmatprep.subr.bf16.mxu1 %v7223_v13  ;;  %v712_v6 = vld [vmem:[#allocation2 + $0xe68] sm:$0xff] }
 0x179   :  { %3626 = vmatpush1.bf16.msra.mxu0 %v7094_v15  ;;  %v572_v10 = vld [vmem:[#allocation2 + $0xa08] sm:$0xff]  ;;  %v7295_v14 = vcombine.high %v708_v25, %v712_v6 }
 0x17a   :  { %3627 = vmatprep.subr.bf16.mxu0 %v7215_v18  ;;  %v576_v12 = vld [vmem:[#allocation2 + $0xa28] sm:$0xff]  ;;  %v7294_v18 = vcombine.low %v708_v25, %v712_v6  ;;  %v417_v25 = vld [vmem:[#allocation2 + $0x530] sm:$0xff] }
 0x17b   :  { %3667 = vmatpush1.bf16.msra.mxu1 %v7222_v17  ;;  %v700_v13 = vld [vmem:[#allocation2 + $0xe08] sm:$0xff]  ;;  %v7166_v17 = vcombine.low %v580_v3, %v584_v22  ;;  %v7159_v19 = vcombine.high %v572_v10, %v576_v12  ;;  %v7158_v29 = vcombine.low %v572_v10, %v576_v12  ;;  %v413_v22 = vld [vmem:[#allocation2 + $0x510] sm:$0xff] }
 0x17c   :  { %3668 = vmatprep.subr.bf16.mxu1 %v7343_v23  ;;  %v704_v15 = vld [vmem:[#allocation2 + $0xe28] sm:$0xff]  ;;  %v437_v23 = vld [vmem:[#allocation2 + $0x5d0] sm:$0xff]  ;;  %v7000_v20 = vcombine.low %v413_v22, %v417_v25 }
 0x17d   :  { %3628 = vmatpush2.bf16.msra.mxu0 %v7214_v26  ;;  %v7287_v24 = vcombine.high %v700_v13, %v704_v15  ;;  %v8798_v26 = vsub.s32 0, %v8728_v44  ;;  %v7286_v30 = vcombine.low %v700_v13, %v704_v15  ;;  %v7001_v13 = vcombine.high %v413_v22, %v417_v25  ;;  %v281_v15 = vld [vmem:[#allocation2 + $0xf0] sm:$0xff] }
 0x17e   :  { %3629 = vmatprep.subr.bf16.mxu0 %v7207_v28  ;;  %v8800_v28 = vld [vmem:[#allocation5] sm:$0xff]  ;;  %v369_v22 = vld [vmem:[#allocation2 + $0x3b0] sm:$0xff] }
 0x17f   :  { %3669 = vmatpush2.bf16.msra.mxu1 %v7342_v27  ;;  %v441_v27 = vld [vmem:[#allocation2 + $0x5f0] sm:$0xff]  ;;  %v768_v39 = vrot.slane %v8800_v28, %v8798_v26 }
 0x180   :  { %3670 = vmatprep.subr.bf16.mxu1 %v7335_v32  ;;  %v301_v32 = vld [vmem:[#allocation2 + $0x190] sm:$0xff] }
 0x181   :  { %3630 = vmatpush2.bf16.msra.mxu0 %v7206_v53  ;;  %v429_v53 = vld [vmem:[#allocation2 + $0x590] sm:$0xff]  ;;  %v6889_v42 = vcombine.high %v301_v32, %v305_v34 }
 0x182   :  { %3631 = vmatprep.subr.bf16.mxu0 %v7199_v37  ;;  %v8803_v37 = vsub.s32 1, %v8728_v44  ;;  %v7016_v56 = vcombine.low %v429_v53, %v433_v38  ;;  %v493_v25 = vld [vmem:[#allocation2 + $0x790] sm:$0xff] }
 0x183   :  { %3671 = vmatpush2.bf16.msra.mxu1 %v7334_v35  ;;  %v7025_v35 = vcombine.high %v437_v23, %v441_v27 }
 0x184   :  { %3672 = vmatprep.subr.bf16.mxu1 %v7327_v41  ;;  %v7024_v41 = vcombine.low %v437_v23, %v441_v27  ;;  %v273_v27 = vld [vmem:[#allocation2 + $0xb0] sm:$0xff] }
 0x185   :  { %3632 = vmatpush2.bf16.msra.mxu0 %v7198_v63  ;;  %v772_v63 = vrot.slane %v8800_v28, %v8803_v37 }
 0x186   :  { %3633 = vmatprep.subr.bf16.mxu0 %v7191_v5  ;;  %v293_v5 = vld [vmem:[#allocation2 + $0x150] sm:$0xff] }
 0x187   :  { %3673 = vmatpush2.bf16.msra.mxu1 %v7326_v43  ;;  %v7017_v43 = vcombine.high %v429_v53, %v433_v38  ;;  %v6881_v59 = vcombine.high %v293_v5, %v297_v47  ;;  %v265_v38 = vld [vmem:[#allocation2 + $0x70] sm:$0xff] }
 0x188   :  { %3674 = vmatprep.subr.bf16.mxu1 %v7319_v50  ;;  %v425_v50 = vld [vmem:[#allocation2 + $0x570] sm:$0xff] }
 0x189   :  { %3634 = vmatpush2.bf16.msra.mxu0 %v7190_v52 }
 0x18a   :  { %3635 = vmatprep.subr.bf16.mxu0 %v7183_v55 }
 0x18b   :  { %3675 = vmatpush2.bf16.msra.mxu1 %v7318_v54  ;;  %v6888_v54 = vcombine.low %v301_v32, %v305_v34 }
 0x18c   :  { %3676 = vmatprep.subr.bf16.mxu1 %v7311_v61 }
 0x18d   :  { %3636 = vmatpush2.bf16.msra.mxu0 %v7182_v0  ;;  %v7009_v0 = vcombine.high %v421_v49, %v425_v50 }
 0x18e   :  { %3637 = vmatprep.subr.bf16.mxu0 %v7175_v2  ;;  %v289_v2 = vld [vmem:[#allocation2 + $0x130] sm:$0xff] }
 0x18f   :  { %3677 = vmatpush2.bf16.msra.mxu1 %v7310_v1  ;;  %v285_v1 = vld [vmem:[#allocation2 + $0x110] sm:$0xff] }
 0x190   :  { %3678 = vmatprep.subr.bf16.mxu1 %v7303_v4  ;;  %v6873_v10 = vcombine.high %v285_v1, %v289_v2 }
 0x191   :  { %3638 = vmatpush2.bf16.msra.mxu0 %v7174_v7  ;;  %v6880_v7 = vcombine.low %v293_v5, %v297_v47  ;;  %v253_v5 = vld [vmem:[#allocation2 + $0x10] sm:$0xff] }
 0x192   :  { %3639 = vmatprep.subr.bf16.mxu0 %v7167_v9  ;;  %v7008_v9 = vcombine.low %v421_v49, %v425_v50  ;;  %v257_v47 = vld [vmem:[#allocation2 + $0x30] sm:$0xff] }
 0x193   :  { %3679 = vmatpush2.bf16.msra.mxu1 %v7302_v8  ;;  %v385_v49 = vld [vmem:[#allocation2 + $0x430] sm:$0xff] }
 0x194   :  { %3680 = vmatprep.subr.bf16.mxu1 %v7295_v14  ;;  %v277_v14 = vld [vmem:[#allocation2 + $0xd0] sm:$0xff] }
 0x195   :  { %3640 = vmatpush2.bf16.msra.mxu0 %v7166_v17  ;;  %v405_v17 = vld [vmem:[#allocation2 + $0x4d0] sm:$0xff]  ;;  %v6865_v21 = vcombine.high %v277_v14, %v281_v15 }
 0x196   :  { %3641 = vmatprep.subr.bf16.mxu0 %v7159_v19  ;;  %v6872_v19 = vcombine.low %v285_v1, %v289_v2 }
 0x197   :  { %3681 = vmatpush2.bf16.msra.mxu1 %v7294_v18  ;;  %v409_v18 = vld [vmem:[#allocation2 + $0x4f0] sm:$0xff] }
 0x198   :  { %3682 = vmatprep.subr.bf16.mxu1 %v7287_v24  ;;  %v6993_v23 = vcombine.high %v405_v17, %v409_v18  ;;  %v269_v24 = vld [vmem:[#allocation2 + $0x90] sm:$0xff]  ;;  %v6992_v32 = vcombine.low %v405_v17, %v409_v18 }
 0x199   :  { %3642 = vmatpush2.bf16.msra.mxu0 %v7158_v29  ;;  %v397_v29 = vld [vmem:[#allocation2 + $0x490] sm:$0xff]  ;;  %v6857_v34 = vcombine.high %v269_v24, %v273_v27 }
 0x19a   :  { %3693 = vmatprep.subr.bf16.mxu0 %v6897_v31  ;;  %v6864_v31 = vcombine.low %v277_v14, %v281_v15  ;;  %v485_v14 = vld [vmem:[#allocation2 + $0x750] sm:$0xff] }
 0x19b   :  { %3683 = vmatpush2.bf16.msra.mxu1 %v7286_v30  ;;  %v401_v30 = vld [vmem:[#allocation2 + $0x4b0] sm:$0xff] }
 0x19c   :  { %3734 = vmatprep.subr.bf16.mxu1 %v7025_v35  ;;  %v3399_v48 = vpop.f32.mrf.mxu0  ;;  %3644 = vmatmul.mubr.bf16.vlgmr.msra.gmra.mxu0 %v8783_v57  ;;  %v6985_v53 = vcombine.high %v397_v29, %v401_v30  ;;  %v261_v35 = vld [vmem:[#allocation2 + $0x50] sm:$0xff] }
 0x19d   :  { %v3400_v51 = vadd.f32 %v3399_v48, %v768_v39  ;;  %3694 = vmatpush1.bf16.msra.mxu0 %v6896_v40  ;;  %3725 = vmatprep.mubr.bf16.mxu0 %v8744_v11  ;;  %v389_v39 = vld [vmem:[#allocation2 + $0x450] sm:$0xff]  ;;  %v6848_v50 = vcombine.low %v261_v35, %v265_v38 }
 0x19e   :  { %v3440_v52 = vpop.f32.mrf.mxu1  ;;  %3685 = vmatmul.mubr.bf16.vlgmr.msra.gmra.mxu1 %v8787_v58  ;;  %v3401_v55 = vpop.f32.mrf.mxu0  ;;  %3695 = vmatprep.subr.bf16.mxu0 %v6889_v42  ;;  %v393_v40 = vld [vmem:[#allocation2 + $0x470] sm:$0xff]  ;;  %v6984_v42 = vcombine.low %v397_v29, %v401_v30 }
 0x19f   :  { %3735 = vmatpush1.bf16.msra.mxu1 %v7024_v41  ;;  %v8811_v60 = vadd.f32 %v3440_v52, %v3400_v51  ;;  %v3402_v61 = vadd.f32 %v3401_v55, %v772_v63  ;;  %3766 = vmatprep.mubr.bf16.mxu1 %v8749_v16  ;;  %v6856_v41 = vcombine.low %v269_v24, %v273_v27  ;;  %v381_v48 = vld [vmem:[#allocation2 + $0x410] sm:$0xff] }
 0x1a0   :  { %v3442_v62 = vpop.f32.mrf.mxu1  ;;  %3736 = vmatprep.subr.bf16.mxu1 %v7017_v43  ;;  %v3403_v3 = vpop.f32.mrf.mxu0  ;;  %v6849_v63 = vcombine.high %v261_v35, %v265_v38  ;;  %v6977_v43 = vcombine.high %v389_v39, %v393_v40  ;;  %v6976_v51 = vcombine.low %v389_v39, %v393_v40  ;;  %v6841_v52 = vcombine.high %v253_v5, %v257_v47  ;;  %v373_v55 = vld [vmem:[#allocation2 + $0x3d0] sm:$0xff] }
 0x1a1   :  { %v8815_v4 = vadd.f32 %v3442_v62, %v3402_v61  ;;  %3696 = vmatpush1.bf16.msra.mxu0 %v6888_v54  ;;  %v6969_v54 = vcombine.high %v381_v48, %v385_v49  ;;  %v505_v61 = vld [vmem:[#allocation2 + $0x7f0] sm:$0xff]  ;;  %v6840_v62 = vcombine.low %v253_v5, %v257_v47 }
 0x1a2   :  { %v3444_v6 = vpop.f32.mrf.mxu1  ;;  %v3404_v8 = vpop.f32.mrf.mxu0  ;;  %3697 = vmatprep.subr.bf16.mxu0 %v6881_v59  ;;  %v501_v59 = vld [vmem:[#allocation2 + $0x7d0] sm:$0xff] }
 0x1a3   :  { %3737 = vmatpush1.bf16.msra.mxu1 %v7016_v56  ;;  %v377_v56 = vld [vmem:[#allocation2 + $0x3f0] sm:$0xff]  ;;  %v7089_v2 = vcombine.high %v501_v59, %v505_v61  ;;  %v7088_v8 = vcombine.low %v501_v59, %v505_v61 }
 0x1a4   :  { %v3445_v12 = vpop.f32.mrf.mxu1  ;;  %3738 = vmatprep.subr.bf16.mxu1 %v7009_v0  ;;  %v6968_v0 = vcombine.low %v381_v48, %v385_v49  ;;  %v6961_v1 = vcombine.high %v373_v55, %v377_v56  ;;  %v365_v3 = vld [vmem:[#allocation2 + $0x390] sm:$0xff] }
 0x1a5   :  { %3698 = vmatpush1.bf16.msra.mxu0 %v6880_v7  ;;  %v497_v6 = vld [vmem:[#allocation2 + $0x7b0] sm:$0xff]  ;;  %v6960_v7 = vcombine.low %v373_v55, %v377_v56  ;;  %v6952_v17 = vcombine.low %v365_v3, %v369_v22 }
 0x1a6   :  { %3699 = vmatprep.subr.bf16.mxu0 %v6873_v10  ;;  %v7081_v10 = vcombine.high %v493_v25, %v497_v6  ;;  %v357_v12 = vld [vmem:[#allocation2 + $0x350] sm:$0xff]  ;;  %v7080_v18 = vcombine.low %v493_v25, %v497_v6 }
 0x1a7   :  { %3739 = vmatpush1.bf16.msra.mxu1 %v7008_v9  ;;  %v6953_v9 = vcombine.high %v365_v3, %v369_v22  ;;  %v489_v15 = vld [vmem:[#allocation2 + $0x770] sm:$0xff] }
 0x1a8   :  { %3740 = vmatprep.subr.bf16.mxu1 %v7001_v13  ;;  %v361_v13 = vld [vmem:[#allocation2 + $0x370] sm:$0xff]  ;;  %v7072_v30 = vcombine.low %v485_v14, %v489_v15 }
 0x1a9   :  { %3700 = vmatpush1.bf16.msra.mxu0 %v6872_v19  ;;  %v6945_v19 = vcombine.high %v357_v12, %v361_v13  ;;  %v477_v24 = vld [vmem:[#allocation2 + $0x710] sm:$0xff]  ;;  %v6944_v29 = vcombine.low %v357_v12, %v361_v13 }
 0x1aa   :  { %3701 = vmatprep.subr.bf16.mxu0 %v6865_v21  ;;  %v349_v21 = vld [vmem:[#allocation2 + $0x310] sm:$0xff] }
 0x1ab   :  { %3741 = vmatpush1.bf16.msra.mxu1 %v7000_v20  ;;  %v7073_v20 = vcombine.high %v485_v14, %v489_v15  ;;  %v481_v27 = vld [vmem:[#allocation2 + $0x730] sm:$0xff] }
 0x1ac   :  { %3742 = vmatprep.subr.bf16.mxu1 %v6993_v23  ;;  %v353_v23 = vld [vmem:[#allocation2 + $0x330] sm:$0xff]  ;;  %v7064_v40 = vcombine.low %v477_v24, %v481_v27 }
 0x1ad   :  { %3702 = vmatpush1.bf16.msra.mxu0 %v6864_v31  ;;  %v6937_v31 = vcombine.high %v349_v21, %v353_v23  ;;  %v469_v35 = vld [vmem:[#allocation2 + $0x6d0] sm:$0xff]  ;;  %v6936_v39 = vcombine.low %v349_v21, %v353_v23 }
 0x1ae   :  { %3703 = vmatprep.subr.bf16.mxu0 %v6857_v34  ;;  %v341_v34 = vld [vmem:[#allocation2 + $0x2d0] sm:$0xff] }
 0x1af   :  { %3743 = vmatpush1.bf16.msra.mxu1 %v6992_v32  ;;  %v7065_v32 = vcombine.high %v477_v24, %v481_v27  ;;  %v473_v38 = vld [vmem:[#allocation2 + $0x6f0] sm:$0xff] }
 0x1b0   :  { %3744 = vmatprep.subr.bf16.mxu1 %v6985_v53  ;;  %v345_v53 = vld [vmem:[#allocation2 + $0x2f0] sm:$0xff]  ;;  %v7056_v49 = vcombine.low %v469_v35, %v473_v38 }
 0x1b1   :  { %3704 = vmatpush1.bf16.msra.mxu0 %v6856_v41  ;;  %v6929_v41 = vcombine.high %v341_v34, %v345_v53  ;;  %v461_v5 = vld [vmem:[#allocation2 + $0x690] sm:$0xff]  ;;  %v6928_v48 = vcombine.low %v341_v34, %v345_v53 }
 0x1b2   :  { %3705 = vmatprep.subr.bf16.mxu0 %v6849_v63  ;;  %v333_v63 = vld [vmem:[#allocation2 + $0x290] sm:$0xff] }
 0x1b3   :  { %3745 = vmatpush1.bf16.msra.mxu1 %v6984_v42  ;;  %v7057_v42 = vcombine.high %v469_v35, %v473_v38  ;;  %v465_v47 = vld [vmem:[#allocation2 + $0x6b0] sm:$0xff] }
 0x1b4   :  { %3746 = vmatprep.subr.bf16.mxu1 %v6977_v43  ;;  %v337_v43 = vld [vmem:[#allocation2 + $0x2b0] sm:$0xff]  ;;  %v7048_v61 = vcombine.low %v461_v5, %v465_v47 }
 0x1b5   :  { %3706 = vmatpush1.bf16.msra.mxu0 %v6848_v50  ;;  %v6921_v50 = vcombine.high %v333_v63, %v337_v43  ;;  %v453_v55 = vld [vmem:[#allocation2 + $0x650] sm:$0xff]  ;;  %v6920_v59 = vcombine.low %v333_v63, %v337_v43 }
 0x1b6   :  { %3707 = vmatprep.subr.bf16.mxu0 %v6841_v52  ;;  %v325_v52 = vld [vmem:[#allocation2 + $0x250] sm:$0xff] }
 0x1b7   :  { %3747 = vmatpush1.bf16.msra.mxu1 %v6976_v51  ;;  %v7049_v51 = vcombine.high %v461_v5, %v465_v47  ;;  %v457_v56 = vld [vmem:[#allocation2 + $0x670] sm:$0xff] }
 0x1b8   :  { %3748 = vmatprep.subr.bf16.mxu1 %v6969_v54  ;;  %v329_v54 = vld [vmem:[#allocation2 + $0x270] sm:$0xff]  ;;  %v7040_v6 = vcombine.low %v453_v55, %v457_v56 }
 0x1b9   :  { %3708 = vmatpush1.bf16.msra.mxu0 %v6840_v62  ;;  %v6913_v62 = vcombine.high %v325_v52, %v329_v54  ;;  %v445_v3 = vld [vmem:[#allocation2 + $0x610] sm:$0xff]  ;;  %v6912_v25 = vcombine.low %v325_v52, %v329_v54 }
 0x1ba   :  { %3709 = vmatprep.subr.bf16.mxu0 %v6961_v1  ;;  %v317_v1 = vld [vmem:[#allocation2 + $0x210] sm:$0xff] }
 0x1bb   :  { %3749 = vmatpush1.bf16.msra.mxu1 %v6968_v0  ;;  %v7041_v0 = vcombine.high %v453_v55, %v457_v56  ;;  %v449_v22 = vld [vmem:[#allocation2 + $0x630] sm:$0xff] }
 0x1bc   :  { %3750 = vmatprep.subr.bf16.mxu1 %v7089_v2  ;;  %v321_v2 = vld [vmem:[#allocation2 + $0x230] sm:$0xff]  ;;  %v7032_v15 = vcombine.low %v445_v3, %v449_v22 }
 0x1bd   :  { %3710 = vmatpush2.bf16.msra.mxu0 %v6960_v7  ;;  %v6905_v7 = vcombine.high %v317_v1, %v321_v2  ;;  %v693_v12 = vld [vmem:[#allocation2 + $0xdd0] sm:$0xff]  ;;  %v6904_v14 = vcombine.low %v317_v1, %v321_v2 }
 0x1be   :  { %3711 = vmatprep.subr.bf16.mxu0 %v6953_v9  ;;  %v565_v9 = vld [vmem:[#allocation2 + $0x9d0] sm:$0xff] }
 0x1bf   :  { %3751 = vmatpush2.bf16.msra.mxu1 %v7088_v8  ;;  %v7033_v8 = vcombine.high %v445_v3, %v449_v22  ;;  %v697_v13 = vld [vmem:[#allocation2 + $0xdf0] sm:$0xff] }
 0x1c0   :  { %3752 = vmatprep.subr.bf16.mxu1 %v7081_v10  ;;  %v569_v10 = vld [vmem:[#allocation2 + $0x9f0] sm:$0xff]  ;;  %v7280_v27 = vcombine.low %v693_v12, %v697_v13 }
 0x1c1   :  { %3712 = vmatpush2.bf16.msra.mxu0 %v6952_v17  ;;  %v7153_v17 = vcombine.high %v565_v9, %v569_v10  ;;  %v685_v21 = vld [vmem:[#allocation2 + $0xd90] sm:$0xff]  ;;  %v7152_v24 = vcombine.low %v565_v9, %v569_v10 }
 0x1c2   :  { %3713 = vmatprep.subr.bf16.mxu0 %v6945_v19  ;;  %v557_v19 = vld [vmem:[#allocation2 + $0x990] sm:$0xff] }
 0x1c3   :  { %3753 = vmatpush2.bf16.msra.mxu1 %v7080_v18  ;;  %v7281_v18 = vcombine.high %v693_v12, %v697_v13  ;;  %v689_v23 = vld [vmem:[#allocation2 + $0xdb0] sm:$0xff] }
 0x1c4   :  { %3754 = vmatprep.subr.bf16.mxu1 %v7073_v20  ;;  %v561_v20 = vld [vmem:[#allocation2 + $0x9b0] sm:$0xff] }
 0x1c5   :  { %3714 = vmatpush2.bf16.msra.mxu0 %v6944_v29  ;;  %v7145_v29 = vcombine.high %v557_v19, %v561_v20  ;;  %v677_v53 = vld [vmem:[#allocation2 + $0xd50] sm:$0xff] }
 0x1c6   :  { %3715 = vmatprep.subr.bf16.mxu0 %v6937_v31  ;;  %v549_v31 = vld [vmem:[#allocation2 + $0x950] sm:$0xff] }
 0x1c7   :  { %3755 = vmatpush2.bf16.msra.mxu1 %v7072_v30  ;;  %v7273_v30 = vcombine.high %v685_v21, %v689_v23  ;;  %v681_v35 = vld [vmem:[#allocation2 + $0xd70] sm:$0xff] }
 0x1c8   :  { %3756 = vmatprep.subr.bf16.mxu1 %v7065_v32  ;;  %v553_v32 = vld [vmem:[#allocation2 + $0x970] sm:$0xff] }
 0x1c9   :  { %3716 = vmatpush2.bf16.msra.mxu0 %v6936_v39  ;;  %v7137_v63 = vcombine.high %v549_v31, %v553_v32  ;;  %v673_v52 = vld [vmem:[#allocation2 + $0xd30] sm:$0xff]  ;;  %v7136_v56 = vcombine.low %v549_v31, %v553_v32 }
 0x1ca   :  { %3717 = vmatprep.subr.bf16.mxu0 %v6929_v41  ;;  %v533_v1 = vld [vmem:[#allocation2 + $0x8d0] sm:$0xff] }
 0x1cb   :  { %3757 = vmatpush2.bf16.msra.mxu1 %v7064_v40  ;;  %v7144_v40 = vcombine.low %v557_v19, %v561_v20  ;;  %v537_v2 = vld [vmem:[#allocation2 + $0x8f0] sm:$0xff] }
 0x1cc   :  { %3758 = vmatprep.subr.bf16.mxu1 %v7057_v42  ;;  %v7272_v42 = vcombine.low %v685_v21, %v689_v23  ;;  %v661_v3 = vld [vmem:[#allocation2 + $0xcd0] sm:$0xff] }
 0x1cd   :  { %3718 = vmatpush2.bf16.msra.mxu0 %v6928_v48  ;;  %v7265_v48 = vcombine.high %v677_v53, %v681_v35  ;;  %v665_v22 = vld [vmem:[#allocation2 + $0xcf0] sm:$0xff] }
 0x1ce   :  { %3719 = vmatprep.subr.bf16.mxu0 %v6921_v50  ;;  %v545_v50 = vld [vmem:[#allocation2 + $0x930] sm:$0xff] }
 0x1cf   :  { %3759 = vmatpush2.bf16.msra.mxu1 %v7056_v49  ;;  %v541_v49 = vld [vmem:[#allocation2 + $0x910] sm:$0xff] }
 0x1d0   :  { %3760 = vmatprep.subr.bf16.mxu1 %v7049_v51  ;;  %v669_v51 = vld [vmem:[#allocation2 + $0xd10] sm:$0xff] }
 0x1d1   :  { %3720 = vmatpush2.bf16.msra.mxu0 %v6920_v59  ;;  %v525_v9 = vld [vmem:[#allocation2 + $0x890] sm:$0xff] }
 0x1d2   :  { %3721 = vmatprep.subr.bf16.mxu0 %v6913_v62  ;;  %v529_v10 = vld [vmem:[#allocation2 + $0x8b0] sm:$0xff] }
 0x1d3   :  { %3761 = vmatpush2.bf16.msra.mxu1 %v7048_v61  ;;  %v7129_v61 = vcombine.high %v541_v49, %v545_v50  ;;  %v653_v12 = vld [vmem:[#allocation2 + $0xc90] sm:$0xff] }
 0x1d4   :  { %3762 = vmatprep.subr.bf16.mxu1 %v7041_v0  ;;  %v7257_v0 = vcombine.high %v669_v51, %v673_v52  ;;  %v657_v13 = vld [vmem:[#allocation2 + $0xcb0] sm:$0xff] }
 0x1d5   :  { %3722 = vmatpush2.bf16.msra.mxu0 %v6912_v25  ;;  %v7128_v25 = vcombine.low %v541_v49, %v545_v50  ;;  %v517_v19 = vld [vmem:[#allocation2 + $0x850] sm:$0xff] }
 0x1d6   :  { %3723 = vmatprep.subr.bf16.mxu0 %v6905_v7  ;;  %v7121_v7 = vcombine.high %v533_v1, %v537_v2  ;;  %v521_v20 = vld [vmem:[#allocation2 + $0x870] sm:$0xff] }
 0x1d7   :  { %3763 = vmatpush2.bf16.msra.mxu1 %v7040_v6  ;;  %v7256_v6 = vcombine.low %v669_v51, %v673_v52  ;;  %v645_v21 = vld [vmem:[#allocation2 + $0xc50] sm:$0xff] }
 0x1d8   :  { %3764 = vmatprep.subr.bf16.mxu1 %v7033_v8  ;;  %v7249_v8 = vcombine.high %v661_v3, %v665_v22  ;;  %v649_v23 = vld [vmem:[#allocation2 + $0xc70] sm:$0xff] }
 0x1d9   :  { %3724 = vmatpush2.bf16.msra.mxu0 %v6904_v14  ;;  %v7120_v14 = vcombine.low %v533_v1, %v537_v2  ;;  %v509_v31 = vld [vmem:[#allocation2 + $0x810] sm:$0xff] }
 0x1da   :  { %3775 = vmatprep.subr.bf16.mxu0 %v7153_v17  ;;  %v7113_v17 = vcombine.high %v525_v9, %v529_v10  ;;  %v513_v32 = vld [vmem:[#allocation2 + $0x830] sm:$0xff] }
 0x1db   :  { %3765 = vmatpush2.bf16.msra.mxu1 %v7032_v15  ;;  %v7248_v15 = vcombine.low %v661_v3, %v665_v22  ;;  %v625_v51 = vld [vmem:[#allocation2 + $0xbb0] sm:$0xff] }
 0x1dc   :  { %3816 = vmatprep.subr.bf16.mxu1 %v7281_v18  ;;  %v3481_v34 = vpop.f32.mrf.mxu0  ;;  %3726 = vmatmul.mubr.bf16.vlgmr.msra.gmra.mxu0 %v8765_v33  ;;  %v7241_v18 = vcombine.high %v653_v12, %v657_v13  ;;  %v749_v52 = vld [vmem:[#allocation2 + $0xf90] sm:$0xff] }
 0x1dd   :  { %v3482_v38 = vadd.f32 %v3481_v34, %v8811_v60  ;;  %3776 = vmatpush1.bf16.msra.mxu0 %v7152_v24  ;;  %3807 = vmatprep.mubr.bf16.mxu0 %v8773_v45  ;;  %v7112_v24 = vcombine.low %v525_v9, %v529_v10  ;;  %v637_v34 = vld [vmem:[#allocation2 + $0xc10] sm:$0xff] }
 0x1de   :  { %v3522_v39 = vpop.f32.mrf.mxu1  ;;  %3767 = vmatmul.mubr.bf16.vlgmr.msra.gmra.mxu1 %v8771_v36  ;;  %v3483_v41 = vpop.f32.mrf.mxu0  ;;  %3777 = vmatprep.subr.bf16.mxu0 %v7145_v29  ;;  %v7105_v29 = vcombine.high %v517_v19, %v521_v20  ;;  %v741_v1 = vld [vmem:[#allocation2 + $0xf50] sm:$0xff] }
 0x1df   :  { %3817 = vmatpush1.bf16.msra.mxu1 %v7280_v27  ;;  %v8820_v43 = vadd.f32 %v3522_v39, %v3482_v38  ;;  %v3484_v5 = vadd.f32 %v3483_v41, %v8815_v4  ;;  %3848 = vmatprep.mubr.bf16.mxu1 %v8776_v46  ;;  %v7264_v4 = vcombine.low %v677_v53, %v681_v35  ;;  %v641_v53 = vld [vmem:[#allocation2 + $0xc30] sm:$0xff] }
 0x1e0   :  { %v3524_v47 = vpop.f32.mrf.mxu1  ;;  %3818 = vmatprep.subr.bf16.mxu1 %v7273_v30  ;;  %v3485_v60 = vpop.f32.mrf.mxu0  ;;  %v7240_v27 = vcombine.low %v653_v12, %v657_v13  ;;  %v7233_v30 = vcombine.high %v645_v21, %v649_v23  ;;  %v7104_v35 = vcombine.low %v517_v19, %v521_v20  ;;  %v7232_v38 = vcombine.low %v645_v21, %v649_v23  ;;  %v629_v41 = vld [vmem:[#allocation2 + $0xbd0] sm:$0xff] }
 0x1e1   :  { %v8825_v54 = vadd.f32 %v3524_v47, %v3484_v5  ;;  %3778 = vmatpush1.bf16.msra.mxu0 %v7144_v40  ;;  %v7097_v39 = vcombine.high %v509_v31, %v513_v32  ;;  %v7225_v40 = vcombine.high %v637_v34, %v641_v53  ;;  %v761_v5 = vld [vmem:[#allocation2 + $0xff0] sm:$0xff]  ;;  %v7096_v47 = vcombine.low %v509_v31, %v513_v32 }
 0x1e2   :  { %v3526_v55 = vpop.f32.mrf.mxu1  ;;  %v3486_v59 = vpop.f32.mrf.mxu0  ;;  %3779 = vmatprep.subr.bf16.mxu0 %v7137_v63  ;;  %v757_v63 = vld [vmem:[#allocation2 + $0xfd0] sm:$0xff] }
 0x1e3   :  { %3819 = vmatpush1.bf16.msra.mxu1 %v7272_v42  ;;  %v633_v42 = vld [vmem:[#allocation2 + $0xbf0] sm:$0xff]  ;;  %v7345_v50 = vcombine.high %v757_v63, %v761_v5  ;;  %v7344_v59 = vcombine.low %v757_v63, %v761_v5 }
 0x1e4   :  { %v3527_v62 = vpop.f32.mrf.mxu1  ;;  %3820 = vmatprep.subr.bf16.mxu1 %v7265_v48  ;;  %v7224_v48 = vcombine.low %v637_v34, %v641_v53  ;;  %v7217_v49 = vcombine.high %v629_v41, %v633_v42  ;;  %v621_v60 = vld [vmem:[#allocation2 + $0xb90] sm:$0xff] }
 0x1e5   :  { %3780 = vmatpush1.bf16.msra.mxu0 %v7136_v56  ;;  %v753_v55 = vld [vmem:[#allocation2 + $0xfb0] sm:$0xff]  ;;  %v7216_v56 = vcombine.low %v629_v41, %v633_v42  ;;  %v7208_v3 = vcombine.low %v621_v60, %v625_v51 }
 0x1e6   :  { %3781 = vmatprep.subr.bf16.mxu0 %v7129_v61  ;;  %v7337_v61 = vcombine.high %v749_v52, %v753_v55  ;;  %v613_v62 = vld [vmem:[#allocation2 + $0xb50] sm:$0xff]  ;;  %v7336_v22 = vcombine.low %v749_v52, %v753_v55 }
 0x1e7   :  { %3821 = vmatpush1.bf16.msra.mxu1 %v7264_v4  ;;  %v7209_v4 = vcombine.high %v621_v60, %v625_v51  ;;  %v745_v2 = vld [vmem:[#allocation2 + $0xf70] sm:$0xff] }
 0x1e8   :  { %3822 = vmatprep.subr.bf16.mxu1 %v7257_v0  ;;  %v617_v0 = vld [vmem:[#allocation2 + $0xb70] sm:$0xff]  ;;  %v7328_v13 = vcombine.low %v741_v1, %v745_v2 }
 0x1e9   :  { %3782 = vmatpush1.bf16.msra.mxu0 %v7128_v25  ;;  %v7201_v25 = vcombine.high %v613_v62, %v617_v0  ;;  %v733_v9 = vld [vmem:[#allocation2 + $0xf10] sm:$0xff]  ;;  %v7200_v12 = vcombine.low %v613_v62, %v617_v0  ;;  %v438_v62 = vld [vmem:[#allocation2 + $0x5d8] sm:$0xff] }
 0x1ea   :  { %3783 = vmatprep.subr.bf16.mxu0 %v7121_v7  ;;  %v605_v7 = vld [vmem:[#allocation2 + $0xb10] sm:$0xff]  ;;  %v442_v0 = vld [vmem:[#allocation2 + $0x5f8] sm:$0xff] }
 0x1eb   :  { %3823 = vmatpush1.bf16.msra.mxu1 %v7256_v6  ;;  %v7329_v6 = vcombine.high %v741_v1, %v745_v2  ;;  %v737_v10 = vld [vmem:[#allocation2 + $0xf30] sm:$0xff]  ;;  %v775_v2 = vsub.s32 2, %v8728_v44 }
 0x1ec   :  { %3824 = vmatprep.subr.bf16.mxu1 %v7249_v8  ;;  %v609_v8 = vld [vmem:[#allocation2 + $0xb30] sm:$0xff]  ;;  %v7320_v23 = vcombine.low %v733_v9, %v737_v10 }
 0x1ed   :  { %3784 = vmatpush1.bf16.msra.mxu0 %v7120_v14  ;;  %v7193_v14 = vcombine.high %v605_v7, %v609_v8  ;;  %v725_v19 = vld [vmem:[#allocation2 + $0xed0] sm:$0xff]  ;;  %v7192_v21 = vcombine.low %v605_v7, %v609_v8  ;;  %v302_v7 = vld [vmem:[#allocation2 + $0x198] sm:$0xff] }
 0x1ee   :  { %3785 = vmatprep.subr.bf16.mxu0 %v7113_v17  ;;  %v597_v17 = vld [vmem:[#allocation2 + $0xad0] sm:$0xff]  ;;  %v306_v8 = vld [vmem:[#allocation2 + $0x1b8] sm:$0xff] }
 0x1ef   :  { %3825 = vmatpush1.bf16.msra.mxu1 %v7248_v15  ;;  %v7321_v15 = vcombine.high %v733_v9, %v737_v10  ;;  %v729_v20 = vld [vmem:[#allocation2 + $0xef0] sm:$0xff]  ;;  %v430_v9 = vld [vmem:[#allocation2 + $0x598] sm:$0xff] }
 0x1f0   :  { %3826 = vmatprep.subr.bf16.mxu1 %v7241_v18  ;;  %v601_v18 = vld [vmem:[#allocation2 + $0xaf0] sm:$0xff]  ;;  %v7312_v53 = vcombine.low %v725_v19, %v729_v20  ;;  %v434_v10 = vld [vmem:[#allocation2 + $0x5b8] sm:$0xff] }
 0x1f1   :  { %3786 = vmatpush1.bf16.msra.mxu0 %v7112_v24  ;;  %v7185_v24 = vcombine.high %v597_v17, %v601_v18  ;;  %v717_v31 = vld [vmem:[#allocation2 + $0xe90] sm:$0xff]  ;;  %v7184_v34 = vcombine.low %v597_v17, %v601_v18  ;;  %v7019_v18 = vcombine.high %v430_v9, %v434_v10 }
 0x1f2   :  { %3787 = vmatprep.subr.bf16.mxu0 %v7105_v29  ;;  %v589_v29 = vld [vmem:[#allocation2 + $0xa90] sm:$0xff] }
 0x1f3   :  { %3827 = vmatpush1.bf16.msra.mxu1 %v7240_v27  ;;  %v7313_v27 = vcombine.high %v725_v19, %v729_v20  ;;  %v721_v32 = vld [vmem:[#allocation2 + $0xeb0] sm:$0xff]  ;;  %v294_v19 = vld [vmem:[#allocation2 + $0x158] sm:$0xff] }
 0x1f4   :  { %3828 = vmatprep.subr.bf16.mxu1 %v7233_v30  ;;  %v593_v30 = vld [vmem:[#allocation2 + $0xab0] sm:$0xff]  ;;  %v7304_v5 = vcombine.low %v717_v31, %v721_v32  ;;  %v298_v20 = vld [vmem:[#allocation2 + $0x178] sm:$0xff] }
 0x1f5   :  { %3788 = vmatpush1.bf16.msra.mxu0 %v7104_v35  ;;  %v7177_v35 = vcombine.high %v589_v29, %v593_v30  ;;  %v709_v41 = vld [vmem:[#allocation2 + $0xe50] sm:$0xff]  ;;  %v7176_v63 = vcombine.low %v589_v29, %v593_v30  ;;  %v6890_v30 = vcombine.low %v302_v7, %v306_v8 }
 0x1f6   :  { %3789 = vmatprep.subr.bf16.mxu0 %v7097_v39  ;;  %v581_v39 = vld [vmem:[#allocation2 + $0xa50] sm:$0xff] }
 0x1f7   :  { %3829 = vmatpush1.bf16.msra.mxu1 %v7232_v38  ;;  %v7305_v38 = vcombine.high %v717_v31, %v721_v32  ;;  %v713_v42 = vld [vmem:[#allocation2 + $0xe70] sm:$0xff]  ;;  %v7018_v32 = vcombine.low %v430_v9, %v434_v10  ;;  %v262_v10 = vld [vmem:[#allocation2 + $0x58] sm:$0xff] }
 0x1f8   :  { %3830 = vmatprep.subr.bf16.mxu1 %v7225_v40  ;;  %v585_v40 = vld [vmem:[#allocation2 + $0xa70] sm:$0xff]  ;;  %v7296_v55 = vcombine.low %v709_v41, %v713_v42 }
 0x1f9   :  { %3790 = vmatpush1.bf16.msra.mxu0 %v7096_v47  ;;  %v7169_v47 = vcombine.high %v581_v39, %v585_v40  ;;  %v701_v60 = vld [vmem:[#allocation2 + $0xe10] sm:$0xff]  ;;  %v7168_v52 = vcombine.low %v581_v39, %v585_v40  ;;  %v286_v39 = vld [vmem:[#allocation2 + $0x118] sm:$0xff] }
 0x1fa   :  { %3791 = vmatprep.subr.bf16.mxu0 %v7217_v49  ;;  %v573_v49 = vld [vmem:[#allocation2 + $0xa10] sm:$0xff]  ;;  %v290_v40 = vld [vmem:[#allocation2 + $0x138] sm:$0xff] }
 0x1fb   :  { %3831 = vmatpush1.bf16.msra.mxu1 %v7224_v48  ;;  %v7297_v48 = vcombine.high %v709_v41, %v713_v42  ;;  %v705_v51 = vld [vmem:[#allocation2 + $0xe30] sm:$0xff]  ;;  %v414_v42 = vld [vmem:[#allocation2 + $0x518] sm:$0xff] }
 0x1fc   :  { %3832 = vmatprep.subr.bf16.mxu1 %v7345_v50  ;;  %v577_v50 = vld [vmem:[#allocation2 + $0xa30] sm:$0xff] }
 0x1fd   :  { %3792 = vmatpush2.bf16.msra.mxu0 %v7216_v56  ;;  %v7161_v56 = vcombine.high %v573_v49, %v577_v50  ;;  %v7160_v1 = vcombine.low %v573_v49, %v577_v50 }
 0x1fe   :  { %3793 = vmatprep.subr.bf16.mxu0 %v7209_v4  ;;  %v310_v4 = vld [vmem:[#allocation2 + $0x1d8] sm:$0xff] }
 0x1ff   :  { %3833 = vmatpush2.bf16.msra.mxu1 %v7344_v59  ;;  %v7289_v59 = vcombine.high %v701_v60, %v705_v51 }
 0x200   :  { %3834 = vmatprep.subr.bf16.mxu1 %v7337_v61  ;;  %v314_v61 = vld [vmem:[#allocation2 + $0x1f8] sm:$0xff] }
 0x201   :  { %3794 = vmatpush2.bf16.msra.mxu0 %v7208_v3  ;;  %v7288_v3 = vcombine.low %v701_v60, %v705_v51  ;;  %v6875_v60 = vcombine.high %v286_v39, %v290_v40 }
 0x202   :  { %3795 = vmatprep.subr.bf16.mxu0 %v7201_v25  ;;  %v7027_v25 = vcombine.high %v438_v62, %v442_v0 }
 0x203   :  { %3835 = vmatpush2.bf16.msra.mxu1 %v7336_v22  ;;  %v6899_v22 = vcombine.high %v310_v4, %v314_v61 }
 0x204   :  { %3836 = vmatprep.subr.bf16.mxu1 %v7329_v6  ;;  %v779_v6 = vsub.s32 3, %v8728_v44 }
 0x205   :  { %3796 = vmatpush2.bf16.msra.mxu0 %v7200_v12  ;;  %v776_v12 = vrot.slane %v8800_v28, %v775_v2 }
 0x206   :  { %3797 = vmatprep.subr.bf16.mxu0 %v7193_v14  ;;  %v7026_v14 = vcombine.low %v438_v62, %v442_v0  ;;  %v780_v17 = vrot.slane %v8800_v28, %v779_v6  ;;  %v270_v0 = vld [vmem:[#allocation2 + $0x98] sm:$0xff] }
 0x207   :  { %3837 = vmatpush2.bf16.msra.mxu1 %v7328_v13  ;;  %v6898_v13 = vcombine.low %v310_v4, %v314_v61  ;;  %v6874_v4 = vcombine.low %v286_v39, %v290_v40 }
 0x208   :  { %3838 = vmatprep.subr.bf16.mxu1 %v7321_v15  ;;  %v6891_v15 = vcombine.high %v302_v7, %v306_v8 }
 0x209   :  { %3798 = vmatpush2.bf16.msra.mxu0 %v7192_v21 }
 0x20a   :  { %3799 = vmatprep.subr.bf16.mxu0 %v7185_v24  ;;  %v426_v24 = vld [vmem:[#allocation2 + $0x578] sm:$0xff] }
 0x20b   :  { %3839 = vmatpush2.bf16.msra.mxu1 %v7320_v23  ;;  %v422_v23 = vld [vmem:[#allocation2 + $0x558] sm:$0xff] }
 0x20c   :  { %3840 = vmatprep.subr.bf16.mxu1 %v7313_v27  ;;  %v7010_v50 = vcombine.low %v422_v23, %v426_v24 }
 0x20d   :  { %3800 = vmatpush2.bf16.msra.mxu0 %v7184_v34  ;;  %v6883_v34 = vcombine.high %v294_v19, %v298_v20 }
 0x20e   :  { %3801 = vmatprep.subr.bf16.mxu0 %v7177_v35 }
 0x20f   :  { %3841 = vmatpush2.bf16.msra.mxu1 %v7312_v53 }
 0x210   :  { %3842 = vmatprep.subr.bf16.mxu1 %v7305_v38  ;;  %v7011_v38 = vcombine.high %v422_v23, %v426_v24  ;;  %v382_v23 = vld [vmem:[#allocation2 + $0x418] sm:$0xff] }
 0x211   :  { %3802 = vmatpush2.bf16.msra.mxu0 %v7176_v63  ;;  %v418_v63 = vld [vmem:[#allocation2 + $0x538] sm:$0xff] }
 0x212   :  { %3803 = vmatprep.subr.bf16.mxu0 %v7169_v47  ;;  %v386_v24 = vld [vmem:[#allocation2 + $0x438] sm:$0xff] }
 0x213   :  { %3843 = vmatpush2.bf16.msra.mxu1 %v7304_v5  ;;  %v6970_v39 = vcombine.low %v382_v23, %v386_v24 }
 0x214   :  { %3844 = vmatprep.subr.bf16.mxu1 %v7297_v48  ;;  %v6882_v48 = vcombine.low %v294_v19, %v298_v20  ;;  %v254_v20 = vld [vmem:[#allocation2 + $0x18] sm:$0xff] }
 0x215   :  { %3804 = vmatpush2.bf16.msra.mxu0 %v7168_v52  ;;  %v7003_v52 = vcombine.high %v414_v42, %v418_v63 }
 0x216   :  { %3805 = vmatprep.subr.bf16.mxu0 %v7161_v56  ;;  %v406_v56 = vld [vmem:[#allocation2 + $0x4d8] sm:$0xff] }
 0x217   :  { %3845 = vmatpush2.bf16.msra.mxu1 %v7296_v55  ;;  %v278_v55 = vld [vmem:[#allocation2 + $0xd8] sm:$0xff] }
 0x218   :  { %3846 = vmatprep.subr.bf16.mxu1 %v7289_v59  ;;  %v410_v59 = vld [vmem:[#allocation2 + $0x4f8] sm:$0xff] }
 0x219   :  { %3806 = vmatpush2.bf16.msra.mxu0 %v7160_v1  ;;  %v6995_v62 = vcombine.high %v406_v56, %v410_v59  ;;  %v274_v1 = vld [vmem:[#allocation2 + $0xb8] sm:$0xff]  ;;  %v6994_v7 = vcombine.low %v406_v56, %v410_v59 }
 0x21a   :  { %3857 = vmatprep.subr.bf16.mxu0 %v6899_v22  ;;  %v402_v22 = vld [vmem:[#allocation2 + $0x4b8] sm:$0xff]  ;;  %v6859_v8 = vcombine.high %v270_v0, %v274_v1 }
 0x21b   :  { %3847 = vmatpush2.bf16.msra.mxu1 %v7288_v3  ;;  %v398_v3 = vld [vmem:[#allocation2 + $0x498] sm:$0xff] }
 0x21c   :  { %3898 = vmatprep.subr.bf16.mxu1 %v7027_v25  ;;  %v3563_v21 = vpop.f32.mrf.mxu0  ;;  %3808 = vmatmul.mubr.bf16.vlgmr.msra.gmra.mxu0 %v8783_v57  ;;  %v6987_v9 = vcombine.high %v398_v3, %v402_v22  ;;  %v490_v56 = vld [vmem:[#allocation2 + $0x778] sm:$0xff] }
 0x21d   :  { %v3564_v27 = vadd.f32 %v3563_v21, %v776_v12  ;;  %3858 = vmatpush1.bf16.msra.mxu0 %v6898_v13  ;;  %3889 = vmatprep.mubr.bf16.mxu0 %v8744_v11  ;;  %v282_v11 = vld [vmem:[#allocation2 + $0xf8] sm:$0xff] }
 0x21e   :  { %v3604_v29 = vpop.f32.mrf.mxu1  ;;  %3849 = vmatmul.mubr.bf16.vlgmr.msra.gmra.mxu1 %v8787_v58  ;;  %v3565_v31 = vpop.f32.mrf.mxu0  ;;  %3859 = vmatprep.subr.bf16.mxu0 %v6891_v15  ;;  %v6867_v61 = vcombine.high %v278_v55, %v282_v11  ;;  %v6866_v25 = vcombine.low %v278_v55, %v282_v11  ;;  %v266_v12 = vld [vmem:[#allocation2 + $0x78] sm:$0xff]  ;;  %v6858_v15 = vcombine.low %v270_v0, %v274_v1 }
 0x21f   :  { %3899 = vmatpush1.bf16.msra.mxu1 %v7026_v14  ;;  %v8837_v28 = vadd.f32 %v3604_v29, %v3564_v27  ;;  %v3566_v53 = vadd.f32 %v3565_v31, %v780_v17  ;;  %3930 = vmatprep.mubr.bf16.mxu1 %v8749_v16  ;;  %v7002_v16 = vcombine.low %v414_v42, %v418_v63  ;;  %v390_v13 = vld [vmem:[#allocation2 + $0x458] sm:$0xff] }
 0x220   :  { %v3606_v35 = vpop.f32.mrf.mxu1  ;;  %3900 = vmatprep.subr.bf16.mxu1 %v7019_v18  ;;  %v3567_v41 = vpop.f32.mrf.mxu0  ;;  %v394_v14 = vld [vmem:[#allocation2 + $0x478] sm:$0xff]  ;;  %v6986_v17 = vcombine.low %v398_v3, %v402_v22  ;;  %v6851_v18 = vcombine.high %v262_v10, %v266_v12  ;;  %v6850_v27 = vcombine.low %v262_v10, %v266_v12  ;;  %v6971_v31 = vcombine.high %v382_v23, %v386_v24 }
 0x221   :  { %v8841_v5 = vadd.f32 %v3606_v35, %v3566_v53  ;;  %3860 = vmatpush1.bf16.msra.mxu0 %v6890_v30  ;;  %v6979_v19 = vcombine.high %v390_v13, %v394_v14  ;;  %v258_v21 = vld [vmem:[#allocation2 + $0x38] sm:$0xff]  ;;  %v6978_v29 = vcombine.low %v390_v13, %v394_v14 }
 0x222   :  { %v3608_v47 = vpop.f32.mrf.mxu1  ;;  %v3568_v49 = vpop.f32.mrf.mxu0  ;;  %3861 = vmatprep.subr.bf16.mxu0 %v6883_v34  ;;  %v6843_v30 = vcombine.high %v254_v20, %v258_v21  ;;  %v378_v34 = vld [vmem:[#allocation2 + $0x3f8] sm:$0xff] }
 0x223   :  { %3901 = vmatpush1.bf16.msra.mxu1 %v7018_v32  ;;  %v374_v32 = vld [vmem:[#allocation2 + $0x3d8] sm:$0xff] }
 0x224   :  { %v3609_v51 = vpop.f32.mrf.mxu1  ;;  %3902 = vmatprep.subr.bf16.mxu1 %v7011_v38  ;;  %v502_v53 = vld [vmem:[#allocation2 + $0x7d8] sm:$0xff]  ;;  %v6842_v38 = vcombine.low %v254_v20, %v258_v21  ;;  %v6963_v40 = vcombine.high %v374_v32, %v378_v34  ;;  %v6962_v49 = vcombine.low %v374_v32, %v378_v34 }
 0x225   :  { %3862 = vmatpush1.bf16.msra.mxu0 %v6882_v48  ;;  %v506_v35 = vld [vmem:[#allocation2 + $0x7f8] sm:$0xff] }
 0x226   :  { %3863 = vmatprep.subr.bf16.mxu0 %v6875_v60  ;;  %v7091_v41 = vcombine.high %v502_v53, %v506_v35  ;;  %v366_v42 = vld [vmem:[#allocation2 + $0x398] sm:$0xff] }
 0x227   :  { %3903 = vmatpush1.bf16.msra.mxu1 %v7010_v50  ;;  %v370_v63 = vld [vmem:[#allocation2 + $0x3b8] sm:$0xff]  ;;  %v7090_v50 = vcombine.low %v502_v53, %v506_v35 }
 0x228   :  { %3904 = vmatprep.subr.bf16.mxu1 %v7003_v52  ;;  %v494_v47 = vld [vmem:[#allocation2 + $0x798] sm:$0xff]  ;;  %v6955_v60 = vcombine.high %v366_v42, %v370_v63  ;;  %v6954_v59 = vcombine.low %v366_v42, %v370_v63 }
 0x229   :  { %3864 = vmatpush1.bf16.msra.mxu0 %v6874_v4  ;;  %v498_v48 = vld [vmem:[#allocation2 + $0x7b8] sm:$0xff] }
 0x22a   :  { %3865 = vmatprep.subr.bf16.mxu0 %v6867_v61  ;;  %v7083_v51 = vcombine.high %v494_v47, %v498_v48  ;;  %v358_v52 = vld [vmem:[#allocation2 + $0x358] sm:$0xff]  ;;  %v7082_v4 = vcombine.low %v494_v47, %v498_v48 }
 0x22b   :  { %3905 = vmatpush1.bf16.msra.mxu1 %v7002_v16  ;;  %v362_v55 = vld [vmem:[#allocation2 + $0x378] sm:$0xff] }
 0x22c   :  { %3906 = vmatprep.subr.bf16.mxu1 %v6995_v62  ;;  %v486_v11 = vld [vmem:[#allocation2 + $0x758] sm:$0xff]  ;;  %v6947_v16 = vcombine.high %v358_v52, %v362_v55  ;;  %v6946_v22 = vcombine.low %v358_v52, %v362_v55 }
 0x22d   :  { %3866 = vmatpush1.bf16.msra.mxu0 %v6866_v25  ;;  %v7075_v61 = vcombine.high %v486_v11, %v490_v56  ;;  %v350_v62 = vld [vmem:[#allocation2 + $0x318] sm:$0xff]  ;;  %v7074_v25 = vcombine.low %v486_v11, %v490_v56 }
 0x22e   :  { %3867 = vmatprep.subr.bf16.mxu0 %v6859_v8  ;;  %v354_v0 = vld [vmem:[#allocation2 + $0x338] sm:$0xff] }
 0x22f   :  { %3907 = vmatpush1.bf16.msra.mxu1 %v6994_v7  ;;  %v478_v1 = vld [vmem:[#allocation2 + $0x718] sm:$0xff]  ;;  %v6939_v7 = vcombine.high %v350_v62, %v354_v0  ;;  %v6938_v14 = vcombine.low %v350_v62, %v354_v0 }
 0x230   :  { %3908 = vmatprep.subr.bf16.mxu1 %v6987_v9  ;;  %v482_v3 = vld [vmem:[#allocation2 + $0x738] sm:$0xff] }
 0x231   :  { %3868 = vmatpush1.bf16.msra.mxu0 %v6858_v15  ;;  %v7067_v8 = vcombine.high %v478_v1, %v482_v3  ;;  %v342_v9 = vld [vmem:[#allocation2 + $0x2d8] sm:$0xff]  ;;  %v7066_v15 = vcombine.low %v478_v1, %v482_v3 }
 0x232   :  { %3869 = vmatprep.subr.bf16.mxu0 %v6851_v18  ;;  %v346_v10 = vld [vmem:[#allocation2 + $0x2f8] sm:$0xff] }
 0x233   :  { %3909 = vmatpush1.bf16.msra.mxu1 %v6986_v17  ;;  %v470_v12 = vld [vmem:[#allocation2 + $0x6d8] sm:$0xff]  ;;  %v6931_v17 = vcombine.high %v342_v9, %v346_v10  ;;  %v6930_v24 = vcombine.low %v342_v9, %v346_v10 }
 0x234   :  { %3910 = vmatprep.subr.bf16.mxu1 %v6979_v19  ;;  %v474_v13 = vld [vmem:[#allocation2 + $0x6f8] sm:$0xff] }
 0x235   :  { %3870 = vmatpush1.bf16.msra.mxu0 %v6850_v27  ;;  %v7059_v18 = vcombine.high %v470_v12, %v474_v13  ;;  %v334_v19 = vld [vmem:[#allocation2 + $0x298] sm:$0xff]  ;;  %v7058_v27 = vcombine.low %v470_v12, %v474_v13 }
 0x236   :  { %3871 = vmatprep.subr.bf16.mxu0 %v6843_v30  ;;  %v338_v20 = vld [vmem:[#allocation2 + $0x2b8] sm:$0xff] }
 0x237   :  { %3911 = vmatpush1.bf16.msra.mxu1 %v6978_v29  ;;  %v462_v21 = vld [vmem:[#allocation2 + $0x698] sm:$0xff]  ;;  %v6923_v29 = vcombine.high %v334_v19, %v338_v20  ;;  %v6922_v35 = vcombine.low %v334_v19, %v338_v20 }
 0x238   :  { %3912 = vmatprep.subr.bf16.mxu1 %v6971_v31  ;;  %v466_v23 = vld [vmem:[#allocation2 + $0x6b8] sm:$0xff] }
 0x239   :  { %3872 = vmatpush1.bf16.msra.mxu0 %v6842_v38  ;;  %v7051_v30 = vcombine.high %v462_v21, %v466_v23  ;;  %v326_v31 = vld [vmem:[#allocation2 + $0x258] sm:$0xff]  ;;  %v7050_v38 = vcombine.low %v462_v21, %v466_v23 }
 0x23a   :  { %3873 = vmatprep.subr.bf16.mxu0 %v6963_v40  ;;  %v330_v32 = vld [vmem:[#allocation2 + $0x278] sm:$0xff] }
 0x23b   :  { %3913 = vmatpush1.bf16.msra.mxu1 %v6970_v39  ;;  %v454_v34 = vld [vmem:[#allocation2 + $0x658] sm:$0xff]  ;;  %v6915_v39 = vcombine.high %v326_v31, %v330_v32  ;;  %v6914_v48 = vcombine.low %v326_v31, %v330_v32 }
 0x23c   :  { %3914 = vmatprep.subr.bf16.mxu1 %v7091_v41  ;;  %v458_v53 = vld [vmem:[#allocation2 + $0x678] sm:$0xff] }
 0x23d   :  { %3874 = vmatpush2.bf16.msra.mxu0 %v6962_v49  ;;  %v7043_v40 = vcombine.high %v454_v34, %v458_v53  ;;  %v318_v41 = vld [vmem:[#allocation2 + $0x218] sm:$0xff]  ;;  %v7042_v49 = vcombine.low %v454_v34, %v458_v53 }
 0x23e   :  { %3875 = vmatprep.subr.bf16.mxu0 %v6955_v60  ;;  %v322_v42 = vld [vmem:[#allocation2 + $0x238] sm:$0xff] }
 0x23f   :  { %3915 = vmatpush2.bf16.msra.mxu1 %v7090_v50  ;;  %v446_v63 = vld [vmem:[#allocation2 + $0x618] sm:$0xff]  ;;  %v6907_v50 = vcombine.high %v318_v41, %v322_v42  ;;  %v6906_v56 = vcombine.low %v318_v41, %v322_v42 }
 0x240   :  { %3916 = vmatprep.subr.bf16.mxu1 %v7083_v51  ;;  %v450_v47 = vld [vmem:[#allocation2 + $0x638] sm:$0xff] }
 0x241   :  { %3876 = vmatpush2.bf16.msra.mxu0 %v6954_v59  ;;  %v7035_v60 = vcombine.high %v446_v63, %v450_v47  ;;  %v566_v51 = vld [vmem:[#allocation2 + $0x9d8] sm:$0xff]  ;;  %v7034_v59 = vcombine.low %v446_v63, %v450_v47 }
 0x242   :  { %3877 = vmatprep.subr.bf16.mxu0 %v6947_v16  ;;  %v570_v52 = vld [vmem:[#allocation2 + $0x9f8] sm:$0xff] }
 0x243   :  { %3917 = vmatpush2.bf16.msra.mxu1 %v7082_v4  ;;  %v694_v55 = vld [vmem:[#allocation2 + $0xdd8] sm:$0xff]  ;;  %v7155_v4 = vcombine.high %v566_v51, %v570_v52  ;;  %v7154_v3 = vcombine.low %v566_v51, %v570_v52 }
 0x244   :  { %3918 = vmatprep.subr.bf16.mxu1 %v7075_v61  ;;  %v698_v11 = vld [vmem:[#allocation2 + $0xdf8] sm:$0xff] }
 0x245   :  { %3878 = vmatpush2.bf16.msra.mxu0 %v6946_v22  ;;  %v7283_v16 = vcombine.high %v694_v55, %v698_v11  ;;  %v558_v61 = vld [vmem:[#allocation2 + $0x998] sm:$0xff]  ;;  %v7282_v22 = vcombine.low %v694_v55, %v698_v11 }
 0x246   :  { %3879 = vmatprep.subr.bf16.mxu0 %v6939_v7  ;;  %v562_v62 = vld [vmem:[#allocation2 + $0x9b8] sm:$0xff] }
 0x247   :  { %3919 = vmatpush2.bf16.msra.mxu1 %v7074_v25  ;;  %v686_v0 = vld [vmem:[#allocation2 + $0xd98] sm:$0xff]  ;;  %v7147_v25 = vcombine.high %v558_v61, %v562_v62 }
 0x248   :  { %3920 = vmatprep.subr.bf16.mxu1 %v7067_v8  ;;  %v690_v1 = vld [vmem:[#allocation2 + $0xdb8] sm:$0xff] }
 0x249   :  { %3880 = vmatpush2.bf16.msra.mxu0 %v6938_v14  ;;  %v7275_v7 = vcombine.high %v686_v0, %v690_v1  ;;  %v550_v8 = vld [vmem:[#allocation2 + $0x958] sm:$0xff]  ;;  %v7274_v19 = vcombine.low %v686_v0, %v690_v1 }
 0x24a   :  { %3881 = vmatprep.subr.bf16.mxu0 %v6931_v17  ;;  %v554_v9 = vld [vmem:[#allocation2 + $0x978] sm:$0xff]  ;;  %v7146_v17 = vcombine.low %v558_v61, %v562_v62 }
 0x24b   :  { %3921 = vmatpush2.bf16.msra.mxu1 %v7066_v15  ;;  %v678_v12 = vld [vmem:[#allocation2 + $0xd58] sm:$0xff]  ;;  %v7139_v20 = vcombine.high %v550_v8, %v554_v9  ;;  %v7138_v31 = vcombine.low %v550_v8, %v554_v9 }
 0x24c   :  { %3922 = vmatprep.subr.bf16.mxu1 %v7059_v18  ;;  %v682_v13 = vld [vmem:[#allocation2 + $0xd78] sm:$0xff] }
 0x24d   :  { %3882 = vmatpush2.bf16.msra.mxu0 %v6930_v24  ;;  %v542_v24 = vld [vmem:[#allocation2 + $0x918] sm:$0xff]  ;;  %v7266_v34 = vcombine.low %v678_v12, %v682_v13 }
 0x24e   :  { %3883 = vmatprep.subr.bf16.mxu0 %v6923_v29  ;;  %v674_v29 = vld [vmem:[#allocation2 + $0xd38] sm:$0xff] }
 0x24f   :  { %3923 = vmatpush2.bf16.msra.mxu1 %v7058_v27  ;;  %v546_v27 = vld [vmem:[#allocation2 + $0x938] sm:$0xff] }
 0x250   :  { %3924 = vmatprep.subr.bf16.mxu1 %v7051_v30  ;;  %v7131_v53 = vcombine.high %v542_v24, %v546_v27  ;;  %v662_v41 = vld [vmem:[#allocation2 + $0xcd8] sm:$0xff]  ;;  %v7130_v42 = vcombine.low %v542_v24, %v546_v27 }
 0x251   :  { %3884 = vmatpush2.bf16.msra.mxu0 %v6922_v35  ;;  %v622_v27 = vld [vmem:[#allocation2 + $0xb98] sm:$0xff] }
 0x252   :  { %3885 = vmatprep.subr.bf16.mxu0 %v6915_v39  ;;  %v534_v39 = vld [vmem:[#allocation2 + $0x8d8] sm:$0xff] }
 0x253   :  { %3925 = vmatpush2.bf16.msra.mxu1 %v7050_v38 }
 0x254   :  { %3926 = vmatprep.subr.bf16.mxu1 %v7043_v40  ;;  %v538_v40 = vld [vmem:[#allocation2 + $0x8f8] sm:$0xff] }
 0x255   :  { %3886 = vmatpush2.bf16.msra.mxu0 %v6914_v48  ;;  %v7123_v63 = vcombine.high %v534_v39, %v538_v40  ;;  %v526_v48 = vld [vmem:[#allocation2 + $0x898] sm:$0xff]  ;;  %v7122_v51 = vcombine.low %v534_v39, %v538_v40 }
 0x256   :  { %3887 = vmatprep.subr.bf16.mxu0 %v6907_v50  ;;  %v654_v50 = vld [vmem:[#allocation2 + $0xc98] sm:$0xff] }
 0x257   :  { %3927 = vmatpush2.bf16.msra.mxu1 %v7042_v49  ;;  %v530_v49 = vld [vmem:[#allocation2 + $0x8b8] sm:$0xff] }
 0x258   :  { %3928 = vmatprep.subr.bf16.mxu1 %v7035_v60  ;;  %v658_v60 = vld [vmem:[#allocation2 + $0xcb8] sm:$0xff]  ;;  %v7115_v55 = vcombine.high %v526_v48, %v530_v49  ;;  %v7114_v61 = vcombine.low %v526_v48, %v530_v49 }
 0x259   :  { %3888 = vmatpush2.bf16.msra.mxu0 %v6906_v56  ;;  %v7243_v11 = vcombine.high %v654_v50, %v658_v60  ;;  %v518_v56 = vld [vmem:[#allocation2 + $0x858] sm:$0xff]  ;;  %v7242_v62 = vcombine.low %v654_v50, %v658_v60 }
 0x25a   :  { %3939 = vmatprep.subr.bf16.mxu0 %v7155_v4  ;;  %v646_v4 = vld [vmem:[#allocation2 + $0xc58] sm:$0xff] }
 0x25b   :  { %3929 = vmatpush2.bf16.msra.mxu1 %v7034_v59  ;;  %v522_v59 = vld [vmem:[#allocation2 + $0x878] sm:$0xff] }
 0x25c   :  { %3980 = vmatprep.subr.bf16.mxu1 %v7283_v16  ;;  %v3645_v10 = vpop.f32.mrf.mxu0  ;;  %3890 = vmatmul.mubr.bf16.vlgmr.msra.gmra.mxu0 %v8765_v33  ;;  %v7267_v33 = vcombine.high %v678_v12, %v682_v13  ;;  %v650_v16 = vld [vmem:[#allocation2 + $0xc78] sm:$0xff]  ;;  %v7107_v0 = vcombine.high %v518_v56, %v522_v59  ;;  %v7106_v8 = vcombine.low %v518_v56, %v522_v59 }
 0x25d   :  { %v3646_v14 = vadd.f32 %v3645_v10, %v8837_v28  ;;  %3940 = vmatpush1.bf16.msra.mxu0 %v7154_v3  ;;  %3971 = vmatprep.mubr.bf16.mxu0 %v8773_v45  ;;  %v666_v45 = vld [vmem:[#allocation2 + $0xcf8] sm:$0xff]  ;;  %v7235_v1 = vcombine.high %v646_v4, %v650_v16  ;;  %v7234_v9 = vcombine.low %v646_v4, %v650_v16 }
 0x25e   :  { %v3686_v15 = vpop.f32.mrf.mxu1  ;;  %3931 = vmatmul.mubr.bf16.vlgmr.msra.gmra.mxu1 %v8771_v36  ;;  %v8846_v18 = vpop.f32.mrf.mxu0  ;;  %3941 = vmatprep.subr.bf16.mxu0 %v7147_v25  ;;  %v670_v36 = vld [vmem:[#allocation2 + $0xd18] sm:$0xff]  ;;  %v7251_v47 = vcombine.high %v662_v41, %v666_v45  ;;  %v7250_v52 = vcombine.low %v662_v41, %v666_v45 }
 0x25f   :  { %3981 = vmatpush1.bf16.msra.mxu1 %v7282_v22  ;;  %v8848_v21 = vadd.f32 %v3686_v15, %v3646_v14  ;;  %4012 = vmatprep.mubr.bf16.mxu1 %v8776_v46  ;;  %v7259_v38 = vcombine.high %v670_v36, %v674_v29  ;;  %v7258_v46 = vcombine.low %v670_v36, %v674_v29  ;;  %v510_v3 = vld [vmem:[#allocation2 + $0x818] sm:$0xff] }
 0x260   :  { %v8850_v23 = vpop.f32.mrf.mxu1  ;;  %3982 = vmatprep.subr.bf16.mxu1 %v7275_v7  ;;  %v3649_v28 = vpop.f32.mrf.mxu0  ;;  %v514_v22 = vld [vmem:[#allocation2 + $0x838] sm:$0xff] }
 0x261   :  { %3942 = vmatpush1.bf16.msra.mxu0 %v7146_v17  ;;  %v638_v25 = vld [vmem:[#allocation2 + $0xc18] sm:$0xff]  ;;  %v7099_v10 = vcombine.high %v510_v3, %v514_v22 }
 0x262   :  { %v3690_v30 = vpop.f32.mrf.mxu1  ;;  %v3650_v32 = vpop.f32.mrf.mxu0  ;;  %3943 = vmatprep.subr.bf16.mxu0 %v7139_v20  ;;  %v642_v7 = vld [vmem:[#allocation2 + $0xc38] sm:$0xff] }
 0x263   :  { %3983 = vmatpush1.bf16.msra.mxu1 %v7274_v19  ;;  %v7227_v12 = vcombine.high %v638_v25, %v642_v7  ;;  %v630_v13 = vld [vmem:[#allocation2 + $0xbd8] sm:$0xff]  ;;  %v7098_v19 = vcombine.low %v510_v3, %v514_v22  ;;  %v7226_v20 = vcombine.low %v638_v25, %v642_v7 }
 0x264   :  { %v3691_v35 = vpop.f32.mrf.mxu1  ;;  %3984 = vmatprep.subr.bf16.mxu1 %v7267_v33  ;;  %v634_v14 = vld [vmem:[#allocation2 + $0xbf8] sm:$0xff] }
 0x265   :  { %3944 = vmatpush1.bf16.msra.mxu0 %v7138_v31  ;;  %v758_v15 = vld [vmem:[#allocation2 + $0xfd8] sm:$0xff]  ;;  %v7219_v33 = vcombine.high %v630_v13, %v634_v14  ;;  %v7218_v30 = vcombine.low %v630_v13, %v634_v14 }
 0x266   :  { %3945 = vmatprep.subr.bf16.mxu0 %v7131_v53  ;;  %v762_v17 = vld [vmem:[#allocation2 + $0xff8] sm:$0xff] }
 0x267   :  { %3985 = vmatpush1.bf16.msra.mxu1 %v7266_v34  ;;  %v7347_v24 = vcombine.high %v758_v15, %v762_v17  ;;  %v626_v28 = vld [vmem:[#allocation2 + $0xbb8] sm:$0xff]  ;;  %v7346_v31 = vcombine.low %v758_v15, %v762_v17 }
 0x268   :  { %3986 = vmatprep.subr.bf16.mxu1 %v7259_v38  ;;  %v750_v36 = vld [vmem:[#allocation2 + $0xf98] sm:$0xff]  ;;  %v7211_v32 = vcombine.high %v622_v27, %v626_v28  ;;  %v7210_v40 = vcombine.low %v622_v27, %v626_v28  ;;  %v3648_v28 = vadd.f32 %v8846_v18, %v8841_v5  ;;  %v4022_v18 = vmax.f32 %v8825_v54, 0.0 }
 0x269   :  { %3946 = vmatpush1.bf16.msra.mxu0 %v7130_v42  ;;  %v754_v29 = vld [vmem:[#allocation2 + $0xfb8] sm:$0xff] }
 0x26a   :  { %3947 = vmatprep.subr.bf16.mxu0 %v7123_v63  ;;  %v7339_v34 = vcombine.high %v750_v36, %v754_v29  ;;  %v614_v53 = vld [vmem:[#allocation2 + $0xb58] sm:$0xff]  ;;  %v7338_v41 = vcombine.low %v750_v36, %v754_v29 }
 0x26b   :  { %3987 = vmatpush1.bf16.msra.mxu1 %v7258_v46  ;;  %v618_v35 = vld [vmem:[#allocation2 + $0xb78] sm:$0xff] }
 0x26c   :  { %3988 = vmatprep.subr.bf16.mxu1 %v7251_v47  ;;  %v742_v38 = vld [vmem:[#allocation2 + $0xf58] sm:$0xff]  ;;  %v7203_v45 = vcombine.high %v614_v53, %v618_v35  ;;  %v7202_v49 = vcombine.low %v614_v53, %v618_v35  ;;  %v783_v53 = vsub.s32 4, %v8728_v44 }
 0x26d   :  { %3948 = vmatpush1.bf16.msra.mxu0 %v7122_v51  ;;  %v746_v39 = vld [vmem:[#allocation2 + $0xf78] sm:$0xff] }
 0x26e   :  { %3949 = vmatprep.subr.bf16.mxu0 %v7115_v55  ;;  %v7331_v42 = vcombine.high %v742_v38, %v746_v39  ;;  %v606_v46 = vld [vmem:[#allocation2 + $0xb18] sm:$0xff]  ;;  %v7330_v50 = vcombine.low %v742_v38, %v746_v39 }
 0x26f   :  { %3989 = vmatpush1.bf16.msra.mxu1 %v7250_v52  ;;  %v610_v63 = vld [vmem:[#allocation2 + $0xb38] sm:$0xff] }
 0x270   :  { %3990 = vmatprep.subr.bf16.mxu1 %v7243_v11  ;;  %v734_v47 = vld [vmem:[#allocation2 + $0xf18] sm:$0xff]  ;;  %v7195_v60 = vcombine.high %v606_v46, %v610_v63  ;;  %v7194_v59 = vcombine.low %v606_v46, %v610_v63  ;;  %v8862_v46 = vpack.c.bf16 %v4022_v18, %v4022_v18 }
 0x271   :  { %3950 = vmatpush1.bf16.msra.mxu0 %v7114_v61  ;;  %v738_v48 = vld [vmem:[#allocation2 + $0xf38] sm:$0xff] }
 0x272   :  { %3951 = vmatprep.subr.bf16.mxu0 %v7107_v0  ;;  %v7323_v51 = vcombine.high %v734_v47, %v738_v48  ;;  %v598_v52 = vld [vmem:[#allocation2 + $0xad8] sm:$0xff]  ;;  %v7322_v4 = vcombine.low %v734_v47, %v738_v48 }
 0x273   :  { %3991 = vmatpush1.bf16.msra.mxu1 %v7242_v62  ;;  %v602_v55 = vld [vmem:[#allocation2 + $0xaf8] sm:$0xff] }
 0x274   :  { %3992 = vmatprep.subr.bf16.mxu1 %v7235_v1  ;;  %v726_v11 = vld [vmem:[#allocation2 + $0xed8] sm:$0xff]  ;;  %v7187_v16 = vcombine.high %v598_v52, %v602_v55  ;;  %v7186_v22 = vcombine.low %v598_v52, %v602_v55 }
 0x275   :  { %3952 = vmatpush1.bf16.msra.mxu0 %v7106_v8  ;;  %v730_v56 = vld [vmem:[#allocation2 + $0xef8] sm:$0xff] }
 0x276   :  { %3953 = vmatprep.subr.bf16.mxu0 %v7099_v10  ;;  %v7315_v61 = vcombine.high %v726_v11, %v730_v56  ;;  %v590_v62 = vld [vmem:[#allocation2 + $0xa98] sm:$0xff]  ;;  %v7314_v25 = vcombine.low %v726_v11, %v730_v56 }
 0x277   :  { %3993 = vmatpush1.bf16.msra.mxu1 %v7234_v9  ;;  %v594_v0 = vld [vmem:[#allocation2 + $0xab8] sm:$0xff] }
 0x278   :  { %3994 = vmatprep.subr.bf16.mxu1 %v7227_v12  ;;  %v718_v1 = vld [vmem:[#allocation2 + $0xe98] sm:$0xff]  ;;  %v7179_v7 = vcombine.high %v590_v62, %v594_v0  ;;  %v7178_v14 = vcombine.low %v590_v62, %v594_v0 }
 0x279   :  { %3954 = vmatpush1.bf16.msra.mxu0 %v7098_v19  ;;  %v722_v3 = vld [vmem:[#allocation2 + $0xeb8] sm:$0xff] }
 0x27a   :  { %3955 = vmatprep.subr.bf16.mxu0 %v7219_v33  ;;  %v7307_v8 = vcombine.high %v718_v1, %v722_v3  ;;  %v582_v9 = vld [vmem:[#allocation2 + $0xa58] sm:$0xff]  ;;  %v7306_v15 = vcombine.low %v718_v1, %v722_v3 }
 0x27b   :  { %3995 = vmatpush1.bf16.msra.mxu1 %v7226_v20  ;;  %v586_v10 = vld [vmem:[#allocation2 + $0xa78] sm:$0xff] }
 0x27c   :  { %3996 = vmatprep.subr.bf16.mxu1 %v7347_v24  ;;  %v710_v12 = vld [vmem:[#allocation2 + $0xe58] sm:$0xff]  ;;  %v7171_v17 = vcombine.high %v582_v9, %v586_v10  ;;  %v7170_v36 = vcombine.low %v582_v9, %v586_v10 }
 0x27d   :  { %3956 = vmatpush2.bf16.msra.mxu0 %v7218_v30  ;;  %v714_v13 = vld [vmem:[#allocation2 + $0xe78] sm:$0xff] }
 0x27e   :  { %3957 = vmatprep.subr.bf16.mxu0 %v7211_v32  ;;  %v7299_v19 = vcombine.high %v710_v12, %v714_v13  ;;  %v574_v20 = vld [vmem:[#allocation2 + $0xa18] sm:$0xff]  ;;  %v7298_v29 = vcombine.low %v710_v12, %v714_v13  ;;  %v3689_v32 = vadd.f32 %v8850_v23, %v3648_v28 }
 0x27f   :  { %3997 = vmatpush2.bf16.msra.mxu1 %v7346_v31  ;;  %v578_v33 = vld [vmem:[#allocation2 + $0xa38] sm:$0xff] }
 0x280   :  { %3998 = vmatprep.subr.bf16.mxu1 %v7339_v34  ;;  %v702_v24 = vld [vmem:[#allocation2 + $0xe18] sm:$0xff]  ;;  %v7163_v30 = vcombine.high %v574_v20, %v578_v33  ;;  %v7162_v34 = vcombine.low %v574_v20, %v578_v33  ;;  %v4024_v39 = vmax.f32 %v3689_v32, 0.0 }
 0x281   :  { %3958 = vmatpush2.bf16.msra.mxu0 %v7210_v40  ;;  %v706_v27 = vld [vmem:[#allocation2 + $0xe38] sm:$0xff]  ;;  %v8859_v40 = vld [vmem:[#allocation5] sm:$0xff] }
 0x282   :  { %3959 = vmatprep.subr.bf16.mxu0 %v7203_v45  ;;  %v7291_v31 = vcombine.high %v702_v24, %v706_v27  ;;  %v7290_v35 = vcombine.low %v702_v24, %v706_v27  ;;  %v7811_v38 = vld [vmem:[#allocation7 + $0xe4] ss:$16 sps:$4 sm:$0xff]   ;;  %v7809_v45 = vld [vmem:[#allocation7 + $0xe0] ss:$16 sps:$4 sm:$0xff]   ;;  %v8865_v48 = vpack.c.bf16 %v4024_v39, %v4024_v39 }
 0x283   :  { %3999 = vmatpush2.bf16.msra.mxu1 %v7338_v41  ;;  %v7814_v5 = vld [vmem:[#allocation7 + $0x2e4] ss:$16 sps:$4 sm:$0xff]   ;;  %v784_v41 = vrot.slane %v8859_v40, %v783_v53  ;;  %v7812_v23 = vld [vmem:[#allocation7 + $0x2e0] ss:$16 sps:$4 sm:$0xff]  }
 0x284   :  { %4000 = vmatprep.subr.bf16.mxu1 %v7331_v42  ;;  %v7817_v42 = vld [vmem:[#allocation7 + $0xc4] ss:$16 sps:$4 sm:$0xff]   ;;  %v7827_v1 = vld [vmem:[#allocation7 + $0x80] ss:$16 sps:$4 sm:$0xff]  }
 0x285   :  { %3960 = vmatpush2.bf16.msra.mxu0 %v7202_v49  ;;  %v7820_v47 = vld [vmem:[#allocation7 + $0x2c4] ss:$16 sps:$4 sm:$0xff]   ;;  %v7830_v3 = vld [vmem:[#allocation7 + $0x280] ss:$16 sps:$4 sm:$0xff]  }
 0x286   :  { %3961 = vmatprep.subr.bf16.mxu0 %v7195_v60  ;;  %v7823_v52 = vld [vmem:[#allocation7 + $0xa4] ss:$16 sps:$4 sm:$0xff]   ;;  %v7839_v12 = vld [vmem:[#allocation7 + $0x40] ss:$16 sps:$4 sm:$0xff]  }
 0x287   :  { %4001 = vmatpush2.bf16.msra.mxu1 %v7330_v50  ;;  %v7815_v50 = vld [vmem:[#allocation7 + $0xc0] ss:$16 sps:$4 sm:$0xff]   ;;  %v7826_v11 = vld [vmem:[#allocation7 + $0x2a4] ss:$16 sps:$4 sm:$0xff]  }
 0x288   :  { %4002 = vmatprep.subr.bf16.mxu1 %v7323_v51  ;;  %v7818_v51 = vld [vmem:[#allocation7 + $0x2c0] ss:$16 sps:$4 sm:$0xff]   ;;  %v7832_v0 = vld [vmem:[#allocation7 + $0x284] ss:$16 sps:$4 sm:$0xff]  }
 0x289   :  { %3962 = vmatpush2.bf16.msra.mxu0 %v7194_v59  ;;  %v7821_v59 = vld [vmem:[#allocation7 + $0xa0] ss:$16 sps:$4 sm:$0xff]   ;;  %v7841_v9 = vld [vmem:[#allocation7 + $0x44] ss:$16 sps:$4 sm:$0xff]  }
 0x28a   :  { %3963 = vmatprep.subr.bf16.mxu0 %v7187_v16  ;;  %v7824_v16 = vld [vmem:[#allocation7 + $0x2a0] ss:$16 sps:$4 sm:$0xff]   ;;  %v7844_v10 = vld [vmem:[#allocation7 + $0x244] ss:$16 sps:$4 sm:$0xff]  }
 0x28b   :  { %4003 = vmatpush2.bf16.msra.mxu1 %v7322_v4  ;;  %v7842_v13 = vld [vmem:[#allocation7 + $0x240] ss:$16 sps:$4 sm:$0xff]   ;;  %v7853_v20 = vld [vmem:[#allocation7 + $0x4] ss:$16 sps:$4 sm:$0xff]  }
 0x28c   :  { %4004 = vmatprep.subr.bf16.mxu1 %v7315_v61  ;;  %v7829_v61 = vld [vmem:[#allocation7 + $0x84] ss:$16 sps:$4 sm:$0xff]   ;;  %v7851_v24 = vld [vmem:[#allocation7] ss:$16 sps:$4 sm:$0xff]  }
 0x28d   :  { %3964 = vmatpush2.bf16.msra.mxu0 %v7186_v22  ;;  %v7835_v22 = vld [vmem:[#allocation7 + $0x64] ss:$16 sps:$4 sm:$0xff]   ;;  %v7854_v27 = vld [vmem:[#allocation7 + $0x200] ss:$16 sps:$4 sm:$0xff]  }
 0x28e   :  { %3965 = vmatprep.subr.bf16.mxu0 %v7179_v7  ;;  %v7833_v7 = vld [vmem:[#allocation7 + $0x60] ss:$16 sps:$4 sm:$0xff]   ;;  %v7856_v33 = vld [vmem:[#allocation7 + $0x204] ss:$16 sps:$4 sm:$0xff]  }
 0x28f   :  { %4005 = vmatpush2.bf16.msra.mxu1 %v7314_v25  ;;  %v7838_v25 = vld [vmem:[#allocation7 + $0x264] ss:$16 sps:$4 sm:$0xff]   ;;  %v7866_v53 = vld [vmem:[#allocation7 + $0x3c0] ss:$16 sps:$4 sm:$0xff]  }
 0x290   :  { %4006 = vmatprep.subr.bf16.mxu1 %v7307_v8  ;;  %v7836_v8 = vld [vmem:[#allocation7 + $0x260] ss:$16 sps:$4 sm:$0xff]   ;;  %v7859_v28 = vld [vmem:[#allocation7 + $0x1e4] ss:$16 sps:$4 sm:$0xff]  }
 0x291   :  { %3966 = vmatpush2.bf16.msra.mxu0 %v7178_v14  ;;  %v7847_v14 = vld [vmem:[#allocation7 + $0x24] ss:$16 sps:$4 sm:$0xff]   ;;  %v7872_v18 = vld [vmem:[#allocation7 + $0x3a0] ss:$16 sps:$4 sm:$0xff]  }
 0x292   :  { %3967 = vmatprep.subr.bf16.mxu0 %v7171_v17  ;;  %v7845_v17 = vld [vmem:[#allocation7 + $0x20] ss:$16 sps:$4 sm:$0xff]   ;;  %v7868_v32 = vld [vmem:[#allocation7 + $0x3c4] ss:$16 sps:$4 sm:$0xff]  }
 0x293   :  { %4007 = vmatpush2.bf16.msra.mxu1 %v7306_v15  ;;  %v7850_v15 = vld [vmem:[#allocation7 + $0x224] ss:$16 sps:$4 sm:$0xff]  }
 0x294   :  { %4008 = vmatprep.subr.bf16.mxu1 %v7299_v19  ;;  %v7848_v19 = vld [vmem:[#allocation7 + $0x220] ss:$16 sps:$4 sm:$0xff]   ;;  %v7877_v39 = vld [vmem:[#allocation7 + $0x184] ss:$16 sps:$4 sm:$0xff]  }
 0x295   :  { %3968 = vmatpush2.bf16.msra.mxu0 %v7170_v36  ;;  %v7862_v36 = vld [vmem:[#allocation7 + $0x3e4] ss:$16 sps:$4 sm:$0xff]  }
 0x296   :  { %3969 = vmatprep.subr.bf16.mxu0 %v7163_v30  ;;  %v7860_v30 = vld [vmem:[#allocation7 + $0x3e0] ss:$16 sps:$4 sm:$0xff]  }
 0x297   :  { %4009 = vmatpush2.bf16.msra.mxu1 %v7298_v29  ;;  %v7857_v29 = vld [vmem:[#allocation7 + $0x1e0] ss:$16 sps:$4 sm:$0xff]  }
 0x298   :  { %4010 = vmatprep.subr.bf16.mxu1 %v7291_v31  ;;  %v7865_v31 = vld [vmem:[#allocation7 + $0x1c4] ss:$16 sps:$4 sm:$0xff]  }
 0x299   :  { %3970 = vmatpush2.bf16.msra.mxu0 %v7162_v34  ;;  %v7863_v34 = vld [vmem:[#allocation7 + $0x1c0] ss:$16 sps:$4 sm:$0xff]  }
 0x29a   :  { %5595 = vmatprep.subr.bf16.mxu0 %v7811_v38  ;;  %v7874_v38 = vld [vmem:[#allocation7 + $0x3a4] ss:$16 sps:$4 sm:$0xff]  }
 0x29b   :  { %4011 = vmatpush2.bf16.msra.mxu1 %v7290_v35  ;;  %v7871_v35 = vld [vmem:[#allocation7 + $0x1a4] ss:$16 sps:$4 sm:$0xff]  }
 0x29c   :  { %5636 = vmatprep.subr.bf16.mxu1 %v7814_v5  ;;  %v3727_v63 = vpop.f32.mrf.mxu0  ;;  %3972 = vmatmul.mubr.bf16.vlgmr.msra.gmra.mxu0 %v8783_v57  ;;  %v7869_v5 = vld [vmem:[#allocation7 + $0x1a0] ss:$16 sps:$4 sm:$0xff]  }
 0x29d   :  { %v3728_v54 = vadd.f32 %v3727_v63, %v784_v41  ;;  %5596 = vmatpush1.bf16.msra.mxu0 %v7809_v45  ;;  %5627 = vmatprep.mubr.bf16.mxu0 %v8862_v46  ;;  %v7880_v41 = vld [vmem:[#allocation7 + $0x384] ss:$16 sps:$4 sm:$0xff]   ;;  %v7875_v45 = vld [vmem:[#allocation7 + $0x180] ss:$16 sps:$4 sm:$0xff]  }
 0x29e   :  { %v3768_v49 = vpop.f32.mrf.mxu1  ;;  %4013 = vmatmul.mubr.bf16.vlgmr.msra.gmra.mxu1 %v8787_v58  ;;  %v8869_v60 = vpop.f32.mrf.mxu0  ;;  %5597 = vmatprep.subr.bf16.mxu0 %v7817_v42  ;;  %v7883_v42 = vld [vmem:[#allocation7 + $0x164] ss:$16 sps:$4 sm:$0xff]  }
 0x29f   :  { %5637 = vmatpush1.bf16.msra.mxu1 %v7812_v23  ;;  %v8871_v55 = vadd.f32 %v3768_v49, %v3728_v54  ;;  %5668 = vmatprep.mubr.bf16.mxu1 %v8865_v48  ;;  %v7878_v23 = vld [vmem:[#allocation7 + $0x380] ss:$16 sps:$4 sm:$0xff]   ;;  %v7886_v63 = vld [vmem:[#allocation7 + $0x364] ss:$16 sps:$4 sm:$0xff]  }
 0x2a0   :  { %v8874_v57 = vpop.f32.mrf.mxu1  ;;  %v3731_v56 = vpop.f32.mrf.mxu0  ;;  %5638 = vmatprep.subr.bf16.mxu1 %v7820_v47  ;;  %v7881_v47 = vld [vmem:[#allocation7 + $0x160] ss:$16 sps:$4 sm:$0xff]   ;;  %v7889_v49 = vld [vmem:[#allocation7 + $0x144] ss:$16 sps:$4 sm:$0xff]  }
 0x2a1   :  { %5598 = vmatpush1.bf16.msra.mxu0 %v7815_v50  ;;  %v7884_v54 = vld [vmem:[#allocation7 + $0x360] ss:$16 sps:$4 sm:$0xff]   ;;  %v7892_v50 = vld [vmem:[#allocation7 + $0x344] ss:$16 sps:$4 sm:$0xff]  }
 0x2a2   :  { %v3772_v58 = vpop.f32.mrf.mxu1  ;;  %v3732_v4 = vpop.f32.mrf.mxu0  ;;  %5599 = vmatprep.subr.bf16.mxu0 %v7823_v52  ;;  %v7890_v52 = vld [vmem:[#allocation7 + $0x340] ss:$16 sps:$4 sm:$0xff]   ;;  %v7898_v56 = vld [vmem:[#allocation7 + $0x324] ss:$16 sps:$4 sm:$0xff]  }
 0x2a3   :  { %5639 = vmatpush1.bf16.msra.mxu1 %v7818_v51  ;;  %v7887_v51 = vld [vmem:[#allocation7 + $0x140] ss:$16 sps:$4 sm:$0xff]   ;;  %v787_v58 = vsub.s32 5, %v8728_v44 }
 0x2a4   :  { %v3773_v62 = vpop.f32.mrf.mxu1  ;;  %5640 = vmatprep.subr.bf16.mxu1 %v7826_v11  ;;  %v7895_v11 = vld [vmem:[#allocation7 + $0x124] ss:$16 sps:$4 sm:$0xff]   ;;  %v7896_v4 = vld [vmem:[#allocation7 + $0x320] ss:$16 sps:$4 sm:$0xff]  }
 0x2a5   :  { %5600 = vmatpush1.bf16.msra.mxu0 %v7821_v59  ;;  %v7893_v59 = vld [vmem:[#allocation7 + $0x120] ss:$16 sps:$4 sm:$0xff]   ;;  %v788_v62 = vrot.slane %v8859_v40, %v787_v58  ;;  %v8006_v58 = vld [vmem:[#allocation7 + $0x604] ss:$16 sps:$4 sm:$0xff]  }
 0x2a6   :  { %5601 = vmatprep.subr.bf16.mxu0 %v7829_v61  ;;  %v7904_v61 = vld [vmem:[#allocation7 + $0x304] ss:$16 sps:$4 sm:$0xff]  }
 0x2a7   :  { %5641 = vmatpush1.bf16.msra.mxu1 %v7824_v16  ;;  %v7901_v16 = vld [vmem:[#allocation7 + $0x104] ss:$16 sps:$4 sm:$0xff]  }
 0x2a8   :  { %5642 = vmatprep.subr.bf16.mxu1 %v7832_v0  ;;  %v7899_v0 = vld [vmem:[#allocation7 + $0x100] ss:$16 sps:$4 sm:$0xff]  }
 0x2a9   :  { %5602 = vmatpush1.bf16.msra.mxu0 %v7827_v1  ;;  %v4021_v1 = vmax.f32 %v8820_v43, 0.0  ;;  %v7970_v43 = vld [vmem:[#allocation7 + $0x6c4] ss:$16 sps:$4 sm:$0xff]  }
 0x2aa   :  { %5603 = vmatprep.subr.bf16.mxu0 %v7835_v22  ;;  %v7907_v22 = vld [vmem:[#allocation7 + $0x4e4] ss:$16 sps:$4 sm:$0xff]  }
 0x2ab   :  { %5643 = vmatpush1.bf16.msra.mxu1 %v7830_v3  ;;  %v7902_v3 = vld [vmem:[#allocation7 + $0x300] ss:$16 sps:$4 sm:$0xff]  }
 0x2ac   :  { %5644 = vmatprep.subr.bf16.mxu1 %v7838_v25  ;;  %v4023_v25 = vmax.f32 %v8848_v21, 0.0 }
 0x2ad   :  { %5604 = vmatpush1.bf16.msra.mxu0 %v7833_v7  ;;  %v7964_v7 = vld [vmem:[#allocation7 + $0x6e4] ss:$16 sps:$4 sm:$0xff]  }
 0x2ae   :  { %5605 = vmatprep.subr.bf16.mxu0 %v7841_v9  ;;  %v7905_v9 = vld [vmem:[#allocation7 + $0x4e0] ss:$16 sps:$4 sm:$0xff]  }
 0x2af   :  { %5645 = vmatpush1.bf16.msra.mxu1 %v7836_v8  ;;  %v3730_v8 = vadd.f32 %v8869_v60, %v788_v62  ;;  %v7908_v60 = vld [vmem:[#allocation7 + $0x4c0] ss:$16 sps:$4 sm:$0xff]  }
 0x2b0   :  { %5646 = vmatprep.subr.bf16.mxu1 %v7844_v10  ;;  %v8881_v10 = vpack.c.bf16 %v4021_v1, %v4021_v1  ;;  %v7929_v62 = vld [vmem:[#allocation7 + $0x5e0] ss:$16 sps:$4 sm:$0xff]  }
 0x2b1   :  { %5606 = vmatpush1.bf16.msra.mxu0 %v7839_v12  ;;  %v7910_v12 = vld [vmem:[#allocation7 + $0x4c4] ss:$16 sps:$4 sm:$0xff]   ;;  %v3771_v21 = vadd.f32 %v8874_v57, %v3730_v8  ;;  %v7911_v57 = vld [vmem:[#allocation7 + $0x4a0] ss:$16 sps:$4 sm:$0xff]  }
 0x2b2   :  { %5607 = vmatprep.subr.bf16.mxu0 %v7847_v14  ;;  %v8883_v14 = vpack.c.bf16 %v4023_v25, %v4023_v25  ;;  %v8010_v1 = vld [vmem:[#allocation7 + $0x7e0] ss:$16 sps:$4 sm:$0xff]   ;;  %v7937_v25 = vld [vmem:[#allocation7 + $0x5a4] ss:$16 sps:$4 sm:$0xff]  }
 0x2b3   :  { %5647 = vmatpush1.bf16.msra.mxu1 %v7842_v13  ;;  %v7962_v13 = vld [vmem:[#allocation7 + $0x6e0] ss:$16 sps:$4 sm:$0xff]   ;;  %v8024_v8 = vld [vmem:[#allocation7 + $0x7a4] ss:$16 sps:$4 sm:$0xff]  }
 0x2b4   :  { %5648 = vmatprep.subr.bf16.mxu1 %v7850_v15 }
 0x2b5   :  { %5608 = vmatpush1.bf16.msra.mxu0 %v7845_v17 }
 0x2b6   :  { %5609 = vmatprep.subr.bf16.mxu0 %v7853_v20  ;;  %v7913_v20 = vld [vmem:[#allocation7 + $0x4a4] ss:$16 sps:$4 sm:$0xff]  }
 0x2b7   :  { %5649 = vmatpush1.bf16.msra.mxu1 %v7848_v19 }
 0x2b8   :  { %5650 = vmatprep.subr.bf16.mxu1 %v7856_v33  ;;  %v7968_v33 = vld [vmem:[#allocation7 + $0x6c0] ss:$16 sps:$4 sm:$0xff]  }
 0x2b9   :  { %5610 = vmatpush1.bf16.msra.mxu0 %v7851_v24 }
 0x2ba   :  { %5611 = vmatprep.subr.bf16.mxu0 %v7859_v28  ;;  %v7976_v28 = vld [vmem:[#allocation7 + $0x6a4] ss:$16 sps:$4 sm:$0xff]  }
 0x2bb   :  { %5651 = vmatpush1.bf16.msra.mxu1 %v7854_v27 }
 0x2bc   :  { %5652 = vmatprep.subr.bf16.mxu1 %v7862_v36 }
 0x2bd   :  { %5612 = vmatpush2.bf16.msra.mxu0 %v7857_v29 }
 0x2be   :  { %5613 = vmatprep.subr.bf16.mxu0 %v7865_v31 }
 0x2bf   :  { %5653 = vmatpush2.bf16.msra.mxu1 %v7860_v30 }
 0x2c0   :  { %5654 = vmatprep.subr.bf16.mxu1 %v7868_v32  ;;  %v7916_v32 = vld [vmem:[#allocation7 + $0x484] ss:$16 sps:$4 sm:$0xff]  }
 0x2c1   :  { %5614 = vmatpush2.bf16.msra.mxu0 %v7863_v34  ;;  %v7974_v34 = vld [vmem:[#allocation7 + $0x6a0] ss:$16 sps:$4 sm:$0xff]  }
 0x2c2   :  { %5615 = vmatprep.subr.bf16.mxu0 %v7871_v35 }
 0x2c3   :  { %5655 = vmatpush2.bf16.msra.mxu1 %v7866_v53 }
 0x2c4   :  { %5656 = vmatprep.subr.bf16.mxu1 %v7874_v38  ;;  %v7982_v38 = vld [vmem:[#allocation7 + $0x684] ss:$16 sps:$4 sm:$0xff]  }
 0x2c5   :  { %5616 = vmatpush2.bf16.msra.mxu0 %v7869_v5 }
 0x2c6   :  { %5617 = vmatprep.subr.bf16.mxu0 %v7877_v39  ;;  %v7919_v39 = vld [vmem:[#allocation7 + $0x464] ss:$16 sps:$4 sm:$0xff]  }
 0x2c7   :  { %5657 = vmatpush2.bf16.msra.mxu1 %v7872_v18  ;;  %v7914_v18 = vld [vmem:[#allocation7 + $0x480] ss:$16 sps:$4 sm:$0xff]  }
 0x2c8   :  { %5658 = vmatprep.subr.bf16.mxu1 %v7880_v41  ;;  %v7980_v41 = vld [vmem:[#allocation7 + $0x680] ss:$16 sps:$4 sm:$0xff]  }
 0x2c9   :  { %5618 = vmatpush2.bf16.msra.mxu0 %v7875_v45  ;;  %v7988_v45 = vld [vmem:[#allocation7 + $0x664] ss:$16 sps:$4 sm:$0xff]  }
 0x2ca   :  { %5619 = vmatprep.subr.bf16.mxu0 %v7883_v42  ;;  %v7922_v42 = vld [vmem:[#allocation7 + $0x444] ss:$16 sps:$4 sm:$0xff]  }
 0x2cb   :  { %5659 = vmatpush2.bf16.msra.mxu1 %v7878_v23  ;;  %v7917_v23 = vld [vmem:[#allocation7 + $0x460] ss:$16 sps:$4 sm:$0xff]  }
 0x2cc   :  { %5660 = vmatprep.subr.bf16.mxu1 %v7886_v63  ;;  %v7986_v63 = vld [vmem:[#allocation7 + $0x660] ss:$16 sps:$4 sm:$0xff]  }
 0x2cd   :  { %5620 = vmatpush2.bf16.msra.mxu0 %v7881_v47  ;;  %v7994_v47 = vld [vmem:[#allocation7 + $0x644] ss:$16 sps:$4 sm:$0xff]  }
 0x2ce   :  { %5621 = vmatprep.subr.bf16.mxu0 %v7889_v49  ;;  %v7925_v49 = vld [vmem:[#allocation7 + $0x424] ss:$16 sps:$4 sm:$0xff]  }
 0x2cf   :  { %5661 = vmatpush2.bf16.msra.mxu1 %v7884_v54  ;;  %v7920_v54 = vld [vmem:[#allocation7 + $0x440] ss:$16 sps:$4 sm:$0xff]  }
 0x2d0   :  { %5662 = vmatprep.subr.bf16.mxu1 %v7892_v50  ;;  %v7992_v50 = vld [vmem:[#allocation7 + $0x640] ss:$16 sps:$4 sm:$0xff]  }
 0x2d1   :  { %5622 = vmatpush2.bf16.msra.mxu0 %v7887_v51  ;;  %v8000_v51 = vld [vmem:[#allocation7 + $0x624] ss:$16 sps:$4 sm:$0xff]  }
 0x2d2   :  { %5623 = vmatprep.subr.bf16.mxu0 %v7895_v11  ;;  %v7928_v11 = vld [vmem:[#allocation7 + $0x404] ss:$16 sps:$4 sm:$0xff]  }
 0x2d3   :  { %5663 = vmatpush2.bf16.msra.mxu1 %v7890_v52  ;;  %v7923_v52 = vld [vmem:[#allocation7 + $0x420] ss:$16 sps:$4 sm:$0xff]  }
 0x2d4   :  { %5664 = vmatprep.subr.bf16.mxu1 %v7898_v56  ;;  %v7998_v56 = vld [vmem:[#allocation7 + $0x620] ss:$16 sps:$4 sm:$0xff]  }
 0x2d5   :  { %5624 = vmatpush2.bf16.msra.mxu0 %v7893_v59  ;;  %v7926_v59 = vld [vmem:[#allocation7 + $0x400] ss:$16 sps:$4 sm:$0xff]  }
 0x2d6   :  { %5625 = vmatprep.subr.bf16.mxu0 %v7901_v16  ;;  %v8004_v16 = vld [vmem:[#allocation7 + $0x600] ss:$16 sps:$4 sm:$0xff]  }
 0x2d7   :  { %5665 = vmatpush2.bf16.msra.mxu1 %v7896_v4  ;;  %v7931_v4 = vld [vmem:[#allocation7 + $0x5e4] ss:$16 sps:$4 sm:$0xff]  }
 0x2d8   :  { %5666 = vmatprep.subr.bf16.mxu1 %v7904_v61  ;;  %v8012_v61 = vld [vmem:[#allocation7 + $0x7e4] ss:$16 sps:$4 sm:$0xff]  }
 0x2d9   :  { %5626 = vmatpush2.bf16.msra.mxu0 %v7899_v0  ;;  %v7934_v0 = vld [vmem:[#allocation7 + $0x5c4] ss:$16 sps:$4 sm:$0xff]  }
 0x2da   :  { %5677 = vmatprep.subr.bf16.mxu0 %v7907_v22  ;;  %v7932_v22 = vld [vmem:[#allocation7 + $0x5c0] ss:$16 sps:$4 sm:$0xff]  }
 0x2db   :  { %5667 = vmatpush2.bf16.msra.mxu1 %v7902_v3  ;;  %v8018_v3 = vld [vmem:[#allocation7 + $0x7c4] ss:$16 sps:$4 sm:$0xff]  }
 0x2dc   :  { %5718 = vmatprep.subr.bf16.mxu1 %v7964_v7  ;;  %v8885_v15 = vpop.f32.mrf.mxu0  ;;  %5628 = vmatmul.mubr.bf16.vlgmr.msra.gmra.mxu0 %v8881_v10  ;;  %v8016_v7 = vld [vmem:[#allocation7 + $0x7c0] ss:$16 sps:$4 sm:$0xff]  }
 0x2dd   :  { %5678 = vmatpush1.bf16.msra.mxu0 %v7905_v9  ;;  %v7935_v9 = vld [vmem:[#allocation7 + $0x5a0] ss:$16 sps:$4 sm:$0xff]  }
 0x2de   :  { %v8889_v17 = vpop.f32.mrf.mxu1  ;;  %5669 = vmatmul.mubr.bf16.vlgmr.msra.gmra.mxu1 %v8883_v14  ;;  %v3811_v19 = vpop.f32.mrf.mxu0  ;;  %5679 = vmatprep.subr.bf16.mxu0 %v7910_v12  ;;  %v7940_v12 = vld [vmem:[#allocation7 + $0x584] ss:$16 sps:$4 sm:$0xff]  }
 0x2df   :  { %5719 = vmatpush1.bf16.msra.mxu1 %v7962_v13  ;;  %v3812_v24 = vadd.f32 %v3811_v19, %v3771_v21  ;;  %v8022_v13 = vld [vmem:[#allocation7 + $0x7a0] ss:$16 sps:$4 sm:$0xff]  }
 0x2e0   :  { %v3852_v27 = vpop.f32.mrf.mxu1  ;;  %5720 = vmatprep.subr.bf16.mxu1 %v7970_v43  ;;  %v3813_v36 = vpop.f32.mrf.mxu0  ;;  %v8030_v43 = vld [vmem:[#allocation7 + $0x784] ss:$16 sps:$4 sm:$0xff]   ;;  %v7938_v21 = vld [vmem:[#allocation7 + $0x580] ss:$16 sps:$4 sm:$0xff]  }
 0x2e1   :  { %v3853_v29 = vadd.f32 %v3852_v27, %v3812_v24  ;;  %5680 = vmatpush1.bf16.msra.mxu0 %v7908_v60  ;;  %v7943_v60 = vld [vmem:[#allocation7 + $0x564] ss:$16 sps:$4 sm:$0xff]   ;;  %v8028_v19 = vld [vmem:[#allocation7 + $0x780] ss:$16 sps:$4 sm:$0xff]  }
 0x2e2   :  { %v3854_v30 = vpop.f32.mrf.mxu1  ;;  %v3814_v31 = vpop.f32.mrf.mxu0  ;;  %5681 = vmatprep.subr.bf16.mxu0 %v7913_v20  ;;  %v8036_v20 = vld [vmem:[#allocation7 + $0x764] ss:$16 sps:$4 sm:$0xff]   ;;  %v8034_v27 = vld [vmem:[#allocation7 + $0x760] ss:$16 sps:$4 sm:$0xff]  }
 0x2e3   :  { %5721 = vmatpush1.bf16.msra.mxu1 %v7968_v33  ;;  %v4026_v53 = vmax.f32 %v3853_v29, 0.0  ;;  %v7941_v33 = vld [vmem:[#allocation7 + $0x560] ss:$16 sps:$4 sm:$0xff]   ;;  %v7946_v24 = vld [vmem:[#allocation7 + $0x544] ss:$16 sps:$4 sm:$0xff]   ;;  %v3810_v29 = vadd.f32 %v8885_v15, %v8871_v55 }
 0x2e4   :  { %v3855_v35 = vpop.f32.mrf.mxu1  ;;  %5722 = vmatprep.subr.bf16.mxu1 %v7976_v28  ;;  %v8042_v28 = vld [vmem:[#allocation7 + $0x744] ss:$16 sps:$4 sm:$0xff]   ;;  %v7944_v36 = vld [vmem:[#allocation7 + $0x540] ss:$16 sps:$4 sm:$0xff]   ;;  %v7955_v55 = vld [vmem:[#allocation7 + $0xec] ss:$16 sps:$4 sm:$0xff]  }
 0x2e5   :  { %v8892_v5 = vpack.c.bf16 %v4026_v53, %v4026_v53  ;;  %5682 = vmatpush1.bf16.msra.mxu0 %v7911_v57  ;;  %v7949_v30 = vld [vmem:[#allocation7 + $0x524] ss:$16 sps:$4 sm:$0xff]   ;;  %v8040_v57 = vld [vmem:[#allocation7 + $0x740] ss:$16 sps:$4 sm:$0xff]  }
 0x2e6   :  { %5683 = vmatprep.subr.bf16.mxu0 %v7916_v32  ;;  %v8048_v31 = vld [vmem:[#allocation7 + $0x724] ss:$16 sps:$4 sm:$0xff]   ;;  %v7947_v32 = vld [vmem:[#allocation7 + $0x520] ss:$16 sps:$4 sm:$0xff]  }
 0x2e7   :  { %5723 = vmatpush1.bf16.msra.mxu1 %v7974_v34  ;;  %5709 = vmatprep.mubr.bf16.mxu0 %v8892_v5  ;;  %v3851_v34 = vadd.f32 %v8889_v17, %v3810_v29  ;;  %v7952_v53 = vld [vmem:[#allocation7 + $0x504] ss:$16 sps:$4 sm:$0xff]   ;;  %v8046_v35 = vld [vmem:[#allocation7 + $0x720] ss:$16 sps:$4 sm:$0xff]   ;;  %v7958_v17 = vld [vmem:[#allocation7 + $0xcc] ss:$16 sps:$4 sm:$0xff]  }
 0x2e8   :  { %5724 = vmatprep.subr.bf16.mxu1 %v7982_v38  ;;  %v8054_v38 = vld [vmem:[#allocation7 + $0x704] ss:$16 sps:$4 sm:$0xff]   ;;  %v8052_v15 = vld [vmem:[#allocation7 + $0x700] ss:$16 sps:$4 sm:$0xff]   ;;  %v8039_v29 = vld [vmem:[#allocation7 + $0x10c] ss:$16 sps:$4 sm:$0xff]  }
 0x2e9   :  { %5684 = vmatpush1.bf16.msra.mxu0 %v7914_v18  ;;  %v7950_v18 = vld [vmem:[#allocation7 + $0x500] ss:$16 sps:$4 sm:$0xff]  }
 0x2ea   :  { %5685 = vmatprep.subr.bf16.mxu0 %v7919_v39  ;;  %v4025_v39 = vmax.f32 %v3851_v34, 0.0 }
 0x2eb   :  { %5725 = vmatpush1.bf16.msra.mxu1 %v7980_v41  ;;  %v8060_v41 = vld [vmem:[#allocation7 + $0x2ec] ss:$16 sps:$4 sm:$0xff]  }
 0x2ec   :  { %5726 = vmatprep.subr.bf16.mxu1 %v7988_v45  ;;  %v7953_v45 = vld [vmem:[#allocation7 + $0xe8] ss:$16 sps:$4 sm:$0xff]  }
 0x2ed   :  { %5686 = vmatpush1.bf16.msra.mxu0 %v7917_v23  ;;  %v8898_v23 = vpack.c.bf16 %v4025_v39, %v4025_v39 }
 0x2ee   :  { %5687 = vmatprep.subr.bf16.mxu0 %v7922_v42 }
 0x2ef   :  { %5727 = vmatpush1.bf16.msra.mxu1 %v7986_v63 }
 0x2f0   :  { %5728 = vmatprep.subr.bf16.mxu1 %v7994_v47  ;;  %v7956_v47 = vld [vmem:[#allocation7 + $0xc8] ss:$16 sps:$4 sm:$0xff]  }
 0x2f1   :  { %5688 = vmatpush1.bf16.msra.mxu0 %v7920_v54 }
 0x2f2   :  { %5689 = vmatprep.subr.bf16.mxu0 %v7925_v49  ;;  %v7961_v49 = vld [vmem:[#allocation7 + $0xac] ss:$16 sps:$4 sm:$0xff]  }
 0x2f3   :  { %5729 = vmatpush1.bf16.msra.mxu1 %v7992_v50 }
 0x2f4   :  { %5730 = vmatprep.subr.bf16.mxu1 %v8000_v51 }
 0x2f5   :  { %5690 = vmatpush1.bf16.msra.mxu0 %v7923_v52 }
 0x2f6   :  { %5691 = vmatprep.subr.bf16.mxu0 %v7928_v11  ;;  %v7959_v11 = vld [vmem:[#allocation7 + $0xa8] ss:$16 sps:$4 sm:$0xff]  }
 0x2f7   :  { %5731 = vmatpush1.bf16.msra.mxu1 %v7998_v56 }
 0x2f8   :  { %5732 = vmatprep.subr.bf16.mxu1 %v8006_v58  ;;  %v7967_v58 = vld [vmem:[#allocation7 + $0x8c] ss:$16 sps:$4 sm:$0xff]  }
 0x2f9   :  { %5692 = vmatpush1.bf16.msra.mxu0 %v7926_v59 }
 0x2fa   :  { %5693 = vmatprep.subr.bf16.mxu0 %v7931_v4  ;;  %v7965_v4 = vld [vmem:[#allocation7 + $0x88] ss:$16 sps:$4 sm:$0xff]  }
 0x2fb   :  { %5733 = vmatpush1.bf16.msra.mxu1 %v8004_v16  ;;  %v7973_v16 = vld [vmem:[#allocation7 + $0x6c] ss:$16 sps:$4 sm:$0xff]  }
 0x2fc   :  { %5734 = vmatprep.subr.bf16.mxu1 %v8012_v61  ;;  %v7979_v61 = vld [vmem:[#allocation7 + $0x4c] ss:$16 sps:$4 sm:$0xff]  }
 0x2fd   :  { %5694 = vmatpush2.bf16.msra.mxu0 %v7929_v62  ;;  %v7977_v62 = vld [vmem:[#allocation7 + $0x48] ss:$16 sps:$4 sm:$0xff]  }
 0x2fe   :  { %5695 = vmatprep.subr.bf16.mxu0 %v7934_v0  ;;  %v7985_v0 = vld [vmem:[#allocation7 + $0x2c] ss:$16 sps:$4 sm:$0xff]  }
 0x2ff   :  { %5735 = vmatpush2.bf16.msra.mxu1 %v8010_v1  ;;  %v7983_v1 = vld [vmem:[#allocation7 + $0x28] ss:$16 sps:$4 sm:$0xff]  }
 0x300   :  { %5736 = vmatprep.subr.bf16.mxu1 %v8018_v3  ;;  %v7991_v3 = vld [vmem:[#allocation7 + $0xc] ss:$16 sps:$4 sm:$0xff]  }
 0x301   :  { %5696 = vmatpush2.bf16.msra.mxu0 %v7932_v22  ;;  %v7989_v22 = vld [vmem:[#allocation7 + $0x8] ss:$16 sps:$4 sm:$0xff]  }
 0x302   :  { %5697 = vmatprep.subr.bf16.mxu0 %v7937_v25  ;;  %v7997_v25 = vld [vmem:[#allocation7 + $0x1ec] ss:$16 sps:$4 sm:$0xff]  }
 0x303   :  { %5737 = vmatpush2.bf16.msra.mxu1 %v8016_v7  ;;  %v7995_v7 = vld [vmem:[#allocation7 + $0x1e8] ss:$16 sps:$4 sm:$0xff]  }
 0x304   :  { %5738 = vmatprep.subr.bf16.mxu1 %v8024_v8  ;;  %v8003_v8 = vld [vmem:[#allocation7 + $0x1cc] ss:$16 sps:$4 sm:$0xff]  }
 0x305   :  { %5698 = vmatpush2.bf16.msra.mxu0 %v7935_v9  ;;  %v8001_v9 = vld [vmem:[#allocation7 + $0x1c8] ss:$16 sps:$4 sm:$0xff]  }
 0x306   :  { %5699 = vmatprep.subr.bf16.mxu0 %v7940_v12  ;;  %v8009_v12 = vld [vmem:[#allocation7 + $0x1ac] ss:$16 sps:$4 sm:$0xff]  }
 0x307   :  { %5739 = vmatpush2.bf16.msra.mxu1 %v8022_v13  ;;  %v8007_v13 = vld [vmem:[#allocation7 + $0x1a8] ss:$16 sps:$4 sm:$0xff]  }
 0x308   :  { %5740 = vmatprep.subr.bf16.mxu1 %v8030_v43  ;;  %v8015_v43 = vld [vmem:[#allocation7 + $0x18c] ss:$16 sps:$4 sm:$0xff]  }
 0x309   :  { %5700 = vmatpush2.bf16.msra.mxu0 %v7938_v21  ;;  %v8013_v21 = vld [vmem:[#allocation7 + $0x188] ss:$16 sps:$4 sm:$0xff]  }
 0x30a   :  { %5701 = vmatprep.subr.bf16.mxu0 %v7943_v60  ;;  %v8021_v60 = vld [vmem:[#allocation7 + $0x16c] ss:$16 sps:$4 sm:$0xff]  }
 0x30b   :  { %5741 = vmatpush2.bf16.msra.mxu1 %v8028_v19  ;;  %v8019_v19 = vld [vmem:[#allocation7 + $0x168] ss:$16 sps:$4 sm:$0xff]  }
 0x30c   :  { %5742 = vmatprep.subr.bf16.mxu1 %v8036_v20  ;;  %v8027_v20 = vld [vmem:[#allocation7 + $0x14c] ss:$16 sps:$4 sm:$0xff]  }
 0x30d   :  { %5702 = vmatpush2.bf16.msra.mxu0 %v7941_v33  ;;  %v8025_v33 = vld [vmem:[#allocation7 + $0x148] ss:$16 sps:$4 sm:$0xff]  }
 0x30e   :  { %5703 = vmatprep.subr.bf16.mxu0 %v7946_v24  ;;  %v8033_v24 = vld [vmem:[#allocation7 + $0x12c] ss:$16 sps:$4 sm:$0xff]  }
 0x30f   :  { %5743 = vmatpush2.bf16.msra.mxu1 %v8034_v27  ;;  %v791_v27 = vsub.s32 6, %v8728_v44 }
 0x310   :  { %5744 = vmatprep.subr.bf16.mxu1 %v8042_v28  ;;  %v795_v28 = vsub.s32 7, %v8728_v44  ;;  %v8293_v44 = vld [vmem:[#allocation13 + $0x68] sm:$0xff]  }
 0x311   :  { %5704 = vmatpush2.bf16.msra.mxu0 %v7944_v36  ;;  %v8031_v36 = vld [vmem:[#allocation7 + $0x128] ss:$16 sps:$4 sm:$0xff]  }
 0x312   :  { %5705 = vmatprep.subr.bf16.mxu0 %v7949_v30  ;;  %v792_v30 = vrot.slane %v8859_v40, %v791_v27  ;;  %v8099_v27 = vld [vmem:[#allocation7 + $0x5cc] ss:$16 sps:$4 sm:$0xff]  }
 0x313   :  { %5745 = vmatpush2.bf16.msra.mxu1 %v8040_v57  ;;  %v796_v57 = vrot.slane %v8859_v40, %v795_v28  ;;  %v8094_v28 = vld [vmem:[#allocation7 + $0x228] ss:$16 sps:$4 sm:$0xff]  }
 0x314   :  { %5746 = vmatprep.subr.bf16.mxu1 %v8048_v31  ;;  %v8037_v31 = vld [vmem:[#allocation7 + $0x108] ss:$16 sps:$4 sm:$0xff]  }
 0x315   :  { %5706 = vmatpush2.bf16.msra.mxu0 %v7947_v32  ;;  %v8045_v32 = vld [vmem:[#allocation7 + $0x4ec] ss:$16 sps:$4 sm:$0xff]  }
 0x316   :  { %5707 = vmatprep.subr.bf16.mxu0 %v7952_v53 }
 0x317   :  { %5747 = vmatpush2.bf16.msra.mxu1 %v8046_v35  ;;  %v8043_v35 = vld [vmem:[#allocation7 + $0x4e8] ss:$16 sps:$4 sm:$0xff]  }
 0x318   :  { %5748 = vmatprep.subr.bf16.mxu1 %v8054_v38  ;;  %v8051_v38 = vld [vmem:[#allocation7 + $0x4cc] ss:$16 sps:$4 sm:$0xff]  }
 0x319   :  { %5708 = vmatpush2.bf16.msra.mxu0 %v7950_v18 }
 0x31a   :  { %5759 = vmatprep.subr.bf16.mxu0 %v7955_v55 }
 0x31b   :  { %5749 = vmatpush2.bf16.msra.mxu1 %v8052_v15 }
 0x31c   :  { %5800 = vmatprep.subr.bf16.mxu1 %v8060_v41  ;;  %v8900_v42 = vpop.f32.mrf.mxu0  ;;  %5710 = vmatmul.mubr.bf16.vlgmr.msra.gmra.mxu0 %v8898_v23  ;;  %v8049_v41 = vld [vmem:[#allocation7 + $0x4c8] ss:$16 sps:$4 sm:$0xff]  }
 0x31d   :  { %5760 = vmatpush1.bf16.msra.mxu0 %v7953_v45  ;;  %5791 = vmatprep.mubr.bf16.mxu0 %v8862_v46  ;;  %v7971_v46 = vld [vmem:[#allocation7 + $0x68] ss:$16 sps:$4 sm:$0xff]   ;;  %v3892_v34 = vadd.f32 %v8900_v42, %v792_v30  ;;  %v8105_v30 = vld [vmem:[#allocation7 + $0x5ac] ss:$16 sps:$4 sm:$0xff]  }
 0x31e   :  { %v8903_v63 = vpop.f32.mrf.mxu1  ;;  %v8906_v54 = vpop.f32.mrf.mxu0  ;;  %5761 = vmatprep.subr.bf16.mxu0 %v7958_v17  ;;  %v8057_v17 = vld [vmem:[#allocation7 + $0x4ac] ss:$16 sps:$4 sm:$0xff]  }
 0x31f   :  { %v3894_v53 = vadd.f32 %v8906_v54, %v796_v57  ;;  %v3933_v18 = vadd.f32 %v8903_v63, %v3892_v34  ;;  %v8100_v57 = vld [vmem:[#allocation7 + $0x208] ss:$16 sps:$4 sm:$0xff]   ;;  %v8111_v34 = vld [vmem:[#allocation7 + $0x58c] ss:$16 sps:$4 sm:$0xff]  }
 0x320   :  { %v8908_v50 = vpop.f32.mrf.mxu1  ;;  %v3895_v51 = vpop.f32.mrf.mxu0 }
 0x321   :  { %5762 = vmatpush1.bf16.msra.mxu0 %v7956_v47  ;;  %v3935_v55 = vadd.f32 %v8908_v50, %v3894_v53  ;;  %v8063_v50 = vld [vmem:[#allocation7 + $0x48c] ss:$16 sps:$4 sm:$0xff]   ;;  %v8106_v53 = vld [vmem:[#allocation7 + $0x3e8] ss:$16 sps:$4 sm:$0xff]  }
 0x322   :  { %v3936_v52 = vpop.f32.mrf.mxu1  ;;  %v3896_v56 = vpop.f32.mrf.mxu0  ;;  %5763 = vmatprep.subr.bf16.mxu0 %v7961_v49 }
 0x323   :  { %v8055_v52 = vld [vmem:[#allocation7 + $0x4a8] ss:$16 sps:$4 sm:$0xff]  }
 0x324   :  { %v3937_v59 = vpop.f32.mrf.mxu1 }
 0x325   :  { %5764 = vmatpush1.bf16.msra.mxu0 %v7959_v11 }
 0x326   :  { %5765 = vmatprep.subr.bf16.mxu0 %v7967_v58 }
 0x329   :  { %5766 = vmatpush1.bf16.msra.mxu0 %v7965_v4 }
 0x32a   :  { %5767 = vmatprep.subr.bf16.mxu0 %v7973_v16  ;;  %v8061_v16 = vld [vmem:[#allocation7 + $0x488] ss:$16 sps:$4 sm:$0xff]  }
 0x32d   :  { %5768 = vmatpush1.bf16.msra.mxu0 %v7971_v46  ;;  %v8066_v46 = vld [vmem:[#allocation7 + $0x2cc] ss:$16 sps:$4 sm:$0xff]  }
 0x32e   :  { %5769 = vmatprep.subr.bf16.mxu0 %v7979_v61  ;;  %v8069_v61 = vld [vmem:[#allocation7 + $0x46c] ss:$16 sps:$4 sm:$0xff]  }
 0x331   :  { %5770 = vmatpush1.bf16.msra.mxu0 %v7977_v62  ;;  %v8064_v62 = vld [vmem:[#allocation7 + $0x2c8] ss:$16 sps:$4 sm:$0xff]  }
 0x332   :  { %5771 = vmatprep.subr.bf16.mxu0 %v7985_v0  ;;  %v8067_v0 = vld [vmem:[#allocation7 + $0x468] ss:$16 sps:$4 sm:$0xff]  }
 0x335   :  { %5772 = vmatpush1.bf16.msra.mxu0 %v7983_v1  ;;  %v8072_v1 = vld [vmem:[#allocation7 + $0x2ac] ss:$16 sps:$4 sm:$0xff]  }
 0x336   :  { %5773 = vmatprep.subr.bf16.mxu0 %v7991_v3  ;;  %v8075_v3 = vld [vmem:[#allocation7 + $0x44c] ss:$16 sps:$4 sm:$0xff]  }
 0x339   :  { %5774 = vmatpush1.bf16.msra.mxu0 %v7989_v22  ;;  %v8070_v22 = vld [vmem:[#allocation7 + $0x2a8] ss:$16 sps:$4 sm:$0xff]  }
 0x33a   :  { %5775 = vmatprep.subr.bf16.mxu0 %v7997_v25  ;;  %v8073_v25 = vld [vmem:[#allocation7 + $0x448] ss:$16 sps:$4 sm:$0xff]  }
 0x33d   :  { %5776 = vmatpush2.bf16.msra.mxu0 %v7995_v7  ;;  %v8078_v7 = vld [vmem:[#allocation7 + $0x28c] ss:$16 sps:$4 sm:$0xff]  }
 0x33e   :  { %5777 = vmatprep.subr.bf16.mxu0 %v8003_v8  ;;  %v8081_v8 = vld [vmem:[#allocation7 + $0x42c] ss:$16 sps:$4 sm:$0xff]  }
 0x341   :  { %5778 = vmatpush2.bf16.msra.mxu0 %v8001_v9  ;;  %v8076_v9 = vld [vmem:[#allocation7 + $0x288] ss:$16 sps:$4 sm:$0xff]  }
 0x342   :  { %5779 = vmatprep.subr.bf16.mxu0 %v8009_v12  ;;  %v8084_v12 = vld [vmem:[#allocation7 + $0x26c] ss:$16 sps:$4 sm:$0xff]  }
 0x345   :  { %5780 = vmatpush2.bf16.msra.mxu0 %v8007_v13  ;;  %v8087_v13 = vld [vmem:[#allocation7 + $0x40c] ss:$16 sps:$4 sm:$0xff]  }
 0x346   :  { %5781 = vmatprep.subr.bf16.mxu0 %v8015_v43  ;;  %v8082_v43 = vld [vmem:[#allocation7 + $0x268] ss:$16 sps:$4 sm:$0xff]  }
 0x349   :  { %5782 = vmatpush2.bf16.msra.mxu0 %v8013_v21  ;;  %v8085_v21 = vld [vmem:[#allocation7 + $0x408] ss:$16 sps:$4 sm:$0xff]  }
 0x34a   :  { %5783 = vmatprep.subr.bf16.mxu0 %v8021_v60  ;;  %v8090_v60 = vld [vmem:[#allocation7 + $0x24c] ss:$16 sps:$4 sm:$0xff]  }
 0x34d   :  { %5784 = vmatpush2.bf16.msra.mxu0 %v8019_v19  ;;  %v8093_v19 = vld [vmem:[#allocation7 + $0x5ec] ss:$16 sps:$4 sm:$0xff]  }
 0x34e   :  { %5785 = vmatprep.subr.bf16.mxu0 %v8027_v20  ;;  %v8088_v20 = vld [vmem:[#allocation7 + $0x248] ss:$16 sps:$4 sm:$0xff]  }
 0x351   :  { %5786 = vmatpush2.bf16.msra.mxu0 %v8025_v33  ;;  %v8091_v33 = vld [vmem:[#allocation7 + $0x5e8] ss:$16 sps:$4 sm:$0xff]  }
 0x352   :  { %5787 = vmatprep.subr.bf16.mxu0 %v8033_v24  ;;  %v8096_v24 = vld [vmem:[#allocation7 + $0x22c] ss:$16 sps:$4 sm:$0xff]  }
 0x355   :  { %5788 = vmatpush2.bf16.msra.mxu0 %v8031_v36  ;;  %v8097_v36 = vld [vmem:[#allocation7 + $0x5c8] ss:$16 sps:$4 sm:$0xff]  }
 0x356   :  { %5789 = vmatprep.subr.bf16.mxu0 %v8039_v29  ;;  %v8102_v29 = vld [vmem:[#allocation7 + $0x20c] ss:$16 sps:$4 sm:$0xff]  }
 0x359   :  { %5790 = vmatpush2.bf16.msra.mxu0 %v8037_v31  ;;  %v8103_v31 = vld [vmem:[#allocation7 + $0x5a8] ss:$16 sps:$4 sm:$0xff]  }
 0x35a   :  { %5841 = vmatprep.subr.bf16.mxu0 %v8045_v32  ;;  %v8108_v32 = vld [vmem:[#allocation7 + $0x3ec] ss:$16 sps:$4 sm:$0xff]  }
 0x35c   :  { %v3973_v39 = vpop.f32.mrf.mxu0  ;;  %5792 = vmatmul.mubr.bf16.vlgmr.msra.gmra.mxu0 %v8881_v10 }
 0x35d   :  { %v3974_v40 = vadd.f32 %v3973_v39, %v3933_v18  ;;  %5842 = vmatpush1.bf16.msra.mxu0 %v8043_v35  ;;  %5873 = vmatprep.mubr.bf16.mxu0 %v8892_v5  ;;  %v8058_v5 = vld [vmem:[#allocation7 + $0x2e8] ss:$16 sps:$4 sm:$0xff]   ;;  %v8117_v18 = vld [vmem:[#allocation7 + $0x56c] ss:$16 sps:$4 sm:$0xff]  }
 0x35e   :  { %v4014_v15 = vpop.f32.mrf.mxu1  ;;  %v3975_v45 = vpop.f32.mrf.mxu0  ;;  %5843 = vmatprep.subr.bf16.mxu0 %v8051_v38  ;;  %v8109_v35 = vld [vmem:[#allocation7 + $0x588] ss:$16 sps:$4 sm:$0xff]   ;;  %v8114_v38 = vld [vmem:[#allocation7 + $0x3cc] ss:$16 sps:$4 sm:$0xff]  }
 0x35f   :  { %v4015_v42 = vadd.f32 %v4014_v15, %v3974_v40  ;;  %v3976_v47 = vadd.f32 %v3975_v45, %v3935_v55  ;;  %v8112_v39 = vld [vmem:[#allocation7 + $0x3c8] ss:$16 sps:$4 sm:$0xff]   ;;  %v8120_v40 = vld [vmem:[#allocation7 + $0x3ac] ss:$16 sps:$4 sm:$0xff]  }
 0x360   :  { %v4016_v54 = vpop.f32.mrf.mxu1  ;;  %v3977_v49 = vpop.f32.mrf.mxu0  ;;  %v8115_v55 = vld [vmem:[#allocation7 + $0x568] ss:$16 sps:$4 sm:$0xff]   ;;  %v8123_v15 = vld [vmem:[#allocation7 + $0x54c] ss:$16 sps:$4 sm:$0xff]  }
 0x361   :  { %v4017_v51 = vadd.f32 %v4016_v54, %v3976_v47  ;;  %5844 = vmatpush1.bf16.msra.mxu0 %v8049_v41  ;;  %v4027_v10 = vmax.f32 %v4015_v42, 0.0  ;;  %v8118_v41 = vld [vmem:[#allocation7 + $0x3a8] ss:$16 sps:$4 sm:$0xff]   ;;  %v8129_v42 = vld [vmem:[#allocation7 + $0x52c] ss:$16 sps:$4 sm:$0xff]  }
 0x362   :  { %v4018_v63 = vpop.f32.mrf.mxu1  ;;  %v3978_v11 = vpop.f32.mrf.mxu0  ;;  %5845 = vmatprep.subr.bf16.mxu0 %v8057_v17  ;;  %v8121_v45 = vld [vmem:[#allocation7 + $0x548] ss:$16 sps:$4 sm:$0xff]   ;;  %v8126_v17 = vld [vmem:[#allocation7 + $0x38c] ss:$16 sps:$4 sm:$0xff]  }
 0x363   :  { %v4028_v56 = vmax.f32 %v4017_v51, 0.0  ;;  %v8922_v4 = vpack.c.bf16 %v4027_v10, %v4027_v10  ;;  %v8124_v47 = vld [vmem:[#allocation7 + $0x388] ss:$16 sps:$4 sm:$0xff]   ;;  %v8132_v49 = vld [vmem:[#allocation7 + $0x36c] ss:$16 sps:$4 sm:$0xff]  }
 0x364   :  { %v4019_v58 = vpop.f32.mrf.mxu1  ;;  %v8127_v54 = vld [vmem:[#allocation7 + $0x528] ss:$16 sps:$4 sm:$0xff]   ;;  %v8135_v51 = vld [vmem:[#allocation7 + $0x50c] ss:$16 sps:$4 sm:$0xff]   ;;  %v8927_v11 = vld [vmem:[#allocation8] sm:$0xf] }
 0x365   :  { %v8920_v59 = vpack.c.bf16 %v4028_v56, %v4028_v56  ;;  %5846 = vmatpush1.bf16.msra.mxu0 %v8055_v52  ;;  %v8130_v63 = vld [vmem:[#allocation7 + $0x368] ss:$16 sps:$4 sm:$0xff]   ;;  %v8138_v10 = vld [vmem:[#allocation7 + $0x34c] ss:$16 sps:$4 sm:$0xff]   ;;  %v4298_v58 = vrot.slane %v8927_v11, %v8798_v26 }
 0x366   :  { %5847 = vmatprep.subr.bf16.mxu0 %v8063_v50  ;;  %v8133_v52 = vld [vmem:[#allocation7 + $0x508] ss:$16 sps:$4 sm:$0xff]  }
 0x367   :  { %5750 = vmatprep.mubr.bf16.mxu1 %v8920_v59  ;;  %v8195_v50 = vld [vmem:[#allocation10 + $0x74] ss:$8 sps:$4 sm:$0xff]  }
 0x368   :  { %5751 = vmatmul.mubr.bf16.vlgmr.msra.gmra.mxu1 %v8922_v4  ;;  %v8136_v56 = vld [vmem:[#allocation7 + $0x348] ss:$16 sps:$4 sm:$0xff]  }
 0x369   :  { %5801 = vmatpush1.bf16.msra.mxu1 %v8058_v5  ;;  %5832 = vmatprep.mubr.bf16.mxu1 %v8865_v48  ;;  %v8079_v48 = vld [vmem:[#allocation7 + $0x428] ss:$16 sps:$4 sm:$0xff]   ;;  %v8141_v5 = vld [vmem:[#allocation7 + $0x32c] ss:$16 sps:$4 sm:$0xff]  }
 0x36a   :  { %5848 = vmatpush1.bf16.msra.mxu0 %v8061_v16  ;;  %5802 = vmatprep.subr.bf16.mxu1 %v8066_v46  ;;  %v8193_v16 = vld [vmem:[#allocation10 + $0x70] ss:$8 sps:$4 sm:$0xff]   ;;  %v4302_v46 = vrot.slane %v8927_v11, %v8803_v37 }
 0x36b   :  { %5849 = vmatprep.subr.bf16.mxu0 %v8069_v61  ;;  %v8198_v61 = vld [vmem:[#allocation10 + $0x64] ss:$8 sps:$4 sm:$0xff]  }
 0x36d   :  { %5803 = vmatpush1.bf16.msra.mxu1 %v8064_v62 }
 0x36e   :  { %5850 = vmatpush1.bf16.msra.mxu0 %v8067_v0  ;;  %5804 = vmatprep.subr.bf16.mxu1 %v8072_v1 }
 0x36f   :  { %5851 = vmatprep.subr.bf16.mxu0 %v8075_v3  ;;  %v8139_v3 = vld [vmem:[#allocation7 + $0x328] ss:$16 sps:$4 sm:$0xff]  }
 0x371   :  { %5805 = vmatpush1.bf16.msra.mxu1 %v8070_v22 }
 0x372   :  { %5852 = vmatpush1.bf16.msra.mxu0 %v8073_v25  ;;  %5806 = vmatprep.subr.bf16.mxu1 %v8078_v7  ;;  %v8144_v25 = vld [vmem:[#allocation7 + $0x30c] ss:$16 sps:$4 sm:$0xff]  }
 0x373   :  { %5853 = vmatprep.subr.bf16.mxu0 %v8081_v8  ;;  %v8196_v7 = vld [vmem:[#allocation10 + $0x60] ss:$8 sps:$4 sm:$0xff]  }
 0x375   :  { %5807 = vmatpush1.bf16.msra.mxu1 %v8076_v9 }
 0x376   :  { %5854 = vmatpush1.bf16.msra.mxu0 %v8079_v48  ;;  %5808 = vmatprep.subr.bf16.mxu1 %v8084_v12  ;;  %v8201_v12 = vld [vmem:[#allocation10 + $0x54] ss:$8 sps:$4 sm:$0xff]  }
 0x377   :  { %5855 = vmatprep.subr.bf16.mxu0 %v8087_v13 }
 0x379   :  { %5809 = vmatpush1.bf16.msra.mxu1 %v8082_v43 }
 0x37a   :  { %5856 = vmatpush1.bf16.msra.mxu0 %v8085_v21  ;;  %5810 = vmatprep.subr.bf16.mxu1 %v8090_v60  ;;  %v8142_v60 = vld [vmem:[#allocation7 + $0x308] ss:$16 sps:$4 sm:$0xff]  }
 0x37b   :  { %5857 = vmatprep.subr.bf16.mxu0 %v8093_v19 }
 0x37d   :  { %5811 = vmatpush1.bf16.msra.mxu1 %v8088_v20  ;;  %v8199_v20 = vld [vmem:[#allocation10 + $0x50] ss:$8 sps:$4 sm:$0xff]  }
 0x37e   :  { %5858 = vmatpush2.bf16.msra.mxu0 %v8091_v33  ;;  %5812 = vmatprep.subr.bf16.mxu1 %v8096_v24  ;;  %v8204_v24 = vld [vmem:[#allocation10 + $0x44] ss:$8 sps:$4 sm:$0xff]  }
 0x37f   :  { %5859 = vmatprep.subr.bf16.mxu0 %v8099_v27  ;;  %v8145_v27 = vld [vmem:[#allocation7 + $0x6e8] ss:$16 sps:$4 sm:$0xff]  }
 0x381   :  { %5813 = vmatpush1.bf16.msra.mxu1 %v8094_v28  ;;  %v8150_v28 = vld [vmem:[#allocation7 + $0x6cc] ss:$16 sps:$4 sm:$0xff]  }
 0x382   :  { %5860 = vmatpush2.bf16.msra.mxu0 %v8097_v36  ;;  %5814 = vmatprep.subr.bf16.mxu1 %v8102_v29  ;;  %v8202_v36 = vld [vmem:[#allocation10 + $0x40] ss:$8 sps:$4 sm:$0xff]   ;;  %v8207_v29 = vld [vmem:[#allocation10 + $0x34] ss:$8 sps:$4 sm:$0xff]  }
 0x383   :  { %5861 = vmatprep.subr.bf16.mxu0 %v8105_v30  ;;  %v8148_v30 = vld [vmem:[#allocation7 + $0x6c8] ss:$16 sps:$4 sm:$0xff]  }
 0x385   :  { %5815 = vmatpush1.bf16.msra.mxu1 %v8100_v57  ;;  %v8153_v57 = vld [vmem:[#allocation7 + $0x6ac] ss:$16 sps:$4 sm:$0xff]  }
 0x386   :  { %5862 = vmatpush2.bf16.msra.mxu0 %v8103_v31  ;;  %5816 = vmatprep.subr.bf16.mxu1 %v8108_v32  ;;  %v8205_v31 = vld [vmem:[#allocation10 + $0x30] ss:$8 sps:$4 sm:$0xff]   ;;  %v8210_v32 = vld [vmem:[#allocation10 + $0x24] ss:$8 sps:$4 sm:$0xff]  }
 0x387   :  { %5863 = vmatprep.subr.bf16.mxu0 %v8111_v34  ;;  %v8151_v34 = vld [vmem:[#allocation7 + $0x6a8] ss:$16 sps:$4 sm:$0xff]  }
 0x389   :  { %5817 = vmatpush2.bf16.msra.mxu1 %v8106_v53  ;;  %v8156_v53 = vld [vmem:[#allocation7 + $0x68c] ss:$16 sps:$4 sm:$0xff]  }
 0x38a   :  { %5864 = vmatpush2.bf16.msra.mxu0 %v8109_v35  ;;  %5818 = vmatprep.subr.bf16.mxu1 %v8114_v38  ;;  %v8208_v35 = vld [vmem:[#allocation10 + $0x20] ss:$8 sps:$4 sm:$0xff]   ;;  %v8213_v38 = vld [vmem:[#allocation10 + $0x14] ss:$8 sps:$4 sm:$0xff]  }
 0x38b   :  { %5865 = vmatprep.subr.bf16.mxu0 %v8117_v18  ;;  %v8159_v18 = vld [vmem:[#allocation7 + $0x66c] ss:$16 sps:$4 sm:$0xff]  }
 0x38d   :  { %5819 = vmatpush2.bf16.msra.mxu1 %v8112_v39  ;;  %v8216_v39 = vld [vmem:[#allocation10 + $0x4] ss:$8 sps:$4 sm:$0xff]  }
 0x38e   :  { %5866 = vmatpush2.bf16.msra.mxu0 %v8115_v55  ;;  %5820 = vmatprep.subr.bf16.mxu1 %v8120_v40  ;;  %v8157_v55 = vld [vmem:[#allocation7 + $0x668] ss:$16 sps:$4 sm:$0xff]   ;;  %v8162_v40 = vld [vmem:[#allocation7 + $0x64c] ss:$16 sps:$4 sm:$0xff]  }
 0x38f   :  { %5867 = vmatprep.subr.bf16.mxu0 %v8123_v15  ;;  %v8214_v15 = vld [vmem:[#allocation10] ss:$8 sps:$4 sm:$0xff]  }
 0x391   :  { %5821 = vmatpush2.bf16.msra.mxu1 %v8118_v41  ;;  %v8219_v41 = vld [vmem:[#allocation10 + $0xf4] ss:$8 sps:$4 sm:$0xff]  }
 0x392   :  { %5868 = vmatpush2.bf16.msra.mxu0 %v8121_v45  ;;  %5822 = vmatprep.subr.bf16.mxu1 %v8126_v17  ;;  %v8160_v45 = vld [vmem:[#allocation7 + $0x648] ss:$16 sps:$4 sm:$0xff]   ;;  %v8165_v17 = vld [vmem:[#allocation7 + $0x62c] ss:$16 sps:$4 sm:$0xff]  }
 0x393   :  { %5869 = vmatprep.subr.bf16.mxu0 %v8129_v42  ;;  %v8217_v42 = vld [vmem:[#allocation10 + $0xf0] ss:$8 sps:$4 sm:$0xff]  }
 0x395   :  { %5823 = vmatpush2.bf16.msra.mxu1 %v8124_v47  ;;  %v8222_v47 = vld [vmem:[#allocation10 + $0xe4] ss:$8 sps:$4 sm:$0xff]  }
 0x396   :  { %5870 = vmatpush2.bf16.msra.mxu0 %v8127_v54  ;;  %5824 = vmatprep.subr.bf16.mxu1 %v8132_v49  ;;  %v8163_v54 = vld [vmem:[#allocation7 + $0x628] ss:$16 sps:$4 sm:$0xff]   ;;  %v8168_v49 = vld [vmem:[#allocation7 + $0x60c] ss:$16 sps:$4 sm:$0xff]  }
 0x397   :  { %5871 = vmatprep.subr.bf16.mxu0 %v8135_v51  ;;  %v8220_v51 = vld [vmem:[#allocation10 + $0xe0] ss:$8 sps:$4 sm:$0xff]  }
 0x399   :  { %5825 = vmatpush2.bf16.msra.mxu1 %v8130_v63  ;;  %v8225_v63 = vld [vmem:[#allocation10 + $0xd4] ss:$8 sps:$4 sm:$0xff]  }
 0x39a   :  { %5872 = vmatpush2.bf16.msra.mxu0 %v8133_v52  ;;  %5826 = vmatprep.subr.bf16.mxu1 %v8138_v10  ;;  %v8166_v52 = vld [vmem:[#allocation7 + $0x608] ss:$16 sps:$4 sm:$0xff]   ;;  %v8171_v10 = vld [vmem:[#allocation7 + $0x7ec] ss:$16 sps:$4 sm:$0xff]  }
 0x39b   :  { %6327 = vmatprep.subr.bf16.mxu0 %v8195_v50  ;;  %v8223_v50 = vld [vmem:[#allocation10 + $0xd0] ss:$8 sps:$4 sm:$0xff]  }
 0x39c   :  { %v5629_v62 = vpop.f32.mrf.mxu0 }
 0x39d   :  { %v5630_v0 = vadd.f32 %v5629_v62, %v4298_v58  ;;  %5827 = vmatpush2.bf16.msra.mxu1 %v8136_v56  ;;  %5874 = vmatmul.mubr.bf16.vlgmr.msra.gmra.mxu0 %v8898_v23  ;;  %v8147_v23 = vld [vmem:[#allocation7 + $0x6ec] ss:$16 sps:$4 sm:$0xff]   ;;  %v8228_v56 = vld [vmem:[#allocation10 + $0xc4] ss:$8 sps:$4 sm:$0xff]  }
 0x39e   :  { %v5670_v1 = vpop.f32.mrf.mxu1  ;;  %v5631_v22 = vpop.f32.mrf.mxu0  ;;  %5828 = vmatprep.subr.bf16.mxu1 %v8141_v5  ;;  %6328 = vmatpush1.bf16.msra.mxu0 %v8193_v16  ;;  %v8169_v58 = vld [vmem:[#allocation7 + $0x7e8] ss:$16 sps:$4 sm:$0xff]   ;;  %v8174_v5 = vld [vmem:[#allocation7 + $0x7cc] ss:$16 sps:$4 sm:$0xff]  }
 0x39f   :  { %v8934_v8 = vadd.f32 %v5670_v1, %v5630_v0  ;;  %v5632_v9 = vadd.f32 %v5631_v22, %v4302_v46  ;;  %6329 = vmatprep.subr.bf16.mxu0 %v8198_v61  ;;  %v8226_v16 = vld [vmem:[#allocation10 + $0xc0] ss:$8 sps:$4 sm:$0xff]   ;;  %v8231_v46 = vld [vmem:[#allocation10 + $0xb4] ss:$8 sps:$4 sm:$0xff]   ;;  %v8229_v0 = vld [vmem:[#allocation10 + $0xb0] ss:$8 sps:$4 sm:$0xff]  }
 0x3a0   :  { %v5672_v48 = vpop.f32.mrf.mxu1  ;;  %v5633_v13 = vpop.f32.mrf.mxu0  ;;  %v8172_v61 = vld [vmem:[#allocation7 + $0x7c8] ss:$16 sps:$4 sm:$0xff]   ;;  %v8177_v62 = vld [vmem:[#allocation7 + $0x7ac] ss:$16 sps:$4 sm:$0xff]  }
 0x3a1   :  { %v8936_v43 = vadd.f32 %v5672_v48, %v5632_v9  ;;  %5829 = vmatpush2.bf16.msra.mxu1 %v8139_v3  ;;  %v8234_v1 = vld [vmem:[#allocation10 + $0xa4] ss:$8 sps:$4 sm:$0xff]   ;;  %v8180_v22 = vld [vmem:[#allocation7 + $0x78c] ss:$16 sps:$4 sm:$0xff]  }
 0x3a2   :  { %v5674_v21 = vpop.f32.mrf.mxu1  ;;  %v5634_v19 = vpop.f32.mrf.mxu0  ;;  %5830 = vmatprep.subr.bf16.mxu1 %v8144_v25  ;;  %6330 = vmatpush1.bf16.msra.mxu0 %v8196_v7  ;;  %v8175_v3 = vld [vmem:[#allocation7 + $0x7a8] ss:$16 sps:$4 sm:$0xff]   ;;  %v8232_v25 = vld [vmem:[#allocation10 + $0xa0] ss:$8 sps:$4 sm:$0xff]  }
 0x3a3   :  { %6331 = vmatprep.subr.bf16.mxu0 %v8201_v12  ;;  %v8237_v7 = vld [vmem:[#allocation10 + $0x94] ss:$8 sps:$4 sm:$0xff]   ;;  %v8183_v48 = vld [vmem:[#allocation7 + $0x76c] ss:$16 sps:$4 sm:$0xff]   ;;  %v8240_v13 = vld [vmem:[#allocation10 + $0x84] ss:$8 sps:$4 sm:$0xff]  }
 0x3a4   :  { %v5675_v33 = vpop.f32.mrf.mxu1  ;;  %v8178_v9 = vld [vmem:[#allocation7 + $0x788] ss:$16 sps:$4 sm:$0xff]   ;;  %v8235_v12 = vld [vmem:[#allocation10 + $0x90] ss:$8 sps:$4 sm:$0xff]   ;;  %v8238_v19 = vld [vmem:[#allocation10 + $0x80] ss:$8 sps:$4 sm:$0xff]  }
 0x3a5   :  { %5831 = vmatpush2.bf16.msra.mxu1 %v8142_v60  ;;  %v8181_v21 = vld [vmem:[#allocation7 + $0x768] ss:$16 sps:$4 sm:$0xff]   ;;  %v8186_v60 = vld [vmem:[#allocation7 + $0x74c] ss:$16 sps:$4 sm:$0xff]  }
 0x3a6   :  { %5882 = vmatprep.subr.bf16.mxu1 %v8147_v23  ;;  %6332 = vmatpush1.bf16.msra.mxu0 %v8199_v20  ;;  %v8184_v23 = vld [vmem:[#allocation7 + $0x748] ss:$16 sps:$4 sm:$0xff]   ;;  %v8189_v20 = vld [vmem:[#allocation7 + $0x72c] ss:$16 sps:$4 sm:$0xff]  }
 0x3a7   :  { %6333 = vmatprep.subr.bf16.mxu0 %v8204_v24 }
 0x3a8   :  { %5833 = vmatmul.mubr.bf16.vlgmr.msra.gmra.mxu1 %v8883_v14  ;;  %v8154_v14 = vld [vmem:[#allocation7 + $0x688] ss:$16 sps:$4 sm:$0xff]  }
 0x3a9   :  { %5883 = vmatpush1.bf16.msra.mxu1 %v8145_v27  ;;  %5914 = vmatprep.mubr.bf16.mxu1 %v8920_v59  ;;  %v8211_v59 = vld [vmem:[#allocation10 + $0x10] ss:$8 sps:$4 sm:$0xff]   ;;  %v8187_v27 = vld [vmem:[#allocation7 + $0x728] ss:$16 sps:$4 sm:$0xff]  }
 0x3aa   :  { %5884 = vmatprep.subr.bf16.mxu1 %v8150_v28  ;;  %6334 = vmatpush1.bf16.msra.mxu0 %v8202_v36  ;;  %v8192_v36 = vld [vmem:[#allocation7 + $0x70c] ss:$16 sps:$4 sm:$0xff]  }
 0x3ab   :  { %6335 = vmatprep.subr.bf16.mxu0 %v8207_v29 }
 0x3ad   :  { %5885 = vmatpush1.bf16.msra.mxu1 %v8148_v30 }
 0x3ae   :  { %5886 = vmatprep.subr.bf16.mxu1 %v8153_v57  ;;  %6336 = vmatpush1.bf16.msra.mxu0 %v8205_v31  ;;  %v8190_v57 = vld [vmem:[#allocation7 + $0x708] ss:$16 sps:$4 sm:$0xff]  }
 0x3af   :  { %6337 = vmatprep.subr.bf16.mxu0 %v8210_v32  ;;  %v8241_v32 = vld [vmem:[#allocation10 + $0x170] ss:$8 sps:$4 sm:$0xff]  }
 0x3b1   :  { %5887 = vmatpush1.bf16.msra.mxu1 %v8151_v34  ;;  %v8243_v34 = vld [vmem:[#allocation10 + $0x174] ss:$8 sps:$4 sm:$0xff]  }
 0x3b2   :  { %5888 = vmatprep.subr.bf16.mxu1 %v8156_v53  ;;  %6338 = vmatpush1.bf16.msra.mxu0 %v8208_v35  ;;  %v8244_v53 = vld [vmem:[#allocation10 + $0x160] ss:$8 sps:$4 sm:$0xff]   ;;  %v8249_v35 = vld [vmem:[#allocation10 + $0x154] ss:$8 sps:$4 sm:$0xff]  }
 0x3b3   :  { %6339 = vmatprep.subr.bf16.mxu0 %v8213_v38  ;;  %v8247_v38 = vld [vmem:[#allocation10 + $0x150] ss:$8 sps:$4 sm:$0xff]  }
 0x3b5   :  { %5889 = vmatpush1.bf16.msra.mxu1 %v8154_v14  ;;  %v8250_v14 = vld [vmem:[#allocation10 + $0x140] ss:$8 sps:$4 sm:$0xff]  }
 0x3b6   :  { %5890 = vmatprep.subr.bf16.mxu1 %v8159_v18  ;;  %6340 = vmatpush1.bf16.msra.mxu0 %v8211_v59  ;;  %v8255_v18 = vld [vmem:[#allocation10 + $0x134] ss:$8 sps:$4 sm:$0xff]   ;;  %v8253_v59 = vld [vmem:[#allocation10 + $0x130] ss:$8 sps:$4 sm:$0xff]  }
 0x3b7   :  { %6341 = vmatprep.subr.bf16.mxu0 %v8216_v39  ;;  %v8256_v39 = vld [vmem:[#allocation10 + $0x120] ss:$8 sps:$4 sm:$0xff]  }
 0x3b9   :  { %5891 = vmatpush1.bf16.msra.mxu1 %v8157_v55  ;;  %v8261_v55 = vld [vmem:[#allocation10 + $0x114] ss:$8 sps:$4 sm:$0xff]  }
 0x3ba   :  { %5892 = vmatprep.subr.bf16.mxu1 %v8162_v40  ;;  %6342 = vmatpush1.bf16.msra.mxu0 %v8214_v15  ;;  %v8259_v40 = vld [vmem:[#allocation10 + $0x110] ss:$8 sps:$4 sm:$0xff]   ;;  %v8264_v15 = vld [vmem:[#allocation10 + $0x104] ss:$8 sps:$4 sm:$0xff]  }
 0x3bb   :  { %6343 = vmatprep.subr.bf16.mxu0 %v8219_v41  ;;  %v8262_v41 = vld [vmem:[#allocation10 + $0x100] ss:$8 sps:$4 sm:$0xff]  }
 0x3bd   :  { %5893 = vmatpush1.bf16.msra.mxu1 %v8160_v45  ;;  %v8267_v45 = vld [vmem:[#allocation10 + $0x1f4] ss:$8 sps:$4 sm:$0xff]  }
 0x3be   :  { %5894 = vmatprep.subr.bf16.mxu1 %v8165_v17  ;;  %6344 = vmatpush2.bf16.msra.mxu0 %v8217_v42  ;;  %v8265_v17 = vld [vmem:[#allocation10 + $0x1f0] ss:$8 sps:$4 sm:$0xff]   ;;  %v8270_v42 = vld [vmem:[#allocation10 + $0x1e4] ss:$8 sps:$4 sm:$0xff]  }
 0x3bf   :  { %6345 = vmatprep.subr.bf16.mxu0 %v8222_v47  ;;  %v8268_v47 = vld [vmem:[#allocation10 + $0x1e0] ss:$8 sps:$4 sm:$0xff]  }
 0x3c1   :  { %5895 = vmatpush1.bf16.msra.mxu1 %v8163_v54  ;;  %v8273_v54 = vld [vmem:[#allocation10 + $0x1d4] ss:$8 sps:$4 sm:$0xff]  }
 0x3c2   :  { %5896 = vmatprep.subr.bf16.mxu1 %v8168_v49  ;;  %6346 = vmatpush2.bf16.msra.mxu0 %v8220_v51  ;;  %v8271_v49 = vld [vmem:[#allocation10 + $0x1d0] ss:$8 sps:$4 sm:$0xff]   ;;  %v8276_v51 = vld [vmem:[#allocation10 + $0x1c4] ss:$8 sps:$4 sm:$0xff]  }
 0x3c3   :  { %6347 = vmatprep.subr.bf16.mxu0 %v8225_v63  ;;  %v8274_v63 = vld [vmem:[#allocation10 + $0x1c0] ss:$8 sps:$4 sm:$0xff]  }
 0x3c5   :  { %5897 = vmatpush1.bf16.msra.mxu1 %v8166_v52  ;;  %v8279_v52 = vld [vmem:[#allocation10 + $0x1b4] ss:$8 sps:$4 sm:$0xff]  }
 0x3c6   :  { %5898 = vmatprep.subr.bf16.mxu1 %v8171_v10  ;;  %6348 = vmatpush2.bf16.msra.mxu0 %v8223_v50  ;;  %v8277_v50 = vld [vmem:[#allocation10 + $0x1b0] ss:$8 sps:$4 sm:$0xff]  }
 0x3c7   :  { %6349 = vmatprep.subr.bf16.mxu0 %v8228_v56 }
 0x3c9   :  { %5899 = vmatpush2.bf16.msra.mxu1 %v8169_v58  ;;  %v8282_v58 = vld [vmem:[#allocation10 + $0x1a4] ss:$8 sps:$4 sm:$0xff]  }
 0x3ca   :  { %5900 = vmatprep.subr.bf16.mxu1 %v8174_v5  ;;  %6350 = vmatpush2.bf16.msra.mxu0 %v8226_v16  ;;  %v8280_v16 = vld [vmem:[#allocation10 + $0x1a0] ss:$8 sps:$4 sm:$0xff]  }
 0x3cb   :  { %6351 = vmatprep.subr.bf16.mxu0 %v8231_v46 }
 0x3cd   :  { %5901 = vmatpush2.bf16.msra.mxu1 %v8172_v61 }
 0x3ce   :  { %5902 = vmatprep.subr.bf16.mxu1 %v8177_v62  ;;  %6352 = vmatpush2.bf16.msra.mxu0 %v8229_v0  ;;  %v8285_v0 = vld [vmem:[#allocation10 + $0x194] ss:$8 sps:$4 sm:$0xff]  }
 0x3cf   :  { %6353 = vmatprep.subr.bf16.mxu0 %v8234_v1 }
 0x3d1   :  { %5903 = vmatpush2.bf16.msra.mxu1 %v8175_v3  ;;  %v8283_v3 = vld [vmem:[#allocation10 + $0x190] ss:$8 sps:$4 sm:$0xff]  }
 0x3d2   :  { %5904 = vmatprep.subr.bf16.mxu1 %v8180_v22  ;;  %6354 = vmatpush2.bf16.msra.mxu0 %v8232_v25 }
 0x3d3   :  { %6355 = vmatprep.subr.bf16.mxu0 %v8237_v7 }
 0x3d5   :  { %5905 = vmatpush2.bf16.msra.mxu1 %v8178_v9 }
 0x3d6   :  { %5906 = vmatprep.subr.bf16.mxu1 %v8183_v48  ;;  %6356 = vmatpush2.bf16.msra.mxu0 %v8235_v12  ;;  %v8288_v48 = vld [vmem:[#allocation10 + $0x184] ss:$8 sps:$4 sm:$0xff]  }
 0x3d7   :  { %6357 = vmatprep.subr.bf16.mxu0 %v8240_v13  ;;  %v8286_v13 = vld [vmem:[#allocation10 + $0x180] ss:$8 sps:$4 sm:$0xff]  }
 0x3d9   :  { %5907 = vmatpush2.bf16.msra.mxu1 %v8181_v21 }
 0x3da   :  { %5908 = vmatprep.subr.bf16.mxu1 %v8186_v60  ;;  %6358 = vmatpush2.bf16.msra.mxu0 %v8238_v19 }
 0x3dc   :  { %v5711_v33 = vpop.f32.mrf.mxu0 }
 0x3dd   :  { %v8941_v24 = vadd.f32 %v5711_v33, %v8934_v8  ;;  %5909 = vmatpush2.bf16.msra.mxu1 %v8184_v23  ;;  %v8246_v8 = vld [vmem:[#allocation10 + $0x164] ss:$8 sps:$4 sm:$0xff]   ;;  %v4306_v33 = vrot.slane %v8927_v11, %v775_v2  ;;  %v8292_v2 = vld [vmem:[#allocation13 + $0x30] sm:$0xff]  }
 0x3de   :  { %v5713_v28 = vpop.f32.mrf.mxu0  ;;  %5910 = vmatprep.subr.bf16.mxu1 %v8189_v20 }
 0x3df   :  { %v8944_v29 = vadd.f32 %v5713_v28, %v8936_v43  ;;  %v8252_v43 = vld [vmem:[#allocation10 + $0x144] ss:$8 sps:$4 sm:$0xff]  }
 0x3e0   :  { %v5715_v30 = vpop.f32.mrf.mxu0 }
 0x3e1   :  { %5911 = vmatpush2.bf16.msra.mxu1 %v8187_v27  ;;  %v4310_v27 = vrot.slane %v8927_v11, %v779_v6  ;;  %v8294_v6 = vld [vmem:[#allocation13 + $0x28] sm:$0xff]   ;;  %v8295_v11 = vld [vmem:[#allocation13 + $0x60] sm:$0xff]  }
 0x3e2   :  { %v5716_v31 = vpop.f32.mrf.mxu0  ;;  %5912 = vmatprep.subr.bf16.mxu1 %v8192_v36 }
 0x3e5   :  { %5913 = vmatpush2.bf16.msra.mxu1 %v8190_v57 }
 0x3e6   :  { %6368 = vmatprep.subr.bf16.mxu1 %v8243_v34 }
 0x3e8   :  { %5915 = vmatmul.mubr.bf16.vlgmr.msra.gmra.mxu1 %v8922_v4  ;;  %v8258_v4 = vld [vmem:[#allocation10 + $0x124] ss:$8 sps:$4 sm:$0xff]  }
 0x3e9   :  { %6369 = vmatpush1.bf16.msra.mxu1 %v8241_v32 }
 0x3ea   :  { %6370 = vmatprep.subr.bf16.mxu1 %v8246_v8 }
 0x3ed   :  { %6371 = vmatpush1.bf16.msra.mxu1 %v8244_v53 }
 0x3ee   :  { %6372 = vmatprep.subr.bf16.mxu1 %v8249_v35  ;;  %v8289_v35 = vld [vmem:[#allocation13 + $0x78] sm:$0xff]  }
 0x3ef   :  { %7703 = vmatprep.subr.bf16.mxu0 %v8289_v35 }
 0x3f1   :  { %6373 = vmatpush1.bf16.msra.mxu1 %v8247_v38  ;;  %v8290_v38 = vld [vmem:[#allocation13 + $0x38] sm:$0xff]  }
 0x3f2   :  { %6374 = vmatprep.subr.bf16.mxu1 %v8252_v43  ;;  %v8291_v43 = vld [vmem:[#allocation13 + $0x70] sm:$0xff]  }
 0x3f5   :  { %6375 = vmatpush1.bf16.msra.mxu1 %v8250_v14  ;;  %v8296_v14 = vld [vmem:[#allocation13 + $0x20] sm:$0xff]  }
 0x3f6   :  { %6376 = vmatprep.subr.bf16.mxu1 %v8255_v18  ;;  %v8297_v18 = vld [vmem:[#allocation13 + $0x58] sm:$0xff]  }
 0x3f9   :  { %6377 = vmatpush1.bf16.msra.mxu1 %v8253_v59  ;;  %v8298_v59 = vld [vmem:[#allocation13 + $0x18] sm:$0xff]  }
 0x3fa   :  { %6378 = vmatprep.subr.bf16.mxu1 %v8258_v4  ;;  %v8299_v4 = vld [vmem:[#allocation13 + $0x50] sm:$0xff]  }
 0x3fd   :  { %6379 = vmatpush1.bf16.msra.mxu1 %v8256_v39  ;;  %v8300_v39 = vld [vmem:[#allocation13 + $0x10] sm:$0xff]  }
 0x3fe   :  { %6380 = vmatprep.subr.bf16.mxu1 %v8261_v55 }
 0x401   :  { %6381 = vmatpush1.bf16.msra.mxu1 %v8259_v40 }
 0x402   :  { %6382 = vmatprep.subr.bf16.mxu1 %v8264_v15 }
 0x405   :  { %6383 = vmatpush1.bf16.msra.mxu1 %v8262_v41 }
 0x406   :  { %6384 = vmatprep.subr.bf16.mxu1 %v8267_v45 }
 0x409   :  { %6385 = vmatpush2.bf16.msra.mxu1 %v8265_v17 }
 0x40a   :  { %6386 = vmatprep.subr.bf16.mxu1 %v8270_v42 }
 0x40d   :  { %6387 = vmatpush2.bf16.msra.mxu1 %v8268_v47 }
 0x40e   :  { %6388 = vmatprep.subr.bf16.mxu1 %v8273_v54 }
 0x411   :  { %6389 = vmatpush2.bf16.msra.mxu1 %v8271_v49 }
 0x412   :  { %6390 = vmatprep.subr.bf16.mxu1 %v8276_v51 }
 0x415   :  { %6391 = vmatpush2.bf16.msra.mxu1 %v8274_v63  ;;  %v8301_v63 = vld [vmem:[#allocation13 + $0x48] sm:$0xff]  }
 0x416   :  { %6392 = vmatprep.subr.bf16.mxu1 %v8279_v52 }
 0x419   :  { %6393 = vmatpush2.bf16.msra.mxu1 %v8277_v50 }
 0x41a   :  { %6394 = vmatprep.subr.bf16.mxu1 %v8282_v58 }
 0x41c   :  { %v5793_v10 = vpop.f32.mrf.mxu0 }
 0x41d   :  { %6395 = vmatpush2.bf16.msra.mxu1 %v8280_v16  ;;  %v5794_v28 = vadd.f32 %v5793_v10, %v4306_v33  ;;  %v8302_v10 = vld [vmem:[#allocation13 + $0x8] sm:$0xff]   ;;  %v8305_v16 = vld [vmem:[#allocation16 + $0x38] sm:$0xff]  }
 0x41e   :  { %v5795_v56 = vpop.f32.mrf.mxu0  ;;  %6396 = vmatprep.subr.bf16.mxu1 %v8285_v0  ;;  %v8308_v0 = vld [vmem:[#allocation16 + $0x20] sm:$0xff]  }
 0x420   :  { %v5797_v5 = vpop.f32.mrf.mxu0 }
 0x421   :  { %6397 = vmatpush2.bf16.msra.mxu1 %v8283_v3  ;;  %v8304_v5 = vld [vmem:[#allocation13] sm:$0xff]   ;;  %v5995_v3 = vld [vmem:[#allocation11] sm:$0x3] }
 0x422   :  { %v5798_v46 = vpop.f32.mrf.mxu0  ;;  %6398 = vmatprep.subr.bf16.mxu1 %v8288_v48 }
 0x423   :  { %v8619_v46 = vmov 0.0  }
 0x425   :  { %6399 = vmatpush2.bf16.msra.mxu1 %v8286_v13 }
 0x426   :  { %7743 = vmatprep.subr.bf16.mxu1 %v8619_v46 }
 0x428   :  { %v5752_v61 = vpop.f32.mrf.mxu1 }
 0x429   :  { %v5753_v62 = vadd.f32 %v5752_v61, %v8941_v24  ;;  %v8306_v61 = vld [vmem:[#allocation16 + $0x30] sm:$0xff]  }
 0x42a   :  { %v5754_v1 = vpop.f32.mrf.mxu1 }
 0x42b   :  { %v5755_v22 = vadd.f32 %v5754_v1, %v8944_v29  ;;  %v5923_v25 = vmax.f32 %v5753_v62, 0.0  ;;  %v5796_v29 = vadd.f32 %v5795_v56, %v4310_v27  ;;  %v8303_v56 = vld [vmem:[#allocation13 + $0x40] sm:$0xff]   ;;  %v8307_v62 = vld [vmem:[#allocation16 + $0x28] sm:$0xff]   ;;  %v8310_v27 = vld [vmem:[#allocation16 + $0x10] sm:$0xff]  }
 0x42c   :  { %v5756_v7 = vpop.f32.mrf.mxu1  ;;  %v8309_v1 = vld [vmem:[#allocation16 + $0x18] sm:$0xff]  }
 0x42d   :  { %v5924_v9 = vmax.f32 %v5755_v22, 0.0  ;;  %v5927_v60 = vpack.c.bf16 %v5923_v25, %v5923_v25  ;;  %v6000_v22 = vrot.slane %v5995_v3, %v8798_v26  ;;  %v6004_v25 = vrot.slane %v5995_v3, %v8803_v37  ;;  %v8311_v26 = vld [vmem:[#allocation16 + $0x8] sm:$0xff]   ;;  %v8312_v37 = vld [vmem:[#allocation16] sm:$0xff]  }
 0x42e   :  { %v5757_v12 = vpop.f32.mrf.mxu1 }
 0x42f   :  { %v5928_v21 = vpack.c.bf16 %v5924_v9, %v5924_v9 }
 0x431   :  { %6359 = vmatprep.mubr.bf16.mxu0 %v5928_v21 }
 0x432   :  { %6360 = vmatmul.mubr.bf16.vlgmr.msra.gmra.mxu0 %v5927_v60 }
 0x433   :  { %7704 = vmatpush3.bf16.msra.mxu0 %v8290_v38 }
 0x434   :  { %7705 = vmatprep.subr.bf16.mxu0 %v8291_v43 }
 0x437   :  { %7706 = vmatpush3.bf16.msra.mxu0 %v8292_v2 }
 0x438   :  { %7707 = vmatprep.subr.bf16.mxu0 %v8293_v44 }
 0x43b   :  { %7708 = vmatpush3.bf16.msra.mxu0 %v8294_v6  ;;  %v8319_v6 = vld [vmem:[#allocation19 + $0x8] sm:$0xff]  }
 0x43c   :  { %7709 = vmatprep.subr.bf16.mxu0 %v8295_v11  ;;  %v8320_v11 = vld [vmem:[#allocation19] sm:$0xff]  }
 0x43f   :  { %7710 = vmatpush3.bf16.msra.mxu0 %v8296_v14  ;;  %v7685_v14 = vld [vmem:[#allocation17] ss:$0 sm:$0xff] }
 0x440   :  { %7711 = vmatprep.subr.bf16.mxu0 %v8297_v18 }
 0x443   :  { %7712 = vmatpush3.bf16.msra.mxu0 %v8298_v59 }
 0x444   :  { %7713 = vmatprep.subr.bf16.mxu0 %v8299_v4 }
 0x447   :  { %7714 = vmatpush3.bf16.msra.mxu0 %v8300_v39 }
 0x448   :  { %7715 = vmatprep.subr.bf16.mxu0 %v8301_v63 }
 0x44b   :  { %7716 = vmatpush3.bf16.msra.mxu0 %v8302_v10 }
 0x44c   :  { %7717 = vmatprep.subr.bf16.mxu0 %v8303_v56 }
 0x44f   :  { %7718 = vmatpush3.bf16.msra.mxu0 %v8304_v5 }
 0x450   :  { %7763 = vmatprep.subr.bf16.mxu0 %v8619_v46 }
 0x45d   :  { %v5875_v19 = vpop.f32.mrf.mxu0 }
 0x45f   :  { %v5877_v23 = vpop.f32.mrf.mxu0 }
 0x461   :  { %v5879_v20 = vpop.f32.mrf.mxu0 }
 0x463   :  { %v5880_v24 = vpop.f32.mrf.mxu0 }
 0x468   :  { %v5834_v36 = vpop.f32.mrf.mxu1 }
 0x469   :  { %v5835_v30 = vadd.f32 %v5834_v36, %v5794_v28  ;;  %v8313_v28 = vld [vmem:[#allocation19 + $0x38] sm:$0xff]   ;;  %v8314_v36 = vld [vmem:[#allocation19 + $0x30] sm:$0xff]  }
 0x46a   :  { %v5836_v57 = vpop.f32.mrf.mxu1 }
 0x46b   :  { %v5837_v31 = vadd.f32 %v5836_v57, %v5796_v29  ;;  %v5876_v32 = vadd.f32 %v5875_v19, %v5835_v30  ;;  %v8315_v29 = vld [vmem:[#allocation19 + $0x28] sm:$0xff]   ;;  %v8316_v30 = vld [vmem:[#allocation19 + $0x20] sm:$0xff]   ;;  %v8317_v57 = vld [vmem:[#allocation19 + $0x18] sm:$0xff]  }
 0x46c   :  { %v5838_v34 = vpop.f32.mrf.mxu1 }
 0x46d   :  { %v5878_v8 = vadd.f32 %v5877_v23, %v5837_v31  ;;  %v8318_v31 = vld [vmem:[#allocation19 + $0x10] sm:$0xff]   ;;  %v7668_v34 = vld [vmem:[#allocation14] ss:$0 sm:$0xff] }
 0x46e   :  { %v5839_v53 = vpop.f32.mrf.mxu1 }
 0x4a8   :  { %v5916_v55 = vpop.f32.mrf.mxu1 }
 0x4a9   :  { %v5917_v40 = vadd.f32 %v5916_v55, %v5876_v32 }
 0x4aa   :  { %v5918_v15 = vpop.f32.mrf.mxu1 }
 0x4ab   :  { %v5919_v41 = vadd.f32 %v5918_v15, %v5878_v8  ;;  %v5925_v45 = vmax.f32 %v5917_v40, 0.0 }
 0x4ac   :  { %v5920_v17 = vpop.f32.mrf.mxu1 }
 0x4ad   :  { %v5926_v42 = vmax.f32 %v5919_v41, 0.0  ;;  %v5929_v49 = vpack.c.bf16 %v5925_v45, %v5925_v45  ;;  %v7694_v41 = vld [vmem:[#allocation20] ss:$0 sm:$0xff] }
 0x4ae   :  { %v5921_v47 = vpop.f32.mrf.mxu1 }
 0x4af   :  { %v5930_v54 = vpack.c.bf16 %v5926_v42, %v5926_v42 }
 0x4b1   :  { %6400 = vmatprep.mubr.bf16.mxu1 %v5930_v54 }
 0x4b2   :  { %6401 = vmatmul.mubr.bf16.vlgmr.msra.gmra.mxu1 %v5929_v49 }
 0x4b3   :  { %7744 = vmatpush3.bf16.msra.mxu1 %v8305_v16  ;;  %7759 = vmatprep.mubr.msk.bf16.mxu1 %vm8620_vm0, %v8619_v46 }
 0x4b4   :  { %7745 = vmatprep.subr.bf16.mxu1 %v8619_v46 }
 0x4b7   :  { %7746 = vmatpush3.bf16.msra.mxu1 %v8306_v61 }
 0x4b8   :  { %7747 = vmatprep.subr.bf16.mxu1 %v8619_v46 }
 0x4bb   :  { %7748 = vmatpush3.bf16.msra.mxu1 %v8307_v62 }
 0x4bc   :  { %7749 = vmatprep.subr.bf16.mxu1 %v8619_v46 }
 0x4bf   :  { %7750 = vmatpush3.bf16.msra.mxu1 %v8308_v0 }
 0x4c0   :  { %7751 = vmatprep.subr.bf16.mxu1 %v8619_v46 }
 0x4c3   :  { %7752 = vmatpush3.bf16.msra.mxu1 %v8309_v1 }
 0x4c4   :  { %7753 = vmatprep.subr.bf16.mxu1 %v8619_v46 }
 0x4c7   :  { %7754 = vmatpush3.bf16.msra.mxu1 %v8310_v27 }
 0x4c8   :  { %7755 = vmatprep.subr.bf16.mxu1 %v8619_v46 }
 0x4cb   :  { %7756 = vmatpush3.bf16.msra.mxu1 %v8311_v26 }
 0x4cc   :  { %7757 = vmatprep.subr.bf16.mxu1 %v8619_v46 }
 0x4cf   :  { %7758 = vmatpush3.bf16.msra.mxu1 %v8312_v37 }
 0x4f2   :  { %v6361_v51 = vpop.f32.mrf.mxu0 }
 0x4f3   :  { %v6362_v7 = vadd.f32 %v6361_v51, %v6000_v22 }
 0x4f4   :  { %v6363_v52 = vpop.f32.mrf.mxu0 }
 0x4f5   :  { %v6364_v48 = vadd.f32 %v6363_v52, %v6004_v25 }
 0x4f6   :  { %v6365_v50 = vpop.f32.mrf.mxu0 }
 0x4f8   :  { %v6366_v58 = vpop.f32.mrf.mxu0 }
 0x572   :  { %v6402_v9 = vpop.f32.mrf.mxu1 }
 0x573   :  { %v6403_v12 = vadd.f32 %v6402_v9, %v6362_v7 }
 0x574   :  { %v6404_v13 = vpop.f32.mrf.mxu1 }
 0x575   :  { %v6405_v21 = vadd.f32 %v6404_v13, %v6364_v48  ;;  %v6409_v60 = vmax.f32 %v6403_v12, 0.0 }
 0x576   :  { %v6406_v19 = vpop.f32.mrf.mxu1 }
 0x577   :  { %v6410_v23 = vmax.f32 %v6405_v21, 0.0  ;;  %v6411_v24 = vpack.c.bf16 %v6409_v60, %v6409_v60 }
 0x578   :  { %v6407_v20 = vpop.f32.mrf.mxu1 }
 0x579   :  { %v6412_v33 = vpack.c.bf16 %v6410_v23, %v6410_v23 }
 0x57b   :  { %6580 = vmatprep.mubr.bf16.mxu0 %v6412_v33 }
 0x57c   :  { %6581 = vmatmul.mubr.bf16.vlgmr.msra.gmra.mxu0 %v6411_v24 }
 0x57d   :  { %7779 = vmatprep.mubr.msk.bf16.mxu0 %vm8620_vm0, %v8619_v46  ;;  %7764 = vmatpush3.bf16.msra.mxu0 %v8313_v28 }
 0x57e   :  { %7765 = vmatprep.subr.bf16.mxu0 %v8619_v46 }
 0x581   :  { %7766 = vmatpush3.bf16.msra.mxu0 %v8314_v36 }
 0x582   :  { %7767 = vmatprep.subr.bf16.mxu0 %v8619_v46 }
 0x585   :  { %7768 = vmatpush3.bf16.msra.mxu0 %v8315_v29 }
 0x586   :  { %7769 = vmatprep.subr.bf16.mxu0 %v8619_v46 }
 0x589   :  { %7770 = vmatpush3.bf16.msra.mxu0 %v8316_v30 }
 0x58a   :  { %7771 = vmatprep.subr.bf16.mxu0 %v8619_v46 }
 0x58d   :  { %7772 = vmatpush3.bf16.msra.mxu0 %v8317_v57 }
 0x58e   :  { %7773 = vmatprep.subr.bf16.mxu0 %v8619_v46 }
 0x591   :  { %7774 = vmatpush3.bf16.msra.mxu0 %v8318_v31 }
 0x592   :  { %7775 = vmatprep.subr.bf16.mxu0 %v8619_v46 }
 0x595   :  { %7776 = vmatpush3.bf16.msra.mxu0 %v8319_v6 }
 0x596   :  { %7777 = vmatprep.subr.bf16.mxu0 %v8619_v46 }
 0x599   :  { %7778 = vmatpush3.bf16.msra.mxu0 %v8320_v11 }
 0x63c   :  { %v7719_v32 = vpop.f32.mrf.mxu0 }
 0x63e   :  { %v7720_v8 = vpop.f32.mrf.mxu0 }
 0x63f   :  { %v7721_v53 = vadd.f32 %v7720_v8, %v7719_v32 }
 0x640   :  { %v7722_v35 = vpop.f32.mrf.mxu0 }
 0x641   :  { %v6583_v38 = vadd.f32 %v7721_v53, %v7668_v34 }
 0x642   :  { %v7723_v43 = vpop.f32.mrf.mxu0 }
 0x643   :  { %v6588_v2 = vmax.f32 %v6583_v38, 0.0 }
 0x645   :  { %v6589_v44 = vpack.c.bf16 %v6588_v2, %v6588_v2 }
 0x647   :  { %7760 = vmatmul.mubr.bf16.vlgmr.msra.gmra.mxu1 %v6589_v44 }
 0x707   :  { %v6695_v18 = vpop.f32.mrf.mxu1 }
 0x708   :  { %v6696_v59 = vadd.f32 %v7685_v14, %v6695_v18 }
 0x709   :  { %v7761_v4 = vpop.f32.mrf.mxu1 }
 0x70a   :  { %v6701_v39 = vmax.f32 %v6696_v59, 0.0 }
 0x70b   :  { %v6698_v55 = vpop.f32.mrf.mxu1 }
 0x70c   :  { %v6702_v40 = vpack.c.bf16 %v6701_v39, %v6701_v39 }
 0x70d   :  { %v7762_v15 = vpop.f32.mrf.mxu1 }
 0x70e   :  { %7780 = vmatmul.mubr.bf16.vlgmr.msra.gmra.mxu0 %v6702_v40 }
 0x7ce   :  { %v6808_v45 = vpop.f32.mrf.mxu0 }
 0x7cf   :  { %v6809_v17 = vadd.f32 %v7694_v41, %v6808_v45 }
 0x7d0   :  { %v7781_v42 = vpop.f32.mrf.mxu0 }
 0x7d1   :  { %6814 = vst [vmem:[#allocation22] sm:$0x3] %v6809_v17 }
 0x7d2   :  { %v6811_v47 = vpop.f32.mrf.mxu0 }
 0x7d3   :  { %8573 = shalt.err (!%p8570_p8)
}
 0x7d4   :  { %6824 = dma.vmem_to_hbm [thread:$0]  %s6822_s29, 32, %s8991_s13, [#allocation4]   ;;  %v7782_v54 = vpop.f32.mrf.mxu0 }
 0x7d5   :  { %8596 = dma.done.wait [#allocation4], 32  }
 0x7d6   :  { %8597 = vsyncadd [#allocation4], 4294967264 }
 0x7d7   :  { %6828 = vsyncpa [#allocation3], 1 }
 0x7d8   :  { %6829 = vsyncpa [#allocation6], 1 }
 0x7d9   :  { %6830 = vsyncpa [#allocation9], 1 }
 0x7da   :  { %6831 = vsyncpa [#allocation12], 1 }
 0x7db   :  { %6832 = vsyncpa [#allocation15], 1 }
 0x7dc   :  { %6833 = vsyncpa [#allocation18], 1 }
 0x7dd   :  { %6834 = vsyncpa [#allocation21], 1 }
 0x7de   :  { %6835 = vsyncpa [#allocation4], 1 }

</bundles_post_ra>
